<compile_context>
chip_gen: v7x
topology: tpu7x:2x2x1
jax: 0.10.0
libtpu: 0.0.40
codegen_flags: <defaults>
</compile_context>

<pallas_src>
import jax
import jax.numpy as jnp
import numpy as np
from jax.experimental import pallas as pl
from jax.experimental.pallas import tpu as pltpu


def _cdiv(a, b):
    return -(-a // b)


def _round_up(x, m):
    return _cdiv(x, m) * m


def _batch_tiling(n):
    """Images-per-step (multiple of 16) and step count for batch-parallel grids."""
    if n <= 16:
        tb = 16
        n_steps = 2 if n > 1 else 1          # >=2 steps so both v7x TCs get work
    else:
        n_steps = max(2, _cdiv(n, 64))       # cap ~64 images/step (VMEM headroom)
        tb = _round_up(_cdiv(n, n_steps), 16)
        n_steps = max(2, _cdiv(n, tb))
    return tb, n_steps, tb * n_steps


# ----------------------------------------------------------------------------
# Pallas kernels
# ----------------------------------------------------------------------------
def _conv_pool_kernel(x_ref, w_ref, b_ref, o_ref):
    """Fused 5x5 VALID conv + bias + ReLU + 2x2 maxpool on H-pair-packed rows.

    x_ref : (TM, L)     bf16  packed rows; lane = p*(W*Cin) + w*Cin + ci
    w_ref : (12, L, F)  bf16  banded weights, index = pool_pos*3 + row_shift
    b_ref : (1, F)      f32   bias tiled over pooled columns
    o_ref : (TM, F)     bf16  pooled activations; lane = wp*Cout + co
    """
    x0 = x_ref[...]                                        # (TM, L) bf16
    tm, l = x0.shape
    # Shifted-row views: pooled row i needs packed rows i, i+1, i+2.  The zero
    # tail only feeds the per-image garbage rows, which downstream never reads.
    xpad = jnp.concatenate([x0, jnp.zeros((16, l), x0.dtype)], axis=0)
    xs = (x0, xpad[1:tm + 1, :], xpad[2:tm + 2, :])
    m = None
    for q in range(4):                                     # 4 pool-window positions
        acc = jnp.dot(xs[0], w_ref[3 * q], preferred_element_type=jnp.float32)
        acc = acc + jnp.dot(xs[1], w_ref[3 * q + 1],
                            preferred_element_type=jnp.float32)
        acc = acc + jnp.dot(xs[2], w_ref[3 * q + 2],
                            preferred_element_type=jnp.float32)
        m = acc if m is None else jnp.maximum(m, acc)      # running max: 2 live f32
    # relu(max_q(conv_q) + b) == max_q(relu(conv_q + b)): shared bias, monotone.
    o_ref[...] = jnp.maximum(m + b_ref[...], 0.0).astype(o_ref.dtype)


def conv_pool_stage(x2d, w_banded, bias_vec, rows_per_img, tb, n_steps):
    """x2d: (Npad*rows_per_img, L) bf16 -> (Npad*rows_per_img, F) bf16."""
    tm = tb * rows_per_img
    n_rows, l = x2d.shape
    f = w_banded.shape[-1]
    assert n_rows == n_steps * tm
    cost = pl.CostEstimate(
        flops=2 * 12 * n_rows * l * f,
        transcendentals=0,
        bytes_accessed=n_rows * l * 2 + 12 * l * f * 2 + n_rows * f * 2,
    )
    return pl.pallas_call(
        _conv_pool_kernel,
        out_shape=jax.ShapeDtypeStruct((n_rows, f), jnp.bfloat16),
        grid=(n_steps,),
        in_specs=[
            pl.BlockSpec((tm, l), lambda i: (i, 0)),
            pl.BlockSpec((12, l, f), lambda i: (0, 0, 0)),
            pl.BlockSpec((1, f), lambda i: (0, 0)),
        ],
        out_specs=pl.BlockSpec((tm, f), lambda i: (i, 0)),
        compiler_params=pltpu.CompilerParams(dimension_semantics=("parallel",)),
        cost_estimate=cost,
    )(x2d, w_banded, bias_vec)


def _fc_chain_kernel(x_ref, w1_ref, b1_ref, w2_ref, b2_ref, w3_ref, b3_ref, o_ref):
    """fc1+ReLU -> fc2+ReLU -> fc3; bf16 operands, f32 accumulation, all in VMEM."""
    h = jnp.dot(x_ref[...], w1_ref[...], preferred_element_type=jnp.float32)
    h = jnp.maximum(h + b1_ref[...], 0.0).astype(jnp.bfloat16)
    h = jnp.dot(h, w2_ref[...], preferred_element_type=jnp.float32)
    h = jnp.maximum(h + b2_ref[...], 0.0).astype(jnp.bfloat16)
    h = jnp.dot(h, w3_ref[...], preferred_element_type=jnp.float32)
    o_ref[...] = h + b3_ref[...]


def fc_chain(x, w1, b1, w2, b2, w3, b3, tb, n_steps):
    """x: (Npad, 400) bf16 -> (Npad, 128) f32 logits (first 10 lanes valid)."""
    n_rows, k = x.shape
    assert n_rows == n_steps * tb
    cost = pl.CostEstimate(
        flops=2 * n_rows * (k + 2 * 128) * 128,
        transcendentals=0,
        bytes_accessed=n_rows * k * 2 + (k + 2 * 128) * 128 * 2 + n_rows * 128 * 4,
    )
    return pl.pallas_call(
        _fc_chain_kernel,
        out_shape=jax.ShapeDtypeStruct((n_rows, 128), jnp.float32),
        grid=(n_steps,),
        in_specs=[
            pl.BlockSpec((tb, k), lambda i: (i, 0)),
            pl.BlockSpec((k, 128), lambda i: (0, 0)),
            pl.BlockSpec((1, 128), lambda i: (0, 0)),
            pl.BlockSpec((128, 128), lambda i: (0, 0)),
            pl.BlockSpec((1, 128), lambda i: (0, 0)),
            pl.BlockSpec((128, 128), lambda i: (0, 0)),
            pl.BlockSpec((1, 128), lambda i: (0, 0)),
        ],
        out_specs=pl.BlockSpec((tb, 128), lambda i: (i, 0)),
        compiler_params=pltpu.CompilerParams(dimension_semantics=("parallel",)),
        cost_estimate=cost,
    )(x, w1, b1, w2, b2, w3, b3)


# ----------------------------------------------------------------------------
# Parameters (PyTorch layout) + one-time prep to TPU-friendly padded layouts.
# ----------------------------------------------------------------------------
def init_params(key):
    ks = jax.random.split(key, 10)

    def u(k, shape, fan_in):
        bound = 1.0 / jnp.sqrt(fan_in)
        return jax.random.uniform(k, shape, jnp.float32, -bound, bound)

    return {
        "conv1_w": u(ks[0], (6, 3, 5, 5), 3 * 5 * 5),
        "conv1_b": u(ks[1], (6,), 3 * 5 * 5),
        "conv2_w": u(ks[2], (16, 6, 5, 5), 6 * 5 * 5),
        "conv2_b": u(ks[3], (16,), 6 * 5 * 5),
        "fc1_w": u(ks[4], (120, 400), 400),
        "fc1_b": u(ks[5], (120,), 400),
        "fc2_w": u(ks[6], (84, 120), 120),
        "fc2_b": u(ks[7], (84,), 120),
        "fc3_w": u(ks[8], (10, 84), 84),
        "fc3_b": u(ks[9], (10,), 84),
    }


def _build_conv_banded(weight, bias, w_in):
    """Banded matrices for conv(5x5, VALID) + 2x2 maxpool on H-pair packed rows.

    Input lanes :  p*(w_in*cin) + w*cin + ci   (p = sub-row within the H pair)
    Output lanes:  wp*cout + co                (wp = pooled column)
    B[q = a*2+b, s] maps packed row (i+s) into pooled row i for pool offset (a,b):
        B[q,s][p*w_in*cin + w*cin + ci, wp*cout + co] =
            W[co, ci, dh, dw]  with dh = 2s+p-a, dw = w-2wp-b, both in [0,5).
    """
    w = np.asarray(weight, np.float32)
    cout, cin, kh, kw = w.shape
    wo = (w_in - kw + 1) // 2
    l_in = 2 * w_in * cin
    f_out = wo * cout
    banded = np.zeros((4, 3, l_in, f_out), np.float32)
    for a in range(2):
        for b in range(2):
            q = a * 2 + b
            for s in range(3):
                for p in range(2):
                    dh = 2 * s + p - a
                    if dh < 0 or dh >= kh:
                        continue
                    for wp in range(wo):
                        for dw in range(kw):
                            wcol = 2 * wp + b + dw
                            if wcol >= w_in:
                                continue
                            r0 = p * w_in * cin + wcol * cin
                            c0 = wp * cout
                            banded[q, s, r0:r0 + cin, c0:c0 + cout] = w[:, :, dh, dw].T
    banded = banded.reshape(12, l_in, f_out)
    bias_vec = np.tile(np.asarray(bias, np.float32), wo).reshape(1, f_out)
    return jnp.asarray(banded, jnp.bfloat16), jnp.asarray(bias_vec, jnp.float32)


def _prep_fc1(w, b):
    # PyTorch fc1 consumes x.view(-1, 400) of a (N,16,5,5) NCHW map, i.e. input
    # feature index c*25 + h*5 + w.  Our conv2 stage emits (h, w, c) order.
    w = np.asarray(w, np.float32).reshape(120, 16, 5, 5)   # (out, c, h, w)
    w = w.transpose(2, 3, 1, 0).reshape(400, 120)          # row = h*80 + w*16 + c
    w = np.pad(w, ((0, 0), (0, 8)))                        # 120 -> 128 output lanes
    b = np.pad(np.asarray(b, np.float32), (0, 8)).reshape(1, 128)
    return jnp.asarray(w, jnp.bfloat16), jnp.asarray(b, jnp.float32)


def _prep_fc(w, b):
    out_f, in_f = w.shape
    w = np.pad(np.asarray(w, np.float32).T, ((0, 128 - in_f), (0, 128 - out_f)))
    b = np.pad(np.asarray(b, np.float32), (0, 128 - out_f)).reshape(1, 128)
    return jnp.asarray(w, jnp.bfloat16), jnp.asarray(b, jnp.float32)


def prep_params(params):
    c1w, c1b = _build_conv_banded(params["conv1_w"], params["conv1_b"], 32)
    c2w, c2b = _build_conv_banded(params["conv2_w"], params["conv2_b"], 14)
    f1w, f1b = _prep_fc1(params["fc1_w"], params["fc1_b"])
    f2w, f2b = _prep_fc(params["fc2_w"], params["fc2_b"])
    f3w, f3b = _prep_fc(params["fc3_w"], params["fc3_b"])
    return {
        "conv1_w": c1w, "conv1_b": c1b, "conv2_w": c2w, "conv2_b": c2b,
        "fc1_w": f1w, "fc1_b": f1b, "fc2_w": f2w, "fc2_b": f2b,
        "fc3_w": f3w, "fc3_b": f3b,
    }


# ----------------------------------------------------------------------------
# Forward pass
# ----------------------------------------------------------------------------
@jax.jit
def net_forward(prepped, x):
    """x: (N, 3, 32, 32) NCHW float32 -> logits (N, 10) float32."""
    n = x.shape[0]
    tb, n_steps, n_pad = _batch_tiling(n)
    if n_pad != n:
        x = jnp.pad(x, ((0, n_pad - n), (0, 0), (0, 0), (0, 0)))
    # NCHW -> NHWC -> H-pair packed 2-D rows (pure reshape, no duplication).
    xh = jnp.transpose(x, (0, 2, 3, 1)).astype(jnp.bfloat16)        # (Np,32,32,3)
    x1 = xh.reshape(n_pad * 16, 2 * 32 * 3)                          # (Np*16, 192)
    y1 = conv_pool_stage(x1, prepped["conv1_w"], prepped["conv1_b"],
                         16, tb, n_steps)                            # (Np*16, 84)
    # conv1 output (14 valid + 2 garbage rows/image) -> conv2 packed input via a
    # pure reshape; the garbage pair becomes packed row 7, which conv2 ignores.
    x2 = y1.reshape(n_pad * 8, 2 * 84)                               # (Np*8, 168)
    y2 = conv_pool_stage(x2, prepped["conv2_w"], prepped["conv2_b"],
                         8, tb, n_steps)                             # (Np*8, 80)
    # fc input: 5 valid rows/image, feature order (h, w, c) baked into fc1 prep.
    x_fc = y2.reshape(n_pad, 8, 80)[:, :5, :].reshape(n_pad, 400)    # (Np, 400)
    logits = fc_chain(x_fc, prepped["fc1_w"], prepped["fc1_b"],
                      prepped["fc2_w"], prepped["fc2_b"],
                      prepped["fc3_w"], prepped["fc3_b"], tb, n_steps)
    return logits[:n, :10]


# Pure-JAX reference (PyTorch semantics, f32) for a numerical sanity check.
def _reference_forward(params, x):
    dn = ("NCHW", "OIHW", "NCHW")
    y = jax.lax.conv_general_dilated(x, params["conv1_w"], (1, 1), "VALID",
                                     dimension_numbers=dn)
    y = jax.nn.relu(y + params["conv1_b"][None, :, None, None])
    y = jax.lax.reduce_window(y, -jnp.inf, jax.lax.max,
                              (1, 1, 2, 2), (1, 1, 2, 2), "VALID")
    y = jax.lax.conv_general_dilated(y, params["conv2_w"], (1, 1), "VALID",
                                     dimension_numbers=dn)
    y = jax.nn.relu(y + params["conv2_b"][None, :, None, None])
    y = jax.lax.reduce_window(y, -jnp.inf, jax.lax.max,
                              (1, 1, 2, 2), (1, 1, 2, 2), "VALID")
    y = y.reshape(y.shape[0], -1)
    y = jax.nn.relu(y @ params["fc1_w"].T + params["fc1_b"])
    y = jax.nn.relu(y @ params["fc2_w"].T + params["fc2_b"])
    return y @ params["fc3_w"].T + params["fc3_b"]


if __name__ == "__main__":
    key = jax.random.PRNGKey(0)
    k_params, k_x = jax.random.split(key)
    params = init_params(k_params)
    prepped = prep_params(params)
    # fc1 (16*5*5 inputs) fixes the spatial size to 32x32 (CIFAR-style).
    x = jax.random.normal(k_x, (2, 3, 32, 32), dtype=jnp.float32)
    out = net_forward(prepped, x)
    jax.block_until_ready(out)
    assert out.shape == (2, 10), out.shape
    assert out.dtype == jnp.float32
    ref = _reference_forward(params, x)
    err = float(jnp.max(jnp.abs(out - ref)))
    scale = float(jnp.max(jnp.abs(ref)))
    assert err <= 5e-2 * max(1.0, scale), (err, scale)   # bf16-operand tolerance
    print("KERNEL_OK")
</pallas_src>

<mosaic_0001>
module attributes {stable_mosaic.version = 11 : i64} {
  func.func @_conv_pool_kernel(%arg0: i32, %arg1: memref<256x192xbf16, #tpu.memory_space<vmem>>, %arg2: memref<12x192x84xbf16, #tpu.memory_space<vmem>>, %arg3: memref<1x84xf32, #tpu.memory_space<vmem>>, %arg4: memref<256x84xbf16, #tpu.memory_space<vmem>>) attributes {dimension_semantics = [#tpu.dimension_semantics<parallel>], iteration_bounds = array<i64: 2>, scalar_prefetch = 0 : i64, scratch_operands = 0 : i64, tpu.core_type = #tpu.core_type<tc>, window_params = [{transform_indices = @transform_0, window_bounds = array<i64: 256, 192>}, {pipeline_mode = #tpu.pipeline_mode<synchronous>, transform_indices = @transform_1, window_bounds = array<i64: 12, 192, 84>}, {pipeline_mode = #tpu.pipeline_mode<synchronous>, transform_indices = @transform_2, window_bounds = array<i64: 1, 84>}, {transform_indices = @transform_3, window_bounds = array<i64: 256, 84>}]} {
    %c0 = arith.constant 0 : index
    %c0_0 = arith.constant 0 : index
    %0 = vector.load %arg1[%c0, %c0_0] : memref<256x192xbf16, #tpu.memory_space<vmem>>, vector<256x192xbf16>
    %cst = arith.constant 0.000000e+00 : bf16
    %1 = vector.broadcast %cst : bf16 to vector<16x192xbf16>
    %2 = tpu.concatenate %0, %1 in 0 : vector<256x192xbf16>, vector<16x192xbf16> -> vector<272x192xbf16>
    %3 = vector.extract_strided_slice %2 {offsets = [1, 0], sizes = [256, 192], strides = [1, 1]} : vector<272x192xbf16> to vector<256x192xbf16>
    %4 = vector.extract_strided_slice %2 {offsets = [2, 0], sizes = [256, 192], strides = [1, 1]} : vector<272x192xbf16> to vector<256x192xbf16>
    %c0_1 = arith.constant 0 : index
    %c0_2 = arith.constant 0 : index
    %c0_3 = arith.constant 0 : index
    %5 = vector.load %arg2[%c0_1, %c0_2, %c0_3] : memref<12x192x84xbf16, #tpu.memory_space<vmem>>, vector<1x192x84xbf16>
    %6 = vector.shape_cast %5 : vector<1x192x84xbf16> to vector<192x84xbf16>
    %cst_4 = arith.constant dense<0.000000e+00> : vector<256x84xf32>
    %7 = tpu.matmul %0, %6, %cst_4 {dimension_numbers = #tpu.dot_dimension_numbers<[1], [0], [0], [1], [0, 0, 1, 1], [], []>} : vector<256x192xbf16>, vector<192x84xbf16>, vector<256x84xf32> -> vector<256x84xf32>
    %c1 = arith.constant 1 : index
    %c0_5 = arith.constant 0 : index
    %c0_6 = arith.constant 0 : index
    %8 = vector.load %arg2[%c1, %c0_5, %c0_6] : memref<12x192x84xbf16, #tpu.memory_space<vmem>>, vector<1x192x84xbf16>
    %9 = vector.shape_cast %8 : vector<1x192x84xbf16> to vector<192x84xbf16>
    %cst_7 = arith.constant dense<0.000000e+00> : vector<256x84xf32>
    %10 = tpu.matmul %3, %9, %cst_7 {dimension_numbers = #tpu.dot_dimension_numbers<[1], [0], [0], [1], [0, 0, 1, 1], [], []>} : vector<256x192xbf16>, vector<192x84xbf16>, vector<256x84xf32> -> vector<256x84xf32>
    %11 = arith.addf %7, %10 : vector<256x84xf32>
    %c2 = arith.constant 2 : index
    %c0_8 = arith.constant 0 : index
    %c0_9 = arith.constant 0 : index
    %12 = vector.load %arg2[%c2, %c0_8, %c0_9] : memref<12x192x84xbf16, #tpu.memory_space<vmem>>, vector<1x192x84xbf16>
    %13 = vector.shape_cast %12 : vector<1x192x84xbf16> to vector<192x84xbf16>
    %cst_10 = arith.constant dense<0.000000e+00> : vector<256x84xf32>
    %14 = tpu.matmul %4, %13, %cst_10 {dimension_numbers = #tpu.dot_dimension_numbers<[1], [0], [0], [1], [0, 0, 1, 1], [], []>} : vector<256x192xbf16>, vector<192x84xbf16>, vector<256x84xf32> -> vector<256x84xf32>
    %15 = arith.addf %11, %14 : vector<256x84xf32>
    %c3 = arith.constant 3 : index
    %c0_11 = arith.constant 0 : index
    %c0_12 = arith.constant 0 : index
    %16 = vector.load %arg2[%c3, %c0_11, %c0_12] : memref<12x192x84xbf16, #tpu.memory_space<vmem>>, vector<1x192x84xbf16>
    %17 = vector.shape_cast %16 : vector<1x192x84xbf16> to vector<192x84xbf16>
    %cst_13 = arith.constant dense<0.000000e+00> : vector<256x84xf32>
    %18 = tpu.matmul %0, %17, %cst_13 {dimension_numbers = #tpu.dot_dimension_numbers<[1], [0], [0], [1], [0, 0, 1, 1], [], []>} : vector<256x192xbf16>, vector<192x84xbf16>, vector<256x84xf32> -> vector<256x84xf32>
    %c4 = arith.constant 4 : index
    %c0_14 = arith.constant 0 : index
    %c0_15 = arith.constant 0 : index
    %19 = vector.load %arg2[%c4, %c0_14, %c0_15] : memref<12x192x84xbf16, #tpu.memory_space<vmem>>, vector<1x192x84xbf16>
    %20 = vector.shape_cast %19 : vector<1x192x84xbf16> to vector<192x84xbf16>
    %cst_16 = arith.constant dense<0.000000e+00> : vector<256x84xf32>
    %21 = tpu.matmul %3, %20, %cst_16 {dimension_numbers = #tpu.dot_dimension_numbers<[1], [0], [0], [1], [0, 0, 1, 1], [], []>} : vector<256x192xbf16>, vector<192x84xbf16>, vector<256x84xf32> -> vector<256x84xf32>
    %22 = arith.addf %18, %21 : vector<256x84xf32>
    %c5 = arith.constant 5 : index
    %c0_17 = arith.constant 0 : index
    %c0_18 = arith.constant 0 : index
    %23 = vector.load %arg2[%c5, %c0_17, %c0_18] : memref<12x192x84xbf16, #tpu.memory_space<vmem>>, vector<1x192x84xbf16>
    %24 = vector.shape_cast %23 : vector<1x192x84xbf16> to vector<192x84xbf16>
    %cst_19 = arith.constant dense<0.000000e+00> : vector<256x84xf32>
    %25 = tpu.matmul %4, %24, %cst_19 {dimension_numbers = #tpu.dot_dimension_numbers<[1], [0], [0], [1], [0, 0, 1, 1], [], []>} : vector<256x192xbf16>, vector<192x84xbf16>, vector<256x84xf32> -> vector<256x84xf32>
    %26 = arith.addf %22, %25 : vector<256x84xf32>
    %27 = arith.maximumf %15, %26 : vector<256x84xf32>
    %c6 = arith.constant 6 : index
    %c0_20 = arith.constant 0 : index
    %c0_21 = arith.constant 0 : index
    %28 = vector.load %arg2[%c6, %c0_20, %c0_21] : memref<12x192x84xbf16, #tpu.memory_space<vmem>>, vector<1x192x84xbf16>
    %29 = vector.shape_cast %28 : vector<1x192x84xbf16> to vector<192x84xbf16>
    %cst_22 = arith.constant dense<0.000000e+00> : vector<256x84xf32>
    %30 = tpu.matmul %0, %29, %cst_22 {dimension_numbers = #tpu.dot_dimension_numbers<[1], [0], [0], [1], [0, 0, 1, 1], [], []>} : vector<256x192xbf16>, vector<192x84xbf16>, vector<256x84xf32> -> vector<256x84xf32>
    %c7 = arith.constant 7 : index
    %c0_23 = arith.constant 0 : index
    %c0_24 = arith.constant 0 : index
    %31 = vector.load %arg2[%c7, %c0_23, %c0_24] : memref<12x192x84xbf16, #tpu.memory_space<vmem>>, vector<1x192x84xbf16>
    %32 = vector.shape_cast %31 : vector<1x192x84xbf16> to vector<192x84xbf16>
    %cst_25 = arith.constant dense<0.000000e+00> : vector<256x84xf32>
    %33 = tpu.matmul %3, %32, %cst_25 {dimension_numbers = #tpu.dot_dimension_numbers<[1], [0], [0], [1], [0, 0, 1, 1], [], []>} : vector<256x192xbf16>, vector<192x84xbf16>, vector<256x84xf32> -> vector<256x84xf32>
    %34 = arith.addf %30, %33 : vector<256x84xf32>
    %c8 = arith.constant 8 : index
    %c0_26 = arith.constant 0 : index
    %c0_27 = arith.constant 0 : index
    %35 = vector.load %arg2[%c8, %c0_26, %c0_27] : memref<12x192x84xbf16, #tpu.memory_space<vmem>>, vector<1x192x84xbf16>
    %36 = vector.shape_cast %35 : vector<1x192x84xbf16> to vector<192x84xbf16>
    %cst_28 = arith.constant dense<0.000000e+00> : vector<256x84xf32>
    %37 = tpu.matmul %4, %36, %cst_28 {dimension_numbers = #tpu.dot_dimension_numbers<[1], [0], [0], [1], [0, 0, 1, 1], [], []>} : vector<256x192xbf16>, vector<192x84xbf16>, vector<256x84xf32> -> vector<256x84xf32>
    %38 = arith.addf %34, %37 : vector<256x84xf32>
    %39 = arith.maximumf %27, %38 : vector<256x84xf32>
    %c9 = arith.constant 9 : index
    %c0_29 = arith.constant 0 : index
    %c0_30 = arith.constant 0 : index
    %40 = vector.load %arg2[%c9, %c0_29, %c0_30] : memref<12x192x84xbf16, #tpu.memory_space<vmem>>, vector<1x192x84xbf16>
    %41 = vector.shape_cast %40 : vector<1x192x84xbf16> to vector<192x84xbf16>
    %cst_31 = arith.constant dense<0.000000e+00> : vector<256x84xf32>
    %42 = tpu.matmul %0, %41, %cst_31 {dimension_numbers = #tpu.dot_dimension_numbers<[1], [0], [0], [1], [0, 0, 1, 1], [], []>} : vector<256x192xbf16>, vector<192x84xbf16>, vector<256x84xf32> -> vector<256x84xf32>
    %c10 = arith.constant 10 : index
    %c0_32 = arith.constant 0 : index
    %c0_33 = arith.constant 0 : index
    %43 = vector.load %arg2[%c10, %c0_32, %c0_33] : memref<12x192x84xbf16, #tpu.memory_space<vmem>>, vector<1x192x84xbf16>
    %44 = vector.shape_cast %43 : vector<1x192x84xbf16> to vector<192x84xbf16>
    %cst_34 = arith.constant dense<0.000000e+00> : vector<256x84xf32>
    %45 = tpu.matmul %3, %44, %cst_34 {dimension_numbers = #tpu.dot_dimension_numbers<[1], [0], [0], [1], [0, 0, 1, 1], [], []>} : vector<256x192xbf16>, vector<192x84xbf16>, vector<256x84xf32> -> vector<256x84xf32>
    %46 = arith.addf %42, %45 : vector<256x84xf32>
    %c11 = arith.constant 11 : index
    %c0_35 = arith.constant 0 : index
    %c0_36 = arith.constant 0 : index
    %47 = vector.load %arg2[%c11, %c0_35, %c0_36] : memref<12x192x84xbf16, #tpu.memory_space<vmem>>, vector<1x192x84xbf16>
    %48 = vector.shape_cast %47 : vector<1x192x84xbf16> to vector<192x84xbf16>
    %cst_37 = arith.constant dense<0.000000e+00> : vector<256x84xf32>
    %49 = tpu.matmul %4, %48, %cst_37 {dimension_numbers = #tpu.dot_dimension_numbers<[1], [0], [0], [1], [0, 0, 1, 1], [], []>} : vector<256x192xbf16>, vector<192x84xbf16>, vector<256x84xf32> -> vector<256x84xf32>
    %50 = arith.addf %46, %49 : vector<256x84xf32>
    %51 = arith.maximumf %39, %50 : vector<256x84xf32>
    %c0_38 = arith.constant 0 : index
    %c0_39 = arith.constant 0 : index
    %52 = vector.load %arg3[%c0_38, %c0_39] : memref<1x84xf32, #tpu.memory_space<vmem>>, vector<1x84xf32>
    %53 = vector.broadcast %52 : vector<1x84xf32> to vector<256x84xf32>
    %54 = arith.addf %51, %53 : vector<256x84xf32>
    %cst_40 = arith.constant 0.000000e+00 : f32
    %55 = vector.broadcast %cst_40 : f32 to vector<256x84xf32>
    %56 = arith.maximumf %54, %55 : vector<256x84xf32>
    %57 = arith.truncf %56 : vector<256x84xf32> to vector<256x84xbf16>
    %c0_41 = arith.constant 0 : index
    %c0_42 = arith.constant 0 : index
    %58 = vector.load %arg4[%c0_41, %c0_42] : memref<256x84xbf16, #tpu.memory_space<vmem>>, vector<256x84xbf16>
    tpu.vector_store %arg4[%c0_41, %c0_42], %57 {strides = array<i32>} : memref<256x84xbf16, #tpu.memory_space<vmem>>, vector<256x84xbf16>,
    return
  }
  func.func @transform_0(%arg0: i32) -> (i32, i32) {
    %c0_i32 = arith.constant 0 : i32
    %c0_i32_0 = arith.constant 0 : i32
    return %arg0, %c0_i32 : i32, i32
  }
  func.func @transform_1(%arg0: i32) -> (i32, i32, i32) {
    %c0_i32 = arith.constant 0 : i32
    %c0_i32_0 = arith.constant 0 : i32
    %c0_i32_1 = arith.constant 0 : i32
    %c0_i32_2 = arith.constant 0 : i32
    return %c0_i32, %c0_i32_0, %c0_i32_1 : i32, i32, i32
  }
  func.func @transform_2(%arg0: i32) -> (i32, i32) {
    %c0_i32 = arith.constant 0 : i32
    %c0_i32_0 = arith.constant 0 : i32
    %c0_i32_1 = arith.constant 0 : i32
    return %c0_i32, %c0_i32_0 : i32, i32
  }
  func.func @transform_3(%arg0: i32) -> (i32, i32) {
    %c0_i32 = arith.constant 0 : i32
    %c0_i32_0 = arith.constant 0 : i32
    return %arg0, %c0_i32 : i32, i32
  }
}

module attributes {stable_mosaic.version = 11 : i64} {
  func.func @_conv_pool_kernel(%arg0: i32, %arg1: memref<128x168xbf16, #tpu.memory_space<vmem>>, %arg2: memref<12x168x80xbf16, #tpu.memory_space<vmem>>, %arg3: memref<1x80xf32, #tpu.memory_space<vmem>>, %arg4: memref<128x80xbf16, #tpu.memory_space<vmem>>) attributes {dimension_semantics = [#tpu.dimension_semantics<parallel>], iteration_bounds = array<i64: 2>, scalar_prefetch = 0 : i64, scratch_operands = 0 : i64, tpu.core_type = #tpu.core_type<tc>, window_params = [{transform_indices = @transform_0, window_bounds = array<i64: 128, 168>}, {pipeline_mode = #tpu.pipeline_mode<synchronous>, transform_indices = @transform_1, window_bounds = array<i64: 12, 168, 80>}, {pipeline_mode = #tpu.pipeline_mode<synchronous>, transform_indices = @transform_2, window_bounds = array<i64: 1, 80>}, {transform_indices = @transform_3, window_bounds = array<i64: 128, 80>}]} {
    %c0 = arith.constant 0 : index
    %c0_0 = arith.constant 0 : index
    %0 = vector.load %arg1[%c0, %c0_0] : memref<128x168xbf16, #tpu.memory_space<vmem>>, vector<128x168xbf16>
    %cst = arith.constant 0.000000e+00 : bf16
    %1 = vector.broadcast %cst : bf16 to vector<16x168xbf16>
    %2 = tpu.concatenate %0, %1 in 0 : vector<128x168xbf16>, vector<16x168xbf16> -> vector<144x168xbf16>
    %3 = vector.extract_strided_slice %2 {offsets = [1, 0], sizes = [128, 168], strides = [1, 1]} : vector<144x168xbf16> to vector<128x168xbf16>
    %4 = vector.extract_strided_slice %2 {offsets = [2, 0], sizes = [128, 168], strides = [1, 1]} : vector<144x168xbf16> to vector<128x168xbf16>
    %c0_1 = arith.constant 0 : index
    %c0_2 = arith.constant 0 : index
    %c0_3 = arith.constant 0 : index
    %5 = vector.load %arg2[%c0_1, %c0_2, %c0_3] : memref<12x168x80xbf16, #tpu.memory_space<vmem>>, vector<1x168x80xbf16>
    %6 = vector.shape_cast %5 : vector<1x168x80xbf16> to vector<168x80xbf16>
    %cst_4 = arith.constant dense<0.000000e+00> : vector<128x80xf32>
    %7 = tpu.matmul %0, %6, %cst_4 {dimension_numbers = #tpu.dot_dimension_numbers<[1], [0], [0], [1], [0, 0, 1, 1], [], []>} : vector<128x168xbf16>, vector<168x80xbf16>, vector<128x80xf32> -> vector<128x80xf32>
    %c1 = arith.constant 1 : index
    %c0_5 = arith.constant 0 : index
    %c0_6 = arith.constant 0 : index
    %8 = vector.load %arg2[%c1, %c0_5, %c0_6] : memref<12x168x80xbf16, #tpu.memory_space<vmem>>, vector<1x168x80xbf16>
    %9 = vector.shape_cast %8 : vector<1x168x80xbf16> to vector<168x80xbf16>
    %cst_7 = arith.constant dense<0.000000e+00> : vector<128x80xf32>
    %10 = tpu.matmul %3, %9, %cst_7 {dimension_numbers = #tpu.dot_dimension_numbers<[1], [0], [0], [1], [0, 0, 1, 1], [], []>} : vector<128x168xbf16>, vector<168x80xbf16>, vector<128x80xf32> -> vector<128x80xf32>
    %11 = arith.addf %7, %10 : vector<128x80xf32>
    %c2 = arith.constant 2 : index
    %c0_8 = arith.constant 0 : index
    %c0_9 = arith.constant 0 : index
    %12 = vector.load %arg2[%c2, %c0_8, %c0_9] : memref<12x168x80xbf16, #tpu.memory_space<vmem>>, vector<1x168x80xbf16>
    %13 = vector.shape_cast %12 : vector<1x168x80xbf16> to vector<168x80xbf16>
    %cst_10 = arith.constant dense<0.000000e+00> : vector<128x80xf32>
    %14 = tpu.matmul %4, %13, %cst_10 {dimension_numbers = #tpu.dot_dimension_numbers<[1], [0], [0], [1], [0, 0, 1, 1], [], []>} : vector<128x168xbf16>, vector<168x80xbf16>, vector<128x80xf32> -> vector<128x80xf32>
    %15 = arith.addf %11, %14 : vector<128x80xf32>
    %c3 = arith.constant 3 : index
    %c0_11 = arith.constant 0 : index
    %c0_12 = arith.constant 0 : index
    %16 = vector.load %arg2[%c3, %c0_11, %c0_12] : memref<12x168x80xbf16, #tpu.memory_space<vmem>>, vector<1x168x80xbf16>
    %17 = vector.shape_cast %16 : vector<1x168x80xbf16> to vector<168x80xbf16>
    %cst_13 = arith.constant dense<0.000000e+00> : vector<128x80xf32>
    %18 = tpu.matmul %0, %17, %cst_13 {dimension_numbers = #tpu.dot_dimension_numbers<[1], [0], [0], [1], [0, 0, 1, 1], [], []>} : vector<128x168xbf16>, vector<168x80xbf16>, vector<128x80xf32> -> vector<128x80xf32>
    %c4 = arith.constant 4 : index
    %c0_14 = arith.constant 0 : index
    %c0_15 = arith.constant 0 : index
    %19 = vector.load %arg2[%c4, %c0_14, %c0_15] : memref<12x168x80xbf16, #tpu.memory_space<vmem>>, vector<1x168x80xbf16>
    %20 = vector.shape_cast %19 : vector<1x168x80xbf16> to vector<168x80xbf16>
    %cst_16 = arith.constant dense<0.000000e+00> : vector<128x80xf32>
    %21 = tpu.matmul %3, %20, %cst_16 {dimension_numbers = #tpu.dot_dimension_numbers<[1], [0], [0], [1], [0, 0, 1, 1], [], []>} : vector<128x168xbf16>, vector<168x80xbf16>, vector<128x80xf32> -> vector<128x80xf32>
    %22 = arith.addf %18, %21 : vector<128x80xf32>
    %c5 = arith.constant 5 : index
    %c0_17 = arith.constant 0 : index
    %c0_18 = arith.constant 0 : index
    %23 = vector.load %arg2[%c5, %c0_17, %c0_18] : memref<12x168x80xbf16, #tpu.memory_space<vmem>>, vector<1x168x80xbf16>
    %24 = vector.shape_cast %23 : vector<1x168x80xbf16> to vector<168x80xbf16>
    %cst_19 = arith.constant dense<0.000000e+00> : vector<128x80xf32>
    %25 = tpu.matmul %4, %24, %cst_19 {dimension_numbers = #tpu.dot_dimension_numbers<[1], [0], [0], [1], [0, 0, 1, 1], [], []>} : vector<128x168xbf16>, vector<168x80xbf16>, vector<128x80xf32> -> vector<128x80xf32>
    %26 = arith.addf %22, %25 : vector<128x80xf32>
    %27 = arith.maximumf %15, %26 : vector<128x80xf32>
    %c6 = arith.constant 6 : index
    %c0_20 = arith.constant 0 : index
    %c0_21 = arith.constant 0 : index
    %28 = vector.load %arg2[%c6, %c0_20, %c0_21] : memref<12x168x80xbf16, #tpu.memory_space<vmem>>, vector<1x168x80xbf16>
    %29 = vector.shape_cast %28 : vector<1x168x80xbf16> to vector<168x80xbf16>
    %cst_22 = arith.constant dense<0.000000e+00> : vector<128x80xf32>
    %30 = tpu.matmul %0, %29, %cst_22 {dimension_numbers = #tpu.dot_dimension_numbers<[1], [0], [0], [1], [0, 0, 1, 1], [], []>} : vector<128x168xbf16>, vector<168x80xbf16>, vector<128x80xf32> -> vector<128x80xf32>
    %c7 = arith.constant 7 : index
    %c0_23 = arith.constant 0 : index
    %c0_24 = arith.constant 0 : index
    %31 = vector.load %arg2[%c7, %c0_23, %c0_24] : memref<12x168x80xbf16, #tpu.memory_space<vmem>>, vector<1x168x80xbf16>
    %32 = vector.shape_cast %31 : vector<1x168x80xbf16> to vector<168x80xbf16>
    %cst_25 = arith.constant dense<0.000000e+00> : vector<128x80xf32>
    %33 = tpu.matmul %3, %32, %cst_25 {dimension_numbers = #tpu.dot_dimension_numbers<[1], [0], [0], [1], [0, 0, 1, 1], [], []>} : vector<128x168xbf16>, vector<168x80xbf16>, vector<128x80xf32> -> vector<128x80xf32>
    %34 = arith.addf %30, %33 : vector<128x80xf32>
    %c8 = arith.constant 8 : index
    %c0_26 = arith.constant 0 : index
    %c0_27 = arith.constant 0 : index
    %35 = vector.load %arg2[%c8, %c0_26, %c0_27] : memref<12x168x80xbf16, #tpu.memory_space<vmem>>, vector<1x168x80xbf16>
    %36 = vector.shape_cast %35 : vector<1x168x80xbf16> to vector<168x80xbf16>
    %cst_28 = arith.constant dense<0.000000e+00> : vector<128x80xf32>
    %37 = tpu.matmul %4, %36, %cst_28 {dimension_numbers = #tpu.dot_dimension_numbers<[1], [0], [0], [1], [0, 0, 1, 1], [], []>} : vector<128x168xbf16>, vector<168x80xbf16>, vector<128x80xf32> -> vector<128x80xf32>
    %38 = arith.addf %34, %37 : vector<128x80xf32>
    %39 = arith.maximumf %27, %38 : vector<128x80xf32>
    %c9 = arith.constant 9 : index
    %c0_29 = arith.constant 0 : index
    %c0_30 = arith.constant 0 : index
    %40 = vector.load %arg2[%c9, %c0_29, %c0_30] : memref<12x168x80xbf16, #tpu.memory_space<vmem>>, vector<1x168x80xbf16>
    %41 = vector.shape_cast %40 : vector<1x168x80xbf16> to vector<168x80xbf16>
    %cst_31 = arith.constant dense<0.000000e+00> : vector<128x80xf32>
    %42 = tpu.matmul %0, %41, %cst_31 {dimension_numbers = #tpu.dot_dimension_numbers<[1], [0], [0], [1], [0, 0, 1, 1], [], []>} : vector<128x168xbf16>, vector<168x80xbf16>, vector<128x80xf32> -> vector<128x80xf32>
    %c10 = arith.constant 10 : index
    %c0_32 = arith.constant 0 : index
    %c0_33 = arith.constant 0 : index
    %43 = vector.load %arg2[%c10, %c0_32, %c0_33] : memref<12x168x80xbf16, #tpu.memory_space<vmem>>, vector<1x168x80xbf16>
    %44 = vector.shape_cast %43 : vector<1x168x80xbf16> to vector<168x80xbf16>
    %cst_34 = arith.constant dense<0.000000e+00> : vector<128x80xf32>
    %45 = tpu.matmul %3, %44, %cst_34 {dimension_numbers = #tpu.dot_dimension_numbers<[1], [0], [0], [1], [0, 0, 1, 1], [], []>} : vector<128x168xbf16>, vector<168x80xbf16>, vector<128x80xf32> -> vector<128x80xf32>
    %46 = arith.addf %42, %45 : vector<128x80xf32>
    %c11 = arith.constant 11 : index
    %c0_35 = arith.constant 0 : index
    %c0_36 = arith.constant 0 : index
    %47 = vector.load %arg2[%c11, %c0_35, %c0_36] : memref<12x168x80xbf16, #tpu.memory_space<vmem>>, vector<1x168x80xbf16>
    %48 = vector.shape_cast %47 : vector<1x168x80xbf16> to vector<168x80xbf16>
    %cst_37 = arith.constant dense<0.000000e+00> : vector<128x80xf32>
    %49 = tpu.matmul %4, %48, %cst_37 {dimension_numbers = #tpu.dot_dimension_numbers<[1], [0], [0], [1], [0, 0, 1, 1], [], []>} : vector<128x168xbf16>, vector<168x80xbf16>, vector<128x80xf32> -> vector<128x80xf32>
    %50 = arith.addf %46, %49 : vector<128x80xf32>
    %51 = arith.maximumf %39, %50 : vector<128x80xf32>
    %c0_38 = arith.constant 0 : index
    %c0_39 = arith.constant 0 : index
    %52 = vector.load %arg3[%c0_38, %c0_39] : memref<1x80xf32, #tpu.memory_space<vmem>>, vector<1x80xf32>
    %53 = vector.broadcast %52 : vector<1x80xf32> to vector<128x80xf32>
    %54 = arith.addf %51, %53 : vector<128x80xf32>
    %cst_40 = arith.constant 0.000000e+00 : f32
    %55 = vector.broadcast %cst_40 : f32 to vector<128x80xf32>
    %56 = arith.maximumf %54, %55 : vector<128x80xf32>
    %57 = arith.truncf %56 : vector<128x80xf32> to vector<128x80xbf16>
    %c0_41 = arith.constant 0 : index
    %c0_42 = arith.constant 0 : index
    %58 = vector.load %arg4[%c0_41, %c0_42] : memref<128x80xbf16, #tpu.memory_space<vmem>>, vector<128x80xbf16>
    tpu.vector_store %arg4[%c0_41, %c0_42], %57 {strides = array<i32>} : memref<128x80xbf16, #tpu.memory_space<vmem>>, vector<128x80xbf16>,
    return
  }
  func.func @transform_0(%arg0: i32) -> (i32, i32) {
    %c0_i32 = arith.constant 0 : i32
    %c0_i32_0 = arith.constant 0 : i32
    return %arg0, %c0_i32 : i32, i32
  }
  func.func @transform_1(%arg0: i32) -> (i32, i32, i32) {
    %c0_i32 = arith.constant 0 : i32
    %c0_i32_0 = arith.constant 0 : i32
    %c0_i32_1 = arith.constant 0 : i32
    %c0_i32_2 = arith.constant 0 : i32
    return %c0_i32, %c0_i32_0, %c0_i32_1 : i32, i32, i32
  }
  func.func @transform_2(%arg0: i32) -> (i32, i32) {
    %c0_i32 = arith.constant 0 : i32
    %c0_i32_0 = arith.constant 0 : i32
    %c0_i32_1 = arith.constant 0 : i32
    return %c0_i32, %c0_i32_0 : i32, i32
  }
  func.func @transform_3(%arg0: i32) -> (i32, i32) {
    %c0_i32 = arith.constant 0 : i32
    %c0_i32_0 = arith.constant 0 : i32
    return %arg0, %c0_i32 : i32, i32
  }
}

module attributes {stable_mosaic.version = 11 : i64} {
  func.func @_fc_chain_kernel(%arg0: i32, %arg1: memref<16x400xbf16, #tpu.memory_space<vmem>>, %arg2: memref<400x128xbf16, #tpu.memory_space<vmem>>, %arg3: memref<1x128xf32, #tpu.memory_space<vmem>>, %arg4: memref<128x128xbf16, #tpu.memory_space<vmem>>, %arg5: memref<1x128xf32, #tpu.memory_space<vmem>>, %arg6: memref<128x128xbf16, #tpu.memory_space<vmem>>, %arg7: memref<1x128xf32, #tpu.memory_space<vmem>>, %arg8: memref<16x128xf32, #tpu.memory_space<vmem>>) attributes {dimension_semantics = [#tpu.dimension_semantics<parallel>], iteration_bounds = array<i64: 2>, scalar_prefetch = 0 : i64, scratch_operands = 0 : i64, tpu.core_type = #tpu.core_type<tc>, window_params = [{transform_indices = @transform_0, window_bounds = array<i64: 16, 400>}, {pipeline_mode = #tpu.pipeline_mode<synchronous>, transform_indices = @transform_1, window_bounds = array<i64: 400, 128>}, {pipeline_mode = #tpu.pipeline_mode<synchronous>, transform_indices = @transform_2, window_bounds = array<i64: 1, 128>}, {pipeline_mode = #tpu.pipeline_mode<synchronous>, transform_indices = @transform_3, window_bounds = array<i64: 128, 128>}, {pipeline_mode = #tpu.pipeline_mode<synchronous>, transform_indices = @transform_4, window_bounds = array<i64: 1, 128>}, {pipeline_mode = #tpu.pipeline_mode<synchronous>, transform_indices = @transform_5, window_bounds = array<i64: 128, 128>}, {pipeline_mode = #tpu.pipeline_mode<synchronous>, transform_indices = @transform_6, window_bounds = array<i64: 1, 128>}, {transform_indices = @transform_7, window_bounds = array<i64: 16, 128>}]} {
    %c0 = arith.constant 0 : index
    %c0_0 = arith.constant 0 : index
    %0 = vector.load %arg1[%c0, %c0_0] : memref<16x400xbf16, #tpu.memory_space<vmem>>, vector<16x400xbf16>
    %c0_1 = arith.constant 0 : index
    %c0_2 = arith.constant 0 : index
    %1 = vector.load %arg2[%c0_1, %c0_2] : memref<400x128xbf16, #tpu.memory_space<vmem>>, vector<400x128xbf16>
    %cst = arith.constant dense<0.000000e+00> : vector<16x128xf32>
    %2 = tpu.matmul %0, %1, %cst {dimension_numbers = #tpu.dot_dimension_numbers<[1], [0], [0], [1], [0, 0, 1, 1], [], []>} : vector<16x400xbf16>, vector<400x128xbf16>, vector<16x128xf32> -> vector<16x128xf32>
    %c0_3 = arith.constant 0 : index
    %c0_4 = arith.constant 0 : index
    %3 = vector.load %arg3[%c0_3, %c0_4] : memref<1x128xf32, #tpu.memory_space<vmem>>, vector<1x128xf32>
    %4 = vector.broadcast %3 : vector<1x128xf32> to vector<16x128xf32>
    %5 = arith.addf %2, %4 : vector<16x128xf32>
    %cst_5 = arith.constant 0.000000e+00 : f32
    %6 = vector.broadcast %cst_5 : f32 to vector<16x128xf32>
    %7 = arith.maximumf %5, %6 : vector<16x128xf32>
    %8 = arith.truncf %7 : vector<16x128xf32> to vector<16x128xbf16>
    %c0_6 = arith.constant 0 : index
    %c0_7 = arith.constant 0 : index
    %9 = vector.load %arg4[%c0_6, %c0_7] : memref<128x128xbf16, #tpu.memory_space<vmem>>, vector<128x128xbf16>
    %cst_8 = arith.constant dense<0.000000e+00> : vector<16x128xf32>
    %10 = tpu.matmul %8, %9, %cst_8 {dimension_numbers = #tpu.dot_dimension_numbers<[1], [0], [0], [1], [0, 0, 1, 1], [], []>} : vector<16x128xbf16>, vector<128x128xbf16>, vector<16x128xf32> -> vector<16x128xf32>
    %c0_9 = arith.constant 0 : index
    %c0_10 = arith.constant 0 : index
    %11 = vector.load %arg5[%c0_9, %c0_10] : memref<1x128xf32, #tpu.memory_space<vmem>>, vector<1x128xf32>
    %12 = vector.broadcast %11 : vector<1x128xf32> to vector<16x128xf32>
    %13 = arith.addf %10, %12 : vector<16x128xf32>
    %cst_11 = arith.constant 0.000000e+00 : f32
    %14 = vector.broadcast %cst_11 : f32 to vector<16x128xf32>
    %15 = arith.maximumf %13, %14 : vector<16x128xf32>
    %16 = arith.truncf %15 : vector<16x128xf32> to vector<16x128xbf16>
    %c0_12 = arith.constant 0 : index
    %c0_13 = arith.constant 0 : index
    %17 = vector.load %arg6[%c0_12, %c0_13] : memref<128x128xbf16, #tpu.memory_space<vmem>>, vector<128x128xbf16>
    %cst_14 = arith.constant dense<0.000000e+00> : vector<16x128xf32>
    %18 = tpu.matmul %16, %17, %cst_14 {dimension_numbers = #tpu.dot_dimension_numbers<[1], [0], [0], [1], [0, 0, 1, 1], [], []>} : vector<16x128xbf16>, vector<128x128xbf16>, vector<16x128xf32> -> vector<16x128xf32>
    %c0_15 = arith.constant 0 : index
    %c0_16 = arith.constant 0 : index
    %19 = vector.load %arg7[%c0_15, %c0_16] : memref<1x128xf32, #tpu.memory_space<vmem>>, vector<1x128xf32>
    %20 = vector.broadcast %19 : vector<1x128xf32> to vector<16x128xf32>
    %21 = arith.addf %18, %20 : vector<16x128xf32>
    %c0_17 = arith.constant 0 : index
    %c0_18 = arith.constant 0 : index
    %22 = vector.load %arg8[%c0_17, %c0_18] : memref<16x128xf32, #tpu.memory_space<vmem>>, vector<16x128xf32>
    tpu.vector_store %arg8[%c0_17, %c0_18], %21 {strides = array<i32>} : memref<16x128xf32, #tpu.memory_space<vmem>>, vector<16x128xf32>,
    return
  }
  func.func @transform_0(%arg0: i32) -> (i32, i32) {
    %c0_i32 = arith.constant 0 : i32
    %c0_i32_0 = arith.constant 0 : i32
    return %arg0, %c0_i32 : i32, i32
  }
  func.func @transform_1(%arg0: i32) -> (i32, i32) {
    %c0_i32 = arith.constant 0 : i32
    %c0_i32_0 = arith.constant 0 : i32
    %c0_i32_1 = arith.constant 0 : i32
    return %c0_i32, %c0_i32_0 : i32, i32
  }
  func.func @transform_2(%arg0: i32) -> (i32, i32) {
    %c0_i32 = arith.constant 0 : i32
    %c0_i32_0 = arith.constant 0 : i32
    %c0_i32_1 = arith.constant 0 : i32
    return %c0_i32, %c0_i32_0 : i32, i32
  }
  func.func @transform_3(%arg0: i32) -> (i32, i32) {
    %c0_i32 = arith.constant 0 : i32
    %c0_i32_0 = arith.constant 0 : i32
    %c0_i32_1 = arith.constant 0 : i32
    return %c0_i32, %c0_i32_0 : i32, i32
  }
  func.func @transform_4(%arg0: i32) -> (i32, i32) {
    %c0_i32 = arith.constant 0 : i32
    %c0_i32_0 = arith.constant 0 : i32
    %c0_i32_1 = arith.constant 0 : i32
    return %c0_i32, %c0_i32_0 : i32, i32
  }
  func.func @transform_5(%arg0: i32) -> (i32, i32) {
    %c0_i32 = arith.constant 0 : i32
    %c0_i32_0 = arith.constant 0 : i32
    %c0_i32_1 = arith.constant 0 : i32
    return %c0_i32, %c0_i32_0 : i32, i32
  }
  func.func @transform_6(%arg0: i32) -> (i32, i32) {
    %c0_i32 = arith.constant 0 : i32
    %c0_i32_0 = arith.constant 0 : i32
    %c0_i32_1 = arith.constant 0 : i32
    return %c0_i32, %c0_i32_0 : i32, i32
  }
  func.func @transform_7(%arg0: i32) -> (i32, i32) {
    %c0_i32 = arith.constant 0 : i32
    %c0_i32_0 = arith.constant 0 : i32
    return %arg0, %c0_i32 : i32, i32
  }
}

</mosaic_0001>

<bundles_post_ra>
// kernel: net_forward.3
= control target key start
LH: loop header
LB: loop body
LE: loop exit
PB: predicated region body
PF: predicated region fallthrough
CT: control target
= control target key end

     0   :  { %s5955_s12 = smov 0   ;;  %s8019_s0 = inlined_call_operand.vmem [shape: bf16[512,192], index: 0, kind: input, shape index: {}]   ;;  %s8020_s1 = inlined_call_operand.vmem [shape: bf16[12,192,84], index: 1, kind: input, shape index: {}]   ;;  %s8021_s2 = inlined_call_operand.vmem [shape: f32[1,84], index: 2, kind: input, shape index: {}]   ;;  %s8022_s3 = inlined_call_operand.vmem [shape: bf16[512,84], index: 3, kind: output, shape index: {}]  }
   0x1 LB: > { %s4450_s13 = sadd.s32 4294967295, %s5932_s12   ;;  %p4454_p0 = scmp.ge.s32.totalorder %s5932_s12, 1  ;;  %s5932_s12 = sphi %s5955_s12, %s13_s12  }
   0x2   : > { %p139_p1 = scmp.lt.s32.totalorder %s5932_s12, 3 }
   0x4   : > { %p140_p2 = pnand %p4454_p0, %p139_p1 }
   0x6   : > { %143 = sbr.rel (%p140_p2) target bundleno = 1047 (0x417), region = 32 }
   0xd   : > { %v5681_v0 = vld [vmem:[%s8020_s1 + $0x60] sm:$0xff]   ;;  %v8023_v1 = vmov 0   ;;  %v5683_v3 = vld [vmem:[%s8020_s1 + $0x68] sm:$0xff]   ;;  %v5685_v5 = vld [vmem:[%s8020_s1 + $0x70] sm:$0xff]   ;;  %s4455_s26 = sshll.u32 %s4450_s13, 5  ;;  %vm736_vm1 = vcmask 523264  }
   0xe   : > { %785 = vmatprep.subr.bf16.mxu0 %v8023_v1  ;;  %1770 = vmatprep.subr.bf16.mxu1 %v8023_v1  ;;  %v5682_v2 = vld [vmem:[%s8020_s1 + $0x180] sm:$0xff]   ;;  %v5684_v4 = vld [vmem:[%s8020_s1 + $0x188] sm:$0xff]   ;;  %v5686_v6 = vld [vmem:[%s8020_s1 + $0x190] sm:$0xff]   ;;  %p165_p3 = scmp.lt.s32.totalorder %s4455_s26, 63  ;;  %vm387_vm0 = vsmask.f32 7424 }
   0xf   : > { %786 = vmatpush1.bf16.msra.mxu0 %v5681_v0  ;;  %1771 = vmatpush1.bf16.msra.mxu1 %v5682_v2  ;;  %v5687_v7 = vld [vmem:[%s8020_s1 + $0x78] sm:$0xff]   ;;  %v5689_v9 = vld [vmem:[%s8020_s1 + $0x80] sm:$0xff]   ;;  %v5691_v11 = vld [vmem:[%s8020_s1 + $0x88] sm:$0xff]   ;;  %vm1253_vm2 = vcmask 1046528   ;;  %vm4361_vm3 = vcmask 683008  }
  0x10   : > { %787 = vmatprep.subr.bf16.mxu0 %v8023_v1  ;;  %1772 = vmatprep.subr.bf16.mxu1 %v8023_v1  ;;  %v5688_v8 = vld [vmem:[%s8020_s1 + $0x198] sm:$0xff]   ;;  %v5690_v10 = vld [vmem:[%s8020_s1 + $0x1a0] sm:$0xff]   ;;  %s8203_s26 = smov (!%p165_p3, %s4455_s26), 63  ;;  %v5692_v12 = vld [vmem:[%s8020_s1 + $0x1a8] sm:$0xff]  }
  0x11   : > { %s5127_s13 = sshll.u32 %s8203_s26, 3  ;;  %v5693_v13 = vld [vmem:[%s8020_s1 + $0x90] sm:$0xff]   ;;  %v5695_v17 = vld [vmem:[%s8020_s1 + $0x98] sm:$0xff]   ;;  %v5697_v24 = vld [vmem:[%s8020_s1 + $0xa0] sm:$0xff]   ;;  %s4459_s17 = sshll.u32 %s8203_s26, 2 }
  0x12   : > { %s6020_s18 = scalar_lea.vmem %s8019_s0, %s5127_s13  ;;  %v5694_v14 = vld [vmem:[%s8020_s1 + $0x1b0] sm:$0xff]   ;;  %v5696_v18 = vld [vmem:[%s8020_s1 + $0x1b8] sm:$0xff]   ;;  %v5698_v26 = vld [vmem:[%s8020_s1 + $0x1c0] sm:$0xff]   ;;  %s7830_s21 = scalar_lea.vmem %s8022_s3, %s4459_s17 }
  0x13   : > { %788 = vmatpush1.bf16.msra.mxu0 %v5683_v3  ;;  %1773 = vmatpush1.bf16.msra.mxu1 %v5684_v4  ;;  %v5705_v15 = vld [vmem:[%s6020_s18 + $0x4] ss:$8 sps:$4 sm:$0xff]   ;;  %v5707_v16 = vld [vmem:[%s6020_s18 + $0x14] ss:$8 sps:$4 sm:$0xff]   ;;  %v5709_v25 = vld [vmem:[%s6020_s18] ss:$8 sps:$4 sm:$0xff]  }
  0x14   : > { %789 = vmatprep.subr.bf16.mxu0 %v8023_v1  ;;  %1774 = vmatprep.subr.bf16.mxu1 %v8023_v1  ;;  %v401_v19 = vshrl.u32 %v5705_v15, 16  ;;  %v403_v20 = vshll.u32 %v5705_v15, 16  ;;  %v408_v21 = vshll.u32 %v5707_v16, 16  ;;  %v5699_v29 = vld [vmem:[%s8020_s1 + $0xa8] sm:$0xff]   ;;  %v5710_v30 = vld [vmem:[%s6020_s18 + $0x10] ss:$8 sps:$4 sm:$0xff]  }
  0x15   : > { %v391_v31 = vshll.u32 %v5709_v25, 16  ;;  %v5700_v32 = vld [vmem:[%s8020_s1 + $0x1c8] sm:$0xff]   ;;  %v5701_v34 = vld [vmem:[%s8020_s1 + $0xb0] sm:$0xff]   ;;  %v389_v35 = vshrl.u32 %v5709_v25, 16  ;;  %v396_v37 = vshll.u32 %v5710_v30, 16  ;;  %v420_v39 = vshrl.u32 %v5707_v16, 16 }
  0x16   : > { %v405_v22 = vrot.slane %v403_v20, 1  ;;  %v410_v23 = vrot.slane %v408_v21, 1  ;;  %v5713_v33 = vld [vmem:[%s6020_s18 + $0x24] ss:$8 sps:$4 sm:$0xff]   ;;  %v5702_v38 = vld [vmem:[%s8020_s1 + $0x1d0] sm:$0xff]   ;;  %v5703_v41 = vld [vmem:[%s8020_s1 + $0xb8] sm:$0xff]  }
  0x17   : > { %790 = vmatpush1.bf16.msra.mxu0 %v5685_v5  ;;  %1775 = vmatpush1.bf16.msra.mxu1 %v5686_v6  ;;  %v393_v36 = vrot.slane %v391_v31, 1  ;;  %v424_v40 = vshll.u32 %v5713_v33, 16  ;;  %v398_v43 = vrot.slane %v396_v37, 1  ;;  %v5715_v44 = vld [vmem:[%s6020_s18 + $0x20] ss:$8 sps:$4 sm:$0xff]   ;;  %v5704_v45 = vld [vmem:[%s8020_s1 + $0x1d8] sm:$0xff]  }
  0x18   : > { %791 = vmatprep.subr.bf16.mxu0 %v8023_v1  ;;  %1776 = vmatprep.subr.bf16.mxu1 %v8023_v1  ;;  %v406_v27 = vor.u32 %v405_v22, %v401_v19  ;;  %v5718_v46 = vld [vmem:[%s6020_s18 + $0x34] ss:$8 sps:$4 sm:$0xff]   ;;  %v422_v47 = vor.u32 %v420_v39, %v410_v23  ;;  %v5711_v49 = vld [vmem:[%s8020_s1] sm:$0xff]   ;;  %v412_v51 = vshrl.u32 %v5710_v30, 16  ;;  %v416_v52 = vshll.u32 %v5715_v44, 16  ;;  %v5716_v60 = vld [vmem:[%s8020_s1 + $0x8] sm:$0xff]  }
  0x19   : > { %v394_v42 = vor.u32 %v393_v36, %v389_v35  ;;  %v426_v48 = vrot.slane %v424_v40, 1  ;;  %v5712_v53 = vld [vmem:[%s8020_s1 + $0x120] sm:$0xff]   ;;  %v436_v54 = vshrl.u32 %v5713_v33, 16  ;;  %v440_v55 = vshll.u32 %v5718_v46, 16  ;;  %v6097_v57 = vld [vmem:[%s6020_s18 + $0x30] ss:$8 sps:$4 sm:$0xff]  }
  0x1a   : > { %v6047_v28 = vsel %vm387_vm0, %v406_v27, %v410_v23  ;;  %v414_v58 = vor.u32 %v412_v51, %v398_v43  ;;  %v418_v59 = vrot.slane %v416_v52, 1  ;;  %v6104_v61 = vld [vmem:[%s6020_s18 + $0x44] ss:$8 sps:$4 sm:$0xff]   ;;  %v6115_v2 = vld [vmem:[%s6020_s18 + $0x40] ss:$8 sps:$4 sm:$0xff]   ;;  %v428_v3 = vshrl.u32 %v5715_v44, 16 }
  0x1b   : > { %792 = vmatpush1.bf16.msra.mxu0 %v5687_v7  ;;  %1777 = vmatpush1.bf16.msra.mxu1 %v5688_v8  ;;  %v6085_v50 = vsel %vm387_vm0, %v394_v42, %v398_v43  ;;  %v6093_v56 = vsel %vm387_vm0, %v422_v47, %v426_v48  ;;  %v5717_v62 = vld [vmem:[%s8020_s1 + $0x128] sm:$0xff]   ;;  %v438_v63 = vor.u32 %v436_v54, %v426_v48  ;;  %v442_v0 = vrot.slane %v440_v55, 1  ;;  %v5723_v5 = vld [vmem:[%s8020_s1 + $0x10] sm:$0xff]   ;;  %v5729_v23 = vld [vmem:[%s8020_s1 + $0x18] sm:$0xff]  }
  0x1c   : > { %793 = vmatprep.subr.bf16.mxu0 %v8023_v1  ;;  %1778 = vmatprep.subr.bf16.mxu1 %v8023_v1  ;;  %v432_v4 = vshll.u32 %v6097_v57, 16  ;;  %v6123_v6 = vld [vmem:[%s6020_s18 + $0x54] ss:$8 sps:$4 sm:$0xff]   ;;  %v6126_v7 = vsel %vm387_vm0, %v414_v58, %v418_v59  ;;  %v6146_v16 = vld [vmem:[%s6020_s18 + $0x60] ss:$8 sps:$4 sm:$0xff]   ;;  %v444_v22 = vshrl.u32 %v6097_v57, 16 }
  0x1d   : > { %4528 = vmatprep.mubr.msk.bf16.mxu0 %vm736_vm1, %v6047_v28  ;;  %4684 = vmatprep.mubr.msk.bf16.mxu1 %vm736_vm1, %v6047_v28  ;;  %v5725_v8 = vld [vmem:[%s8020_s1 + $0x130] sm:$0xff]   ;;  %v468_v25 = vshrl.u32 %v6104_v61, 16  ;;  %v5730_v27 = vld [vmem:[%s8020_s1 + $0x138] sm:$0xff]   ;;  %v484_v30 = vshrl.u32 %v6123_v6, 16  ;;  %v480_v31 = vshll.u32 %v6146_v16, 16  ;;  %v5734_v37 = vld [vmem:[%s8020_s1 + $0x20] sm:$0xff]  }
  0x1e   : > { %v434_v15 = vrot.slane %v432_v4, 1  ;;  %v5735_v39 = vld [vmem:[%s8020_s1 + $0x140] sm:$0xff]   ;;  %v492_v43 = vshrl.u32 %v6146_v16, 16  ;;  %v6215_v51 = vld [vmem:[%s6020_s18 + $0x90] ss:$8 sps:$4 sm:$0xff]   ;;  %v5741_v54 = vld [vmem:[%s8020_s1 + $0x28] sm:$0xff]  }
  0x1f   : > { %794 = vmatpush1.bf16.msra.mxu0 %v5689_v9  ;;  %1779 = vmatpush1.bf16.msra.mxu1 %v5690_v10  ;;  %v6132_v9 = vld [vmem:[%s6020_s18 + $0x50] ss:$8 sps:$4 sm:$0xff]   ;;  %v6135_v10 = vsel %vm387_vm0, %v438_v63, %v442_v0  ;;  %v6198_v44 = vld [vmem:[%s6020_s18 + $0x84] ss:$8 sps:$4 sm:$0xff]   ;;  %v6209_v48 = vld [vmem:[%s6020_s18 + $0x80] ss:$8 sps:$4 sm:$0xff]  }
  0x20   : > { %795 = vmatprep.subr.bf16.mxu0 %v8023_v1  ;;  %1780 = vmatprep.subr.bf16.mxu1 %v8023_v1  ;;  %v464_v19 = vshll.u32 %v6132_v9, 16  ;;  %v476_v36 = vshrl.u32 %v6132_v9, 16  ;;  %v5743_v57 = vld [vmem:[%s8020_s1 + $0x148] sm:$0xff]   ;;  %v512_v63 = vshll.u32 %v6209_v48, 16 }
  0x21   : > { %v6229_v58 = vld [vmem:[%s6020_s18 + $0xa4] ss:$8 sps:$4 sm:$0xff]  }
  0x22   : > { %v6177_v35 = vrot.slane %v464_v19, 1  ;;  %v6268_v19 = vrot.slane %v512_v63, 1 }
  0x23   : > { %796 = vmatpush1.bf16.msra.mxu0 %v5691_v11  ;;  %1781 = vmatpush1.bf16.msra.mxu1 %v5692_v12  ;;  %v452_v11 = vshrl.u32 %v5718_v46, 16  ;;  %v456_v12 = vshll.u32 %v6104_v61, 16  ;;  %v6201_v46 = vrot.slane %v480_v31, 1  ;;  %v520_v61 = vshll.u32 %v6198_v44, 16 }
  0x24   : > { %797 = vmatprep.subr.bf16.mxu0 %v8023_v1  ;;  %1782 = vmatprep.subr.bf16.mxu1 %v8023_v1 }
  0x25   : > { %v454_v20 = vor.u32 %v452_v11, %v442_v0  ;;  %v458_v21 = vrot.slane %v456_v12, 1  ;;  %v5748_v12 = vld [vmem:[%s8020_s1 + $0x150] sm:$0xff]  }
  0x27   : > { %798 = vmatpush1.bf16.msra.mxu0 %v5693_v13  ;;  %1783 = vmatpush1.bf16.msra.mxu1 %v5694_v14  ;;  %v448_v13 = vshll.u32 %v6115_v2, 16  ;;  %v6142_v14 = vld [vmem:[%s6020_s18 + $0x64] ss:$8 sps:$4 sm:$0xff]   ;;  %v470_v52 = vor.u32 %v468_v25, %v458_v21 }
  0x28   : > { %799 = vmatprep.subr.bf16.mxu0 %v8023_v1  ;;  %1784 = vmatprep.subr.bf16.mxu1 %v8023_v1  ;;  %v500_v40 = vshrl.u32 %v6142_v14, 16 }
  0x2b   : > { %800 = vmatpush1.bf16.msra.mxu0 %v5695_v17  ;;  %1785 = vmatpush1.bf16.msra.mxu1 %v5696_v18  ;;  %v430_v17 = vor.u32 %v428_v3, %v418_v59  ;;  %v472_v18 = vshll.u32 %v6123_v6, 16  ;;  %v5747_v3 = vld [vmem:[%s8020_s1 + $0x30] sm:$0xff]  }
  0x2c   : > { %801 = vmatprep.subr.bf16.mxu0 %v8023_v1  ;;  %1786 = vmatprep.subr.bf16.mxu1 %v8023_v1 }
  0x2d   : > { %v6173_v33 = vsel %vm387_vm0, %v430_v17, %v434_v15  ;;  %v524_v17 = vshrl.u32 %v6209_v48, 16 }
  0x2f   : > { %802 = vmatpush1.bf16.msra.mxu0 %v5697_v24  ;;  %1787 = vmatpush1.bf16.msra.mxu1 %v5698_v26  ;;  %v450_v24 = vrot.slane %v448_v13, 1  ;;  %v460_v26 = vshrl.u32 %v6115_v2, 16  ;;  %v528_v2 = vshll.u32 %v6215_v51, 16  ;;  %v6259_v13 = vrot.slane %v520_v61, 1 }
  0x30   : > { %803 = vmatprep.subr.bf16.mxu0 %v8023_v1  ;;  %1788 = vmatprep.subr.bf16.mxu1 %v8023_v1 }
  0x33   : > { %804 = vmatpush1.bf16.msra.mxu0 %v5699_v29  ;;  %1789 = vmatpush1.bf16.msra.mxu1 %v5700_v32  ;;  %v488_v29 = vshll.u32 %v6142_v14, 16  ;;  %v6170_v32 = vld [vmem:[%s6020_s18 + $0x74] ss:$8 sps:$4 sm:$0xff]  }
  0x34   : > { %805 = vmatprep.subr.bf16.mxu0 %v8023_v1  ;;  %1790 = vmatprep.subr.bf16.mxu1 %v8023_v1  ;;  %v504_v47 = vshll.u32 %v6170_v32, 16  ;;  %v516_v55 = vshrl.u32 %v6170_v32, 16  ;;  %v5770_v14 = vld [vmem:[%s8020_s1 + $0x50] sm:$0xff]  }
  0x35   : > { %v6193_v42 = vrot.slane %v488_v29, 1  ;;  %v6290_v29 = vld [vmem:[%s6020_s18 + $0xb4] ss:$8 sps:$4 sm:$0xff]  }
  0x36   : > { %v580_v61 = vshrl.u32 %v6290_v29, 16 }
  0x37   : > { %806 = vmatpush1.bf16.msra.mxu0 %v5701_v34  ;;  %1791 = vmatpush1.bf16.msra.mxu1 %v5702_v38  ;;  %v6175_v34 = vrot.slane %v472_v18, 1  ;;  %v6184_v38 = vsel %vm387_vm0, %v454_v20, %v458_v21  ;;  %v552_v18 = vshll.u32 %v6229_v58, 16  ;;  %v502_v63 = vor.u32 %v500_v40, %v6193_v42 }
  0x38   : > { %807 = vmatprep.subr.bf16.mxu0 %v8023_v1  ;;  %1792 = vmatprep.subr.bf16.mxu1 %v8023_v1 }
  0x39   : > { %v6247_v4 = vsel %vm387_vm0, %v470_v52, %v6175_v34  ;;  %v6292_v6 = vrot.slane %v552_v18, 1  ;;  %v5761_v52 = vld [vmem:[%s8020_s1 + $0x160] sm:$0xff]  }
  0x3b   : > { %808 = vmatpush1.bf16.msra.mxu0 %v5703_v41  ;;  %1793 = vmatpush1.bf16.msra.mxu1 %v5704_v45  ;;  %v6191_v41 = vld [vmem:[%s6020_s18 + $0x70] ss:$8 sps:$4 sm:$0xff]   ;;  %v446_v45 = vor.u32 %v444_v22, %v434_v15  ;;  %v532_v15 = vshrl.u32 %v6198_v44, 16  ;;  %v540_v22 = vshrl.u32 %v6215_v51, 16  ;;  %v526_v44 = vor.u32 %v524_v17, %v6268_v19 }
  0x3c   : > { %1066 = vmatprep.subr.bf16.mxu0 %v8023_v1  ;;  %2003 = vmatprep.subr.bf16.mxu1 %v8023_v1 }
  0x3d   : > { %v6232_v59 = vsel %vm387_vm0, %v446_v45, %v450_v24  ;;  %v5759_v45 = vld [vmem:[%s8020_s1 + $0x40] sm:$0xff]  }
  0x3e   : > { %818 = vmatmul.mubr.bf16.vlgmr.msra.gmra.mrb[0].mxu0 %v6085_v50  ;;  %1803 = vmatmul.mubr.bf16.vlgmr.msra.gmra.mrb[0].mxu1 %v6085_v50 }
  0x3f   : > { %1067 = vmatpush1.bf16.msra.mxu0 %v5711_v49  ;;  %2004 = vmatpush1.bf16.msra.mxu1 %v5712_v53  ;;  %v6212_v49 = vld [vmem:[%s6020_s18 + $0x94] ss:$8 sps:$4 sm:$0xff]   ;;  %v496_v53 = vshll.u32 %v6191_v41, 16 }
  0x40   : > { %4529 = vmatprep.mubr.msk.bf16.mxu0 %vm736_vm1, %v6093_v56  ;;  %4685 = vmatprep.mubr.msk.bf16.mxu1 %vm736_vm1, %v6093_v56  ;;  %v536_v0 = vshll.u32 %v6212_v49, 16  ;;  %v548_v21 = vshrl.u32 %v6212_v49, 16 }
  0x41   : > { %1068 = vmatprep.subr.bf16.mxu0 %v8023_v1  ;;  %2005 = vmatprep.subr.bf16.mxu1 %v8023_v1  ;;  %v6252_v11 = vrot.slane %v496_v53, 1  ;;  %v6318_v53 = vld [vmem:[%s6020_s18 + $0xc4] ss:$8 sps:$4 sm:$0xff]  }
  0x42   : > { %v6270_v20 = vrot.slane %v536_v0, 1 }
  0x43   : > { %1069 = vmatpush1.bf16.msra.mxu0 %v5716_v60  ;;  %2006 = vmatpush1.bf16.msra.mxu1 %v5717_v62  ;;  %v6234_v60 = vrot.slane %v504_v47, 1  ;;  %v508_v62 = vshrl.u32 %v6191_v41, 16  ;;  %v568_v47 = vshll.u32 %v6290_v29, 16 }
  0x44   : > { %1070 = vmatprep.subr.bf16.mxu0 %v8023_v1  ;;  %2007 = vmatprep.subr.bf16.mxu1 %v8023_v1 }
  0x45   : > { %v6339_v9 = vrot.slane %v568_v47, 1  ;;  %v518_v16 = vor.u32 %v516_v55, %v6234_v60  ;;  %v510_v32 = vor.u32 %v508_v62, %v6252_v11  ;;  %v6437_v47 = vld [vmem:[%s6020_s18 + $0xd0] ss:$8 sps:$4 sm:$0xff]  }
  0x46   : > { %826 = vmatmul.mubr.bf16.gmra.mrb[4].mxu0 %v6126_v7  ;;  %1811 = vmatmul.mubr.bf16.gmra.mrb[4].mxu1 %v6126_v7 }
  0x47   : > { %4530 = vmatprep.mubr.msk.bf16.mxu0 %vm736_vm1, %v6135_v10  ;;  %4686 = vmatprep.mubr.msk.bf16.mxu1 %vm736_vm1, %v6135_v10 }
  0x48   : > { %1071 = vmatpush1.bf16.msra.mxu0 %v5723_v5  ;;  %2008 = vmatpush1.bf16.msra.mxu1 %v5725_v8  ;;  %v6250_v5 = vld [vmem:[%s6020_s18 + $0xa0] ss:$8 sps:$4 sm:$0xff]   ;;  %v462_v8 = vor.u32 %v460_v26, %v450_v24  ;;  %v6279_v24 = vrot.slane %v528_v2, 1  ;;  %v5752_v26 = vld [vmem:[%s8020_s1 + $0x38] sm:$0xff]  }
  0x49   : > { %1072 = vmatprep.subr.bf16.mxu0 %v8023_v1  ;;  %2009 = vmatprep.subr.bf16.mxu1 %v8023_v1  ;;  %v544_v25 = vshll.u32 %v6250_v5, 16  ;;  %v5765_v2 = vld [vmem:[%s8020_s1 + $0x48] sm:$0xff]  }
  0x4a   : > { %v6298_v31 = vsel %vm387_vm0, %v462_v8, %v6177_v35  ;;  %v494_v8 = vor.u32 %v492_v43, %v6201_v46  ;;  %v6385_v43 = vld [vmem:[%s6020_s18 + $0xc0] ss:$8 sps:$4 sm:$0xff]   ;;  %v542_v49 = vor.u32 %v540_v22, %v6279_v24  ;;  %v6464_v22 = vld [vmem:[%s6020_s18 + $0xe4] ss:$8 sps:$4 sm:$0xff]  }
  0x4c   : > { %1073 = vmatpush1.bf16.msra.mxu0 %v5729_v23  ;;  %2010 = vmatpush1.bf16.msra.mxu1 %v5730_v27  ;;  %v486_v23 = vor.u32 %v484_v30, %v6175_v34  ;;  %v5753_v27 = vld [vmem:[%s8020_s1 + $0x158] sm:$0xff]   ;;  %v564_v30 = vshrl.u32 %v6229_v58, 16 }
  0x4d   : > { %1074 = vmatprep.subr.bf16.mxu0 %v8023_v1  ;;  %2011 = vmatprep.subr.bf16.mxu1 %v8023_v1  ;;  %v6301_v34 = vld [vmem:[%s6020_s18 + $0xb0] ss:$8 sps:$4 sm:$0xff]  }
  0x4e   : > { %834 = vmatmul.mubr.bf16.gmra.mrb[8].mxu0 %v6173_v33  ;;  %1819 = vmatmul.mubr.bf16.gmra.mrb[8].mxu1 %v6173_v33  ;;  %v560_v0 = vshll.u32 %v6301_v34, 16  ;;  %v572_v18 = vshrl.u32 %v6301_v34, 16  ;;  %v566_v51 = vor.u32 %v564_v30, %v6292_v6  ;;  %v616_v30 = vshll.u32 %v6464_v22, 16 }
  0x4f   : > { %4531 = vmatprep.mubr.msk.bf16.mxu0 %vm736_vm1, %v6184_v38  ;;  %4687 = vmatprep.mubr.msk.bf16.mxu1 %vm736_vm1, %v6184_v38 }
  0x50   : > { %1075 = vmatpush1.bf16.msra.mxu0 %v5734_v37  ;;  %2012 = vmatpush1.bf16.msra.mxu1 %v5735_v39  ;;  %v6305_v37 = vsel %vm387_vm0, %v486_v23, %v6193_v42  ;;  %v556_v39 = vshrl.u32 %v6250_v5, 16  ;;  %v5771_v42 = vld [vmem:[%s8020_s1 + $0x170] sm:$0xff]   ;;  %v5775_v23 = vld [vmem:[%s8020_s1 + $0x58] sm:$0xff]  }
  0x51   : > { %1076 = vmatprep.subr.bf16.mxu0 %v8023_v1  ;;  %2013 = vmatprep.subr.bf16.mxu1 %v8023_v1 }
  0x54   : > { %1077 = vmatpush1.bf16.msra.mxu0 %v5741_v54  ;;  %2014 = vmatpush1.bf16.msra.mxu1 %v5743_v57  ;;  %v478_v54 = vor.u32 %v476_v36, %v6177_v35  ;;  %v6327_v57 = vrot.slane %v544_v25, 1  ;;  %v5766_v35 = vld [vmem:[%s8020_s1 + $0x168] sm:$0xff]   ;;  %v584_v36 = vshll.u32 %v6318_v53, 16  ;;  %v5776_v25 = vld [vmem:[%s8020_s1 + $0x178] sm:$0xff]  }
  0x55   : > { %1078 = vmatprep.subr.bf16.mxu0 %v8023_v1  ;;  %2015 = vmatprep.subr.bf16.mxu1 %v8023_v1 }
  0x56   : > { %842 = vmatmul.mubr.bf16.gmra.mrb[12].mxu0 %v6232_v59  ;;  %1827 = vmatmul.mubr.bf16.gmra.mrb[12].mxu1 %v6232_v59  ;;  %v6352_v40 = vsel %vm387_vm0, %v478_v54, %v6201_v46  ;;  %v6391_v46 = vsel %vm387_vm0, %v494_v8, %v6252_v11  ;;  %v586_v55 = vrot.slane %v584_v36, 1  ;;  %v596_v11 = vshrl.u32 %v6318_v53, 16 }
  0x57   : > { %4532 = vmatprep.mubr.msk.bf16.mxu0 %vm736_vm1, %v6247_v4  ;;  %4688 = vmatprep.mubr.msk.bf16.mxu1 %vm736_vm1, %v6247_v4  ;;  %v6472_v54 = vsel %vm387_vm0, %v566_v51, %v6339_v9  ;;  %v628_v36 = vshrl.u32 %v6464_v22, 16 }
  0x58   : > { %1079 = vmatpush1.bf16.msra.mxu0 %v5747_v3  ;;  %2016 = vmatpush1.bf16.msra.mxu1 %v5748_v12  ;;  %v6359_v3 = vsel %vm387_vm0, %v502_v63, %v6234_v60  ;;  %v6370_v12 = vrot.slane %v560_v0, 1  ;;  %v576_v60 = vshll.u32 %v6385_v43, 16  ;;  %v558_v63 = vor.u32 %v556_v39, %v6327_v57  ;;  %v6489_v39 = vld [vmem:[%s6020_s18 + $0xe0] ss:$8 sps:$4 sm:$0xff]  }
  0x59   : > { %1080 = vmatprep.subr.bf16.mxu0 %v8023_v1  ;;  %2017 = vmatprep.subr.bf16.mxu1 %v8023_v1  ;;  %v604_v0 = vshrl.u32 %v6437_v47, 16 }
  0x5a   : > { %v578_v62 = vrot.slane %v576_v60, 1 }
  0x5c   : > { %1081 = vmatpush1.bf16.msra.mxu0 %v5752_v26  ;;  %2018 = vmatpush1.bf16.msra.mxu1 %v5753_v27  ;;  %v6395_v26 = vsel %vm387_vm0, %v518_v16, %v6259_v13  ;;  %v534_v27 = vor.u32 %v532_v15, %v6259_v13  ;;  %v550_v13 = vor.u32 %v548_v21, %v6270_v20  ;;  %v6434_v15 = vld [vmem:[%s6020_s18 + $0xd4] ss:$8 sps:$4 sm:$0xff]  }
  0x5d   : > { %1082 = vmatprep.subr.bf16.mxu0 %v8023_v1  ;;  %2019 = vmatprep.subr.bf16.mxu1 %v8023_v1  ;;  %v600_v17 = vshll.u32 %v6434_v15, 16  ;;  %v612_v21 = vshrl.u32 %v6434_v15, 16 }
  0x5e   : > { %850 = vmatmul.mubr.bf16.gmra.mrb[16].mxu0 %v6298_v31  ;;  %1835 = vmatmul.mubr.bf16.gmra.mrb[16].mxu1 %v6298_v31  ;;  %v6418_v41 = vsel %vm387_vm0, %v534_v27, %v6270_v20  ;;  %v6445_v48 = vsel %vm387_vm0, %v550_v13, %v6292_v6  ;;  %v592_v20 = vshll.u32 %v6437_v47, 16 }
  0x5f   : > { %4533 = vmatprep.mubr.msk.bf16.mxu0 %vm736_vm1, %v6305_v37  ;;  %4689 = vmatprep.mubr.msk.bf16.mxu1 %vm736_vm1, %v6305_v37  ;;  %v602_v58 = vrot.slane %v600_v17, 1 }
  0x60   : > { %1083 = vmatpush1.bf16.msra.mxu0 %v5759_v45  ;;  %2020 = vmatpush1.bf16.msra.mxu1 %v5761_v52  ;;  %v6414_v45 = vsel %vm387_vm0, %v510_v32, %v6268_v19  ;;  %v6441_v52 = vsel %vm387_vm0, %v526_v44, %v6279_v24  ;;  %v588_v19 = vshrl.u32 %v6385_v43, 16  ;;  %v6468_v24 = vsel %vm387_vm0, %v542_v49, %v6327_v57 }
  0x61   : > { %1084 = vmatprep.subr.bf16.mxu0 %v8023_v1  ;;  %2021 = vmatprep.subr.bf16.mxu1 %v8023_v1  ;;  %v594_v6 = vrot.slane %v592_v20, 1  ;;  %v6493_v57 = vsel %vm387_vm0, %v558_v63, %v6370_v12  ;;  %v614_v16 = vor.u32 %v612_v21, %v602_v58  ;;  %v620_v49 = vshrl.u32 %v6489_v39, 16 }
  0x62   : > { %v6556_v63 = vrot.slane %v8023_v1, 1 }
  0x63   : > { %v606_v60 = vor.u32 %v604_v0, %v594_v6 }
  0x64   : > { %1085 = vmatpush1.bf16.msra.mxu0 %v5765_v2  ;;  %2022 = vmatpush1.bf16.msra.mxu1 %v5766_v35  ;;  %v582_v2 = vor.u32 %v580_v61, %v6339_v9  ;;  %v574_v61 = vor.u32 %v572_v18, %v6370_v12  ;;  %v608_v9 = vshll.u32 %v6489_v39, 16  ;;  %v590_v12 = vor.u32 %v588_v19, %v578_v62 }
  0x65   : > { %1086 = vmatprep.subr.bf16.mxu0 %v8023_v1  ;;  %2023 = vmatprep.subr.bf16.mxu1 %v8023_v1  ;;  %v618_v18 = vrot.slane %v616_v30, 1 }
  0x66   : > { %858 = vmatmul.mubr.bf16.gmra.mrb[20].mxu0 %v6352_v40  ;;  %1843 = vmatmul.mubr.bf16.gmra.mrb[20].mxu1 %v6352_v40  ;;  %v6496_v35 = vsel %vm387_vm0, %v582_v2, %v586_v55  ;;  %v6513_v8 = vsel %vm387_vm0, %v574_v61, %v578_v62  ;;  %v6526_v32 = vsel %vm387_vm0, %v590_v12, %v594_v6  ;;  %v610_v27 = vrot.slane %v608_v9, 1  ;;  %v6536_v62 = vld [vmem:[%s6020_s18 + $0xf0] ss:$8 sps:$4 sm:$0xff]   ;;  %v6579_v9 = vld [vmem:[%s6020_s18 + $0x4] ss:$8 sps:$4 sm:$0xff]  }
  0x67   : > { %4534 = vmatprep.mubr.msk.bf16.mxu0 %vm736_vm1, %v6359_v3  ;;  %4690 = vmatprep.mubr.msk.bf16.mxu1 %vm736_vm1, %v6359_v3  ;;  %v624_v17 = vshll.u32 %v6536_v62, 16  ;;  %v636_v30 = vshrl.u32 %v6536_v62, 16  ;;  %v6592_v12 = vld [vmem:[%s6020_s18] ss:$8 sps:$4 sm:$0xff]  }
  0x68   : > { %1087 = vmatpush1.bf16.msra.mxu0 %v5770_v14  ;;  %2024 = vmatpush1.bf16.msra.mxu1 %v5771_v42  ;;  %v598_v14 = vor.u32 %v596_v11, %v586_v55  ;;  %v6510_v42 = vld [vmem:[%s6020_s18 + $0xf4] ss:$8 sps:$4 sm:$0xff]   ;;  %v6529_v55 = vsel %vm387_vm0, %v614_v16, %v618_v18  ;;  %v630_v11 = vor.u32 %v628_v36, %v618_v18  ;;  %v5777_v36 = vld [vmem:[%s8020_s1 + $0xc0] sm:$0xff]   ;;  %v5779_v18 = vld [vmem:[%s8020_s1 + $0xc8] sm:$0xff]  }
  0x69   : > { %1088 = vmatprep.subr.bf16.mxu0 %v8023_v1  ;;  %2025 = vmatprep.subr.bf16.mxu1 %v8023_v1  ;;  %v6541_v13 = vsel %vm387_vm0, %v606_v60, %v610_v27  ;;  %v644_v20 = vshrl.u32 %v6510_v42, 16  ;;  %v622_v21 = vor.u32 %v620_v49, %v610_v27  ;;  %v626_v51 = vrot.slane %v624_v17, 1  ;;  %v5780_v16 = vld [vmem:[%s8020_s1 + $0x1e8] sm:$0xff]   ;;  %v5781_v60 = vld [vmem:[%s8020_s1 + $0xd0] sm:$0xff]   ;;  %v5783_v49 = vld [vmem:[%s8020_s1 + $0xd8] sm:$0xff]  }
  0x6a   : > { %v5782_v27 = vld [vmem:[%s8020_s1 + $0x1f0] sm:$0xff]   ;;  %v5784_v17 = vld [vmem:[%s8020_s1 + $0x1f8] sm:$0xff]  }
  0x6b   : > { %v6559_v6 = vsel %vm387_vm0, %v622_v21, %v626_v51  ;;  %v638_v2 = vor.u32 %v636_v30, %v626_v51  ;;  %v5786_v21 = vld [vmem:[%s8020_s1 + $0x200] sm:$0xff]   ;;  %v5787_v30 = vld [vmem:[%s8020_s1 + $0xe8] sm:$0xff]  }
  0x6c   : > { %1089 = vmatpush1.bf16.msra.mxu0 %v5775_v23  ;;  %2026 = vmatpush1.bf16.msra.mxu1 %v5776_v25  ;;  %v6516_v23 = vsel %vm387_vm0, %v598_v14, %v602_v58  ;;  %v632_v25 = vshll.u32 %v6510_v42, 16  ;;  %v5778_v14 = vld [vmem:[%s8020_s1 + $0x1e0] sm:$0xff]  }
  0x6d   : > { %1455 = vmatprep.subr.bf16.mxu0 %v8023_v1  ;;  %2261 = vmatprep.subr.bf16.mxu1 %v8023_v1  ;;  %v6574_v61 = vsel %vm387_vm0, %v638_v2, %v6556_v63  ;;  %v6647_v51 = vld [vmem:[%s6020_s18 + $0x20] ss:$8 sps:$4 sm:$0xff]  }
  0x6e   : > { %866 = vmatmul.mubr.bf16.gmra.mrb[24].mxu0 %v6391_v46  ;;  %1851 = vmatmul.mubr.bf16.gmra.mrb[24].mxu1 %v6391_v46  ;;  %v634_v44 = vrot.slane %v632_v25, 1  ;;  %8082 = vst [vmem:[#allocation3_spill] sm:$0xff] %v6574_v61  ;;  %v6600_v25 = vld [vmem:[%s6020_s18 + $0x14] ss:$8 sps:$4 sm:$0xff]   ;;  %v5788_v2 = vld [vmem:[%s8020_s1 + $0x208] sm:$0xff]  }
  0x6f   : > { %4535 = vmatprep.mubr.msk.bf16.mxu0 %vm736_vm1, %v6395_v26  ;;  %4691 = vmatprep.mubr.msk.bf16.mxu1 %vm736_vm1, %v6395_v26 }
  0x70   : > { %v6546_v19 = vsel %vm387_vm0, %v630_v11, %v634_v44  ;;  %v646_v58 = vor.u32 %v644_v20, %v634_v44  ;;  %v6620_v44 = vld [vmem:[%s6020_s18 + $0x10] ss:$8 sps:$4 sm:$0xff]   ;;  %v6625_v11 = vld [vmem:[%s6020_s18 + $0x24] ss:$8 sps:$4 sm:$0xff]  }
  0x71   : > { %v5785_v20 = vld [vmem:[%s8020_s1 + $0xe0] sm:$0xff]  }
  0x72   : > { %v6564_v0 = vsel %vm387_vm0, %v646_v58, %v6556_v63  ;;  %v6653_v58 = vld [vmem:[%s6020_s18 + $0x34] ss:$8 sps:$4 sm:$0xff]  }
  0x73   : > { %8081 = vst [vmem:[#allocation2_spill] sm:$0xff] %v6564_v0 }
  0x76   : > { %874 = vmatmul.mubr.bf16.gmra.mrb[28].mxu0 %v6414_v45  ;;  %1859 = vmatmul.mubr.bf16.gmra.mrb[28].mxu1 %v6414_v45 }
  0x77   : > { %4536 = vmatprep.mubr.msk.bf16.mxu0 %vm736_vm1, %v6418_v41  ;;  %4692 = vmatprep.mubr.msk.bf16.mxu1 %vm736_vm1, %v6418_v41 }
  0x7e   : > { %882 = vmatmul.mubr.bf16.gmra.mrb[32].mxu0 %v6441_v52  ;;  %1867 = vmatmul.mubr.bf16.gmra.mrb[32].mxu1 %v6441_v52 }
  0x7f   : > { %4537 = vmatprep.mubr.msk.bf16.mxu0 %vm736_vm1, %v6445_v48  ;;  %4693 = vmatprep.mubr.msk.bf16.mxu1 %vm736_vm1, %v6445_v48 }
  0x86   : > { %890 = vmatmul.mubr.bf16.gmra.mrb[36].mxu0 %v6468_v24  ;;  %1875 = vmatmul.mubr.bf16.gmra.mrb[36].mxu1 %v6468_v24 }
  0x87   : > { %4538 = vmatprep.mubr.msk.bf16.mxu0 %vm736_vm1, %v6472_v54  ;;  %4694 = vmatprep.mubr.msk.bf16.mxu1 %vm736_vm1, %v6472_v54 }
  0x8e   : > { %898 = vmatmul.mubr.bf16.gmra.mrb[40].mxu0 %v6493_v57  ;;  %1883 = vmatmul.mubr.bf16.gmra.mrb[40].mxu1 %v6493_v57 }
  0x8f   : > { %4539 = vmatprep.mubr.msk.bf16.mxu0 %vm736_vm1, %v6496_v35  ;;  %4695 = vmatprep.mubr.msk.bf16.mxu1 %vm736_vm1, %v6496_v35 }
  0x96   : > { %906 = vmatmul.mubr.bf16.gmra.mrb[44].mxu0 %v6513_v8  ;;  %1891 = vmatmul.mubr.bf16.gmra.mrb[44].mxu1 %v6513_v8 }
  0x97   : > { %4540 = vmatprep.mubr.msk.bf16.mxu0 %vm736_vm1, %v6516_v23  ;;  %4696 = vmatprep.mubr.msk.bf16.mxu1 %vm736_vm1, %v6516_v23 }
  0x9e   : > { %914 = vmatmul.mubr.bf16.gmra.mrb[48].mxu0 %v6526_v32  ;;  %1899 = vmatmul.mubr.bf16.gmra.mrb[48].mxu1 %v6526_v32 }
  0x9f   : > { %4541 = vmatprep.mubr.msk.bf16.mxu0 %vm736_vm1, %v6529_v55  ;;  %4697 = vmatprep.mubr.msk.bf16.mxu1 %vm736_vm1, %v6529_v55 }
  0xa6   : > { %922 = vmatmul.mubr.bf16.gmra.mrb[52].mxu0 %v6541_v13  ;;  %1907 = vmatmul.mubr.bf16.gmra.mrb[52].mxu1 %v6541_v13 }
  0xa7   : > { %4542 = vmatprep.mubr.msk.bf16.mxu0 %vm736_vm1, %v6546_v19  ;;  %4698 = vmatprep.mubr.msk.bf16.mxu1 %vm736_vm1, %v6546_v19 }
  0xae   : > { %930 = vmatmul.mubr.bf16.gmra.mrb[56].mxu0 %v6559_v6  ;;  %1915 = vmatmul.mubr.bf16.gmra.mrb[56].mxu1 %v6559_v6 }
  0xaf   : > { %4543 = vmatprep.mubr.msk.bf16.mxu0 %vm736_vm1, %v6564_v0  ;;  %4699 = vmatprep.mubr.msk.bf16.mxu1 %vm736_vm1, %v6564_v0  ;;  %v5802_v0 = vld [vmem:[%s8020_s1 + $0x3c0] sm:$0xff]  }
  0xb6   : > { %938 = vmatmul.mubr.bf16.gmra.mrb[60].mxu0 %v6574_v61  ;;  %1923 = vmatmul.mubr.bf16.gmra.mrb[60].mxu1 %v6574_v61  ;;  %v6795_v61 = vld [vmem:[%s6020_s18 + $0xa4] ss:$8 sps:$4 sm:$0xff]  }
  0xb7   : > { %4556 = vmatprep.mubr.msk.bf16.mxu0 %vm736_vm1, %v6579_v9  ;;  %4712 = vmatprep.mubr.msk.bf16.mxu1 %vm736_vm1, %v6579_v9 }
  0xbe   : > { %1099 = vmatmul.mubr.bf16.vlgmr.msra.gmra.mrb[0].mxu0 %v6592_v12  ;;  %2036 = vmatmul.mubr.bf16.vlgmr.msra.gmra.mrb[0].mxu1 %v6592_v12 }
  0xbf   : > { %1456 = vmatpush1.bf16.msra.mxu0 %v5777_v36  ;;  %2262 = vmatpush1.bf16.msra.mxu1 %v5778_v14  ;;  %v5789_v36 = vld [vmem:[%s8020_s1 + $0xf0] sm:$0xff]  }
  0xc0   : > { %4557 = vmatprep.mubr.msk.bf16.mxu0 %vm736_vm1, %v6600_v25  ;;  %4713 = vmatprep.mubr.msk.bf16.mxu1 %vm736_vm1, %v6600_v25  ;;  %v5790_v14 = vld [vmem:[%s8020_s1 + $0x210] sm:$0xff]  }
  0xc1   : > { %1457 = vmatprep.subr.bf16.mxu0 %v8023_v1  ;;  %2263 = vmatprep.subr.bf16.mxu1 %v8023_v1 }
  0xc3   : > { %1458 = vmatpush1.bf16.msra.mxu0 %v5779_v18  ;;  %2264 = vmatpush1.bf16.msra.mxu1 %v5780_v16  ;;  %v6675_v18 = vld [vmem:[%s6020_s18 + $0x30] ss:$8 sps:$4 sm:$0xff]   ;;  %v6681_v16 = vld [vmem:[%s6020_s18 + $0x44] ss:$8 sps:$4 sm:$0xff]  }
  0xc4   : > { %1459 = vmatprep.subr.bf16.mxu0 %v8023_v1  ;;  %2265 = vmatprep.subr.bf16.mxu1 %v8023_v1 }
  0xc6   : > { %1107 = vmatmul.mubr.bf16.gmra.mrb[4].mxu0 %v6620_v44  ;;  %2044 = vmatmul.mubr.bf16.gmra.mrb[4].mxu1 %v6620_v44 }
  0xc7   : > { %4558 = vmatprep.mubr.msk.bf16.mxu0 %vm736_vm1, %v6625_v11  ;;  %4714 = vmatprep.mubr.msk.bf16.mxu1 %vm736_vm1, %v6625_v11 }
  0xc8   : > { %1460 = vmatpush1.bf16.msra.mxu0 %v5781_v60  ;;  %2266 = vmatpush1.bf16.msra.mxu1 %v5782_v27  ;;  %v5791_v60 = vld [vmem:[%s8020_s1 + $0xf8] sm:$0xff]  }
  0xc9   : > { %1461 = vmatprep.subr.bf16.mxu0 %v8023_v1  ;;  %2267 = vmatprep.subr.bf16.mxu1 %v8023_v1  ;;  %v5792_v27 = vld [vmem:[%s8020_s1 + $0x218] sm:$0xff]  }
  0xcc   : > { %1462 = vmatpush1.bf16.msra.mxu0 %v5783_v49  ;;  %2268 = vmatpush1.bf16.msra.mxu1 %v5784_v17  ;;  %v5793_v49 = vld [vmem:[%s8020_s1 + $0x100] sm:$0xff]  }
  0xcd   : > { %1463 = vmatprep.subr.bf16.mxu0 %v8023_v1  ;;  %2269 = vmatprep.subr.bf16.mxu1 %v8023_v1  ;;  %v5794_v17 = vld [vmem:[%s8020_s1 + $0x220] sm:$0xff]  }
  0xce   : > { %1115 = vmatmul.mubr.bf16.gmra.mrb[8].mxu0 %v6647_v51  ;;  %2052 = vmatmul.mubr.bf16.gmra.mrb[8].mxu1 %v6647_v51 }
  0xcf   : > { %4559 = vmatprep.mubr.msk.bf16.mxu0 %vm736_vm1, %v6653_v58  ;;  %4715 = vmatprep.mubr.msk.bf16.mxu1 %vm736_vm1, %v6653_v58 }
  0xd0   : > { %1464 = vmatpush1.bf16.msra.mxu0 %v5785_v20  ;;  %2270 = vmatpush1.bf16.msra.mxu1 %v5786_v21  ;;  %v6703_v20 = vld [vmem:[%s6020_s18 + $0x40] ss:$8 sps:$4 sm:$0xff]   ;;  %v6709_v21 = vld [vmem:[%s6020_s18 + $0x54] ss:$8 sps:$4 sm:$0xff]  }
  0xd1   : > { %1465 = vmatprep.subr.bf16.mxu0 %v8023_v1  ;;  %2271 = vmatprep.subr.bf16.mxu1 %v8023_v1 }
  0xd4   : > { %1466 = vmatpush1.bf16.msra.mxu0 %v5787_v30  ;;  %2272 = vmatpush1.bf16.msra.mxu1 %v5788_v2  ;;  %v5795_v30 = vld [vmem:[%s8020_s1 + $0x108] sm:$0xff]  }
  0xd5   : > { %1467 = vmatprep.subr.bf16.mxu0 %v8023_v1  ;;  %2273 = vmatprep.subr.bf16.mxu1 %v8023_v1  ;;  %v5796_v2 = vld [vmem:[%s8020_s1 + $0x228] sm:$0xff]  }
  0xd6   : > { %1123 = vmatmul.mubr.bf16.gmra.mrb[12].mxu0 %v6675_v18  ;;  %2060 = vmatmul.mubr.bf16.gmra.mrb[12].mxu1 %v6675_v18 }
  0xd7   : > { %4560 = vmatprep.mubr.msk.bf16.mxu0 %vm736_vm1, %v6681_v16  ;;  %4716 = vmatprep.mubr.msk.bf16.mxu1 %vm736_vm1, %v6681_v16 }
  0xd8   : > { %1468 = vmatpush1.bf16.msra.mxu0 %v5789_v36  ;;  %2274 = vmatpush1.bf16.msra.mxu1 %v5790_v14  ;;  %v5797_v36 = vld [vmem:[%s8020_s1 + $0x110] sm:$0xff]  }
  0xd9   : > { %1469 = vmatprep.subr.bf16.mxu0 %v8023_v1  ;;  %2275 = vmatprep.subr.bf16.mxu1 %v8023_v1  ;;  %v5798_v14 = vld [vmem:[%s8020_s1 + $0x230] sm:$0xff]  }
  0xdc   : > { %1470 = vmatpush1.bf16.msra.mxu0 %v5791_v60  ;;  %2276 = vmatpush1.bf16.msra.mxu1 %v5792_v27  ;;  %v6731_v60 = vld [vmem:[%s6020_s18 + $0x50] ss:$8 sps:$4 sm:$0xff]   ;;  %v6737_v27 = vld [vmem:[%s6020_s18 + $0x64] ss:$8 sps:$4 sm:$0xff]  }
  0xdd   : > { %1471 = vmatprep.subr.bf16.mxu0 %v8023_v1  ;;  %2277 = vmatprep.subr.bf16.mxu1 %v8023_v1 }
  0xde   : > { %1131 = vmatmul.mubr.bf16.gmra.mrb[16].mxu0 %v6703_v20  ;;  %2068 = vmatmul.mubr.bf16.gmra.mrb[16].mxu1 %v6703_v20 }
  0xdf   : > { %4561 = vmatprep.mubr.msk.bf16.mxu0 %vm736_vm1, %v6709_v21  ;;  %4717 = vmatprep.mubr.msk.bf16.mxu1 %vm736_vm1, %v6709_v21 }
  0xe0   : > { %1472 = vmatpush1.bf16.msra.mxu0 %v5793_v49  ;;  %2278 = vmatpush1.bf16.msra.mxu1 %v5794_v17  ;;  %v5799_v49 = vld [vmem:[%s8020_s1 + $0x118] sm:$0xff]  }
  0xe1   : > { %1473 = vmatprep.subr.bf16.mxu0 %v8023_v1  ;;  %2279 = vmatprep.subr.bf16.mxu1 %v8023_v1  ;;  %v5800_v17 = vld [vmem:[%s8020_s1 + $0x238] sm:$0xff]  }
  0xe4   : > { %1474 = vmatpush1.bf16.msra.mxu0 %v5795_v30  ;;  %2280 = vmatpush1.bf16.msra.mxu1 %v5796_v2  ;;  %v6753_v30 = vld [vmem:[%s6020_s18 + $0x60] ss:$8 sps:$4 sm:$0xff]   ;;  %v6759_v2 = vld [vmem:[%s6020_s18 + $0x74] ss:$8 sps:$4 sm:$0xff]  }
  0xe5   : > { %1475 = vmatprep.subr.bf16.mxu0 %v8023_v1  ;;  %2281 = vmatprep.subr.bf16.mxu1 %v8023_v1 }
  0xe6   : > { %1139 = vmatmul.mubr.bf16.gmra.mrb[20].mxu0 %v6731_v60  ;;  %2076 = vmatmul.mubr.bf16.gmra.mrb[20].mxu1 %v6731_v60 }
  0xe7   : > { %4562 = vmatprep.mubr.msk.bf16.mxu0 %vm736_vm1, %v6737_v27  ;;  %4718 = vmatprep.mubr.msk.bf16.mxu1 %vm736_vm1, %v6737_v27 }
  0xe8   : > { %1476 = vmatpush1.bf16.msra.mxu0 %v5797_v36  ;;  %2282 = vmatpush1.bf16.msra.mxu1 %v5798_v14  ;;  %v6766_v36 = vld [vmem:[%s6020_s18 + $0x70] ss:$8 sps:$4 sm:$0xff]   ;;  %v6771_v14 = vld [vmem:[%s6020_s18 + $0x84] ss:$8 sps:$4 sm:$0xff]  }
  0xe9   : > { %1477 = vmatprep.subr.bf16.mxu0 %v8023_v1  ;;  %2283 = vmatprep.subr.bf16.mxu1 %v8023_v1 }
  0xec   : > { %1478 = vmatpush1.bf16.msra.mxu0 %v5799_v49  ;;  %2284 = vmatpush1.bf16.msra.mxu1 %v5800_v17  ;;  %v6778_v49 = vld [vmem:[%s6020_s18 + $0x80] ss:$8 sps:$4 sm:$0xff]   ;;  %v6783_v17 = vld [vmem:[%s6020_s18 + $0x94] ss:$8 sps:$4 sm:$0xff]  }
  0xed   : > { %2608 = vmatprep.subr.bf16.mxu0 %v8023_v1  ;;  %3446 = vmatprep.subr.bf16.mxu1 %v8023_v1  ;;  %v6790_v1 = vld [vmem:[%s6020_s18 + $0x90] ss:$8 sps:$4 sm:$0xff]  }
  0xee   : > { %1147 = vmatmul.mubr.bf16.gmra.mrb[24].mxu0 %v6753_v30  ;;  %2084 = vmatmul.mubr.bf16.gmra.mrb[24].mxu1 %v6753_v30 }
  0xef   : > { %4563 = vmatprep.mubr.msk.bf16.mxu0 %vm736_vm1, %v6759_v2  ;;  %4719 = vmatprep.mubr.msk.bf16.mxu1 %vm736_vm1, %v6759_v2 }
  0xf6   : > { %1155 = vmatmul.mubr.bf16.gmra.mrb[28].mxu0 %v6766_v36  ;;  %2092 = vmatmul.mubr.bf16.gmra.mrb[28].mxu1 %v6766_v36 }
  0xf7   : > { %4564 = vmatprep.mubr.msk.bf16.mxu0 %vm736_vm1, %v6771_v14  ;;  %4720 = vmatprep.mubr.msk.bf16.mxu1 %vm736_vm1, %v6771_v14 }
  0xfe   : > { %1163 = vmatmul.mubr.bf16.gmra.mrb[32].mxu0 %v6778_v49  ;;  %2100 = vmatmul.mubr.bf16.gmra.mrb[32].mxu1 %v6778_v49 }
  0xff   : > { %4565 = vmatprep.mubr.msk.bf16.mxu0 %vm736_vm1, %v6783_v17  ;;  %4721 = vmatprep.mubr.msk.bf16.mxu1 %vm736_vm1, %v6783_v17 }
 0x106   : > { %1171 = vmatmul.mubr.bf16.gmra.mrb[36].mxu0 %v6790_v1  ;;  %2108 = vmatmul.mubr.bf16.gmra.mrb[36].mxu1 %v6790_v1 }
 0x107   : > { %4566 = vmatprep.mubr.msk.bf16.mxu0 %vm736_vm1, %v6795_v61  ;;  %4722 = vmatprep.mubr.msk.bf16.mxu1 %vm736_vm1, %v6795_v61 }
 0x10e   : > { %1179 = vmatmul.mubr.bf16.gmra.mrb[40].mxu0 %v6250_v5  ;;  %2116 = vmatmul.mubr.bf16.gmra.mrb[40].mxu1 %v6250_v5  ;;  %v1257_v5 = vrot.slane %v6579_v9, 1  ;;  %v1262_v9 = vrot.slane %v6625_v11, 1  ;;  %v5803_v11 = vld [vmem:[%s8020_s1 + $0x2a8] sm:$0xff]  }
 0x10f   : > { %4567 = vmatprep.mubr.msk.bf16.mxu0 %vm736_vm1, %v6290_v29  ;;  %4723 = vmatprep.mubr.msk.bf16.mxu1 %vm736_vm1, %v6290_v29  ;;  %v1258_v29 = vrot.slane %v6600_v25, 1 }
 0x116   : > { %1187 = vmatmul.mubr.bf16.gmra.mrb[44].mxu0 %v6301_v34  ;;  %2124 = vmatmul.mubr.bf16.gmra.mrb[44].mxu1 %v6301_v34  ;;  %v6834_v34 = vsel %vm1253_vm2, %v1257_v5, %v1258_v29  ;;  %v5801_v5 = vld [vmem:[%s8020_s1 + $0x2a0] sm:$0xff]  }
 0x117   : > { %4568 = vmatprep.mubr.msk.bf16.mxu0 %vm736_vm1, %v6318_v53  ;;  %4724 = vmatprep.mubr.msk.bf16.mxu1 %vm736_vm1, %v6318_v53  ;;  %v1254_v53 = vrot.slane %v6592_v12, 1  ;;  %v6855_v12 = vsel %vm1253_vm2, %v1258_v29, %v1262_v9  ;;  %v5804_v29 = vld [vmem:[%s8020_s1 + $0x3c8] sm:$0xff]  }
 0x118   : > { %8083 = vst [vmem:[#allocation4_spill] sm:$0xff] %v6855_v12 }
 0x11e   : > { %1195 = vmatmul.mubr.bf16.gmra.mrb[48].mxu0 %v6385_v43  ;;  %2132 = vmatmul.mubr.bf16.gmra.mrb[48].mxu1 %v6385_v43  ;;  %v1255_v43 = vrot.slane %v6620_v44, 1  ;;  %v1260_v44 = vrot.slane %v6647_v51, 1 }
 0x11f   : > { %4569 = vmatprep.mubr.msk.bf16.mxu0 %vm736_vm1, %v6434_v15  ;;  %4725 = vmatprep.mubr.msk.bf16.mxu1 %vm736_vm1, %v6434_v15 }
 0x120   : > { %v6846_v25 = vsel %vm1253_vm2, %v1254_v53, %v1255_v43  ;;  %v1266_v53 = vrot.slane %v6653_v58, 1  ;;  %v6874_v51 = vsel %vm1253_vm2, %v1255_v43, %v1260_v44  ;;  %v5805_v58 = vld [vmem:[%s8020_s1 + $0x2b0] sm:$0xff]   ;;  %v1264_v43 = vrot.slane %v6675_v18, 1 }
 0x122   : > { %v6904_v18 = vsel %vm1253_vm2, %v1260_v44, %v1264_v43  ;;  %v1268_v44 = vrot.slane %v6703_v20, 1 }
 0x124   : > { %v6934_v20 = vsel %vm1253_vm2, %v1264_v43, %v1268_v44  ;;  %v1272_v43 = vrot.slane %v6731_v60, 1 }
 0x126   : > { %1203 = vmatmul.mubr.bf16.gmra.mrb[52].mxu0 %v6437_v47  ;;  %2140 = vmatmul.mubr.bf16.gmra.mrb[52].mxu1 %v6437_v47  ;;  %v6964_v60 = vsel %vm1253_vm2, %v1268_v44, %v1272_v43  ;;  %v1276_v44 = vrot.slane %v6753_v30, 1 }
 0x127   : > { %4570 = vmatprep.mubr.msk.bf16.mxu0 %vm736_vm1, %v6464_v22  ;;  %4726 = vmatprep.mubr.msk.bf16.mxu1 %vm736_vm1, %v6464_v22 }
 0x128   : > { %v6994_v30 = vsel %vm1253_vm2, %v1272_v43, %v1276_v44  ;;  %v1280_v43 = vrot.slane %v6766_v36, 1 }
 0x12a   : > { %v7024_v36 = vsel %vm1253_vm2, %v1276_v44, %v1280_v43  ;;  %v1290_v44 = vrot.slane %v6783_v17, 1  ;;  %v1294_v17 = vrot.slane %v6795_v61, 1  ;;  %v7070_v61 = vld [vmem:[%s6020_s18 + $0xb4] ss:$8 sps:$4 sm:$0xff]  }
 0x12e   : > { %1211 = vmatmul.mubr.bf16.gmra.mrb[56].mxu0 %v6489_v39  ;;  %2148 = vmatmul.mubr.bf16.gmra.mrb[56].mxu1 %v6489_v39 }
 0x12f   : > { %4571 = vmatprep.mubr.msk.bf16.mxu0 %vm736_vm1, %v6510_v42  ;;  %4727 = vmatprep.mubr.msk.bf16.mxu1 %vm736_vm1, %v6510_v42 }
 0x136   : > { %1219 = vmatmul.mubr.bf16.gmra.mrb[60].mxu0 %v6536_v62  ;;  %2156 = vmatmul.mubr.bf16.gmra.mrb[60].mxu1 %v6536_v62 }
 0x137   : > { %4608 = vmatprep.mubr.msk.bf16.mxu0 %vm736_vm1, %v6834_v34  ;;  %4764 = vmatprep.mubr.msk.bf16.mxu1 %vm736_vm1, %v6834_v34 }
 0x13e   : > { %1488 = vmatmul.mubr.bf16.vlgmr.msra.gmra.mrb[0].mxu0 %v6846_v25  ;;  %2294 = vmatmul.mubr.bf16.vlgmr.msra.gmra.mrb[0].mxu1 %v6846_v25 }
 0x13f   : > { %2609 = vmatpush1.bf16.msra.mxu0 %v5801_v5  ;;  %3447 = vmatpush1.bf16.msra.mxu1 %v5802_v0  ;;  %v8084_v5 = vmov 0   ;;  %v6877_v0 = vsel %vm1253_vm2, %v1262_v9, %v1266_v53  ;;  %v1270_v9 = vrot.slane %v6681_v16, 1  ;;  %v5809_v16 = vld [vmem:[%s8020_s1 + $0x2c0] sm:$0xff]  }
 0x140   : > { %4609 = vmatprep.mubr.msk.bf16.mxu0 %vm736_vm1, %v6855_v12  ;;  %4765 = vmatprep.mubr.msk.bf16.mxu1 %vm736_vm1, %v6855_v12  ;;  %8085 = vst [vmem:[#allocation5_spill] sm:$0xff] %v6877_v0  ;;  %v5806_v12 = vld [vmem:[%s8020_s1 + $0x3d0] sm:$0xff]  }
 0x141   : > { %2610 = vmatprep.subr.bf16.mxu0 %v8084_v5  ;;  %3448 = vmatprep.subr.bf16.mxu1 %v8084_v5 }
 0x143   : > { %2611 = vmatpush1.bf16.msra.mxu0 %v5803_v11  ;;  %3449 = vmatpush1.bf16.msra.mxu1 %v5804_v29  ;;  %v5807_v11 = vld [vmem:[%s8020_s1 + $0x2b8] sm:$0xff]  }
 0x144   : > { %2612 = vmatprep.subr.bf16.mxu0 %v8084_v5  ;;  %3450 = vmatprep.subr.bf16.mxu1 %v8084_v5  ;;  %v5808_v29 = vld [vmem:[%s8020_s1 + $0x3d8] sm:$0xff]  }
 0x146   : > { %1496 = vmatmul.mubr.bf16.gmra.mrb[4].mxu0 %v6874_v51  ;;  %2302 = vmatmul.mubr.bf16.gmra.mrb[4].mxu1 %v6874_v51 }
 0x147   : > { %4610 = vmatprep.mubr.msk.bf16.mxu0 %vm736_vm1, %v6877_v0  ;;  %4766 = vmatprep.mubr.msk.bf16.mxu1 %vm736_vm1, %v6877_v0  ;;  %v6907_v0 = vsel %vm1253_vm2, %v1266_v53, %v1270_v9  ;;  %v1274_v53 = vrot.slane %v6709_v21, 1  ;;  %v5813_v21 = vld [vmem:[%s8020_s1 + $0x2d0] sm:$0xff]  }
 0x148   : > { %2613 = vmatpush1.bf16.msra.mxu0 %v5805_v58  ;;  %3451 = vmatpush1.bf16.msra.mxu1 %v5806_v12  ;;  %v5810_v12 = vld [vmem:[%s8020_s1 + $0x3e0] sm:$0xff]   ;;  %v5811_v58 = vld [vmem:[%s8020_s1 + $0x2c8] sm:$0xff]  }
 0x149   : > { %2614 = vmatprep.subr.bf16.mxu0 %v8084_v5  ;;  %3452 = vmatprep.subr.bf16.mxu1 %v8084_v5 }
 0x14c   : > { %2615 = vmatpush1.bf16.msra.mxu0 %v5807_v11  ;;  %3453 = vmatpush1.bf16.msra.mxu1 %v5808_v29  ;;  %v5812_v11 = vld [vmem:[%s8020_s1 + $0x3e8] sm:$0xff]   ;;  %v6937_v29 = vsel %vm1253_vm2, %v1270_v9, %v1274_v53  ;;  %v1278_v9 = vrot.slane %v6737_v27, 1  ;;  %v5817_v27 = vld [vmem:[%s8020_s1 + $0x2e0] sm:$0xff]  }
 0x14d   : > { %2616 = vmatprep.subr.bf16.mxu0 %v8084_v5  ;;  %3454 = vmatprep.subr.bf16.mxu1 %v8084_v5 }
 0x14e   : > { %1504 = vmatmul.mubr.bf16.gmra.mrb[8].mxu0 %v6904_v18  ;;  %2310 = vmatmul.mubr.bf16.gmra.mrb[8].mxu1 %v6904_v18 }
 0x14f   : > { %4611 = vmatprep.mubr.msk.bf16.mxu0 %vm736_vm1, %v6907_v0  ;;  %4767 = vmatprep.mubr.msk.bf16.mxu1 %vm736_vm1, %v6907_v0 }
 0x150   : > { %2617 = vmatpush1.bf16.msra.mxu0 %v5809_v16  ;;  %3455 = vmatpush1.bf16.msra.mxu1 %v5810_v12  ;;  %v5814_v16 = vld [vmem:[%s8020_s1 + $0x3f0] sm:$0xff]   ;;  %v5815_v12 = vld [vmem:[%s8020_s1 + $0x2d8] sm:$0xff]  }
 0x151   : > { %2618 = vmatprep.subr.bf16.mxu0 %v8084_v5  ;;  %3456 = vmatprep.subr.bf16.mxu1 %v8084_v5 }
 0x154   : > { %2619 = vmatpush1.bf16.msra.mxu0 %v5811_v58  ;;  %3457 = vmatpush1.bf16.msra.mxu1 %v5812_v11  ;;  %v5816_v58 = vld [vmem:[%s8020_s1 + $0x3f8] sm:$0xff]   ;;  %v6967_v11 = vsel %vm1253_vm2, %v1274_v53, %v1278_v9  ;;  %v1282_v53 = vrot.slane %v6759_v2, 1  ;;  %v5821_v2 = vld [vmem:[%s8020_s1 + $0x2f0] sm:$0xff]  }
 0x155   : > { %2620 = vmatprep.subr.bf16.mxu0 %v8084_v5  ;;  %3458 = vmatprep.subr.bf16.mxu1 %v8084_v5 }
 0x156   : > { %1512 = vmatmul.mubr.bf16.gmra.mrb[12].mxu0 %v6934_v20  ;;  %2318 = vmatmul.mubr.bf16.gmra.mrb[12].mxu1 %v6934_v20 }
 0x157   : > { %4612 = vmatprep.mubr.msk.bf16.mxu0 %vm736_vm1, %v6937_v29  ;;  %4768 = vmatprep.mubr.msk.bf16.mxu1 %vm736_vm1, %v6937_v29 }
 0x158   : > { %2621 = vmatpush1.bf16.msra.mxu0 %v5813_v21  ;;  %3459 = vmatpush1.bf16.msra.mxu1 %v5814_v16  ;;  %v5818_v21 = vld [vmem:[%s8020_s1 + $0x400] sm:$0xff]   ;;  %v5819_v16 = vld [vmem:[%s8020_s1 + $0x2e8] sm:$0xff]  }
 0x159   : > { %2622 = vmatprep.subr.bf16.mxu0 %v8084_v5  ;;  %3460 = vmatprep.subr.bf16.mxu1 %v8084_v5 }
 0x15c   : > { %2623 = vmatpush1.bf16.msra.mxu0 %v5815_v12  ;;  %3461 = vmatpush1.bf16.msra.mxu1 %v5816_v58  ;;  %v5820_v12 = vld [vmem:[%s8020_s1 + $0x408] sm:$0xff]   ;;  %v6997_v58 = vsel %vm1253_vm2, %v1278_v9, %v1282_v53  ;;  %v1286_v9 = vrot.slane %v6771_v14, 1  ;;  %v1284_v14 = vrot.slane %v6778_v49, 1  ;;  %v1288_v49 = vrot.slane %v6790_v1, 1 }
 0x15d   : > { %2624 = vmatprep.subr.bf16.mxu0 %v8084_v5  ;;  %3462 = vmatprep.subr.bf16.mxu1 %v8084_v5  ;;  %v7064_v1 = vld [vmem:[%s6020_s18 + $0xa0] ss:$8 sps:$4 sm:$0xff]  }
 0x15e   : > { %1520 = vmatmul.mubr.bf16.gmra.mrb[16].mxu0 %v6964_v60  ;;  %2326 = vmatmul.mubr.bf16.gmra.mrb[16].mxu1 %v6964_v60 }
 0x15f   : > { %4613 = vmatprep.mubr.msk.bf16.mxu0 %vm736_vm1, %v6967_v11  ;;  %4769 = vmatprep.mubr.msk.bf16.mxu1 %vm736_vm1, %v6967_v11 }
 0x160   : > { %2625 = vmatpush1.bf16.msra.mxu0 %v5817_v27  ;;  %3463 = vmatpush1.bf16.msra.mxu1 %v5818_v21  ;;  %v5822_v27 = vld [vmem:[%s8020_s1 + $0x410] sm:$0xff]   ;;  %v5823_v21 = vld [vmem:[%s8020_s1 + $0x2f8] sm:$0xff]  }
 0x161   : > { %2626 = vmatprep.subr.bf16.mxu0 %v8084_v5  ;;  %3464 = vmatprep.subr.bf16.mxu1 %v8084_v5 }
 0x164   : > { %2627 = vmatpush1.bf16.msra.mxu0 %v5819_v16  ;;  %3465 = vmatpush1.bf16.msra.mxu1 %v5820_v12  ;;  %v5824_v16 = vld [vmem:[%s8020_s1 + $0x418] sm:$0xff]   ;;  %v7027_v12 = vsel %vm1253_vm2, %v1282_v53, %v1286_v9  ;;  %v7040_v53 = vsel %vm1253_vm2, %v1280_v43, %v1284_v14  ;;  %v7057_v43 = vsel %vm1253_vm2, %v1290_v44, %v1294_v17 }
 0x165   : > { %2628 = vmatprep.subr.bf16.mxu0 %v8084_v5  ;;  %3466 = vmatprep.subr.bf16.mxu1 %v8084_v5  ;;  %8086 = vst [vmem:[#allocation6_spill] sm:$0xff] %v7040_v53  ;;  %8089 = vst [vmem:[#allocation9_spill] sm:$0xff] %v7057_v43 }
 0x166   : > { %1528 = vmatmul.mubr.bf16.gmra.mrb[20].mxu0 %v6994_v30  ;;  %2334 = vmatmul.mubr.bf16.gmra.mrb[20].mxu1 %v6994_v30 }
 0x167   : > { %4614 = vmatprep.mubr.msk.bf16.mxu0 %vm736_vm1, %v6997_v58  ;;  %4770 = vmatprep.mubr.msk.bf16.mxu1 %vm736_vm1, %v6997_v58 }
 0x168   : > { %2629 = vmatpush1.bf16.msra.mxu0 %v5821_v2  ;;  %3467 = vmatpush1.bf16.msra.mxu1 %v5822_v27  ;;  %v7043_v2 = vsel %vm1253_vm2, %v1286_v9, %v1290_v44  ;;  %v7054_v27 = vsel %vm1253_vm2, %v1284_v14, %v1288_v49  ;;  %v1292_v9 = vrot.slane %v7064_v1, 1  ;;  %v7084_v44 = vld [vmem:[%s6020_s18 + $0xb0] ss:$8 sps:$4 sm:$0xff]  }
 0x169   : > { %2630 = vmatprep.subr.bf16.mxu0 %v8084_v5  ;;  %3468 = vmatprep.subr.bf16.mxu1 %v8084_v5  ;;  %8087 = vst [vmem:[#allocation7_spill] sm:$0xff] %v7043_v2  ;;  %8088 = vst [vmem:[#allocation8_spill] sm:$0xff] %v7054_v27 }
 0x16c   : > { %2631 = vmatpush1.bf16.msra.mxu0 %v5823_v21  ;;  %3469 = vmatpush1.bf16.msra.mxu1 %v5824_v16  ;;  %v1298_v21 = vrot.slane %v7070_v61, 1  ;;  %v7074_v16 = vsel %vm1253_vm2, %v1288_v49, %v1292_v9 }
 0x16d   : > { %2841 = vmatprep.subr.bf16.mxu0 %v8084_v5  ;;  %3679 = vmatprep.subr.bf16.mxu1 %v8084_v5  ;;  %8090 = vst [vmem:[#allocation10_spill] sm:$0xff] %v7074_v16 }
 0x16e   : > { %1536 = vmatmul.mubr.bf16.gmra.mrb[24].mxu0 %v7024_v36  ;;  %2342 = vmatmul.mubr.bf16.gmra.mrb[24].mxu1 %v7024_v36  ;;  %v7077_v14 = vsel %vm1253_vm2, %v1294_v17, %v1298_v21 }
 0x16f   : > { %4615 = vmatprep.mubr.msk.bf16.mxu0 %vm736_vm1, %v7027_v12  ;;  %4771 = vmatprep.mubr.msk.bf16.mxu1 %vm736_vm1, %v7027_v12  ;;  %8091 = vst [vmem:[#allocation11_spill] sm:$0xff] %v7077_v14 }
 0x176   : > { %1544 = vmatmul.mubr.bf16.gmra.mrb[28].mxu0 %v7040_v53  ;;  %2350 = vmatmul.mubr.bf16.gmra.mrb[28].mxu1 %v7040_v53 }
 0x177   : > { %4616 = vmatprep.mubr.msk.bf16.mxu0 %vm736_vm1, %v7043_v2  ;;  %4772 = vmatprep.mubr.msk.bf16.mxu1 %vm736_vm1, %v7043_v2 }
 0x17e   : > { %1552 = vmatmul.mubr.bf16.gmra.mrb[32].mxu0 %v7054_v27  ;;  %2358 = vmatmul.mubr.bf16.gmra.mrb[32].mxu1 %v7054_v27  ;;  %v7090_v27 = vld [vmem:[%s6020_s18 + $0xc4] ss:$8 sps:$4 sm:$0xff]  }
 0x17f   : > { %4617 = vmatprep.mubr.msk.bf16.mxu0 %vm736_vm1, %v7057_v43  ;;  %4773 = vmatprep.mubr.msk.bf16.mxu1 %vm736_vm1, %v7057_v43  ;;  %v1296_v43 = vrot.slane %v7084_v44, 1  ;;  %v1302_v49 = vrot.slane %v7090_v27, 1 }
 0x181   : > { %v7094_v17 = vsel %vm1253_vm2, %v1292_v9, %v1296_v43  ;;  %v7097_v2 = vsel %vm1253_vm2, %v1298_v21, %v1302_v49  ;;  %v1306_v9 = vrot.slane %v6434_v15, 1  ;;  %v1310_v15 = vrot.slane %v6464_v22, 1 }
 0x182   : > { %8092 = vst [vmem:[#allocation12_spill] sm:$0xff] %v7094_v17  ;;  %v1314_v22 = vrot.slane %v6510_v42, 1 }
 0x183   : > { %v7114_v21 = vsel %vm1253_vm2, %v1302_v49, %v1306_v9  ;;  %v7128_v49 = vsel %vm1253_vm2, %v1306_v9, %v1310_v15 }
 0x184   : > { %v7142_v9 = vsel %vm1253_vm2, %v1310_v15, %v1314_v22  ;;  %v5825_v15 = vld [vmem:[%s8020_s1 + $0x240] sm:$0xff]  }
 0x186   : > { %1560 = vmatmul.mubr.bf16.gmra.mrb[36].mxu0 %v7074_v16  ;;  %2366 = vmatmul.mubr.bf16.gmra.mrb[36].mxu1 %v7074_v16  ;;  %v7104_v16 = vld [vmem:[%s6020_s18 + $0xc0] ss:$8 sps:$4 sm:$0xff]  }
 0x187   : > { %4618 = vmatprep.mubr.msk.bf16.mxu0 %vm736_vm1, %v7077_v14  ;;  %4774 = vmatprep.mubr.msk.bf16.mxu1 %vm736_vm1, %v7077_v14  ;;  %v1300_v14 = vrot.slane %v7104_v16, 1 }
 0x189   : > { %v7111_v53 = vsel %vm1253_vm2, %v1296_v43, %v1300_v14 }
 0x18e   : > { %1568 = vmatmul.mubr.bf16.gmra.mrb[40].mxu0 %v7094_v17  ;;  %2374 = vmatmul.mubr.bf16.gmra.mrb[40].mxu1 %v7094_v17  ;;  %v1304_v17 = vrot.slane %v6437_v47, 1  ;;  %v1308_v47 = vrot.slane %v6489_v39, 1  ;;  %v1312_v39 = vrot.slane %v6536_v62, 1 }
 0x18f   : > { %4619 = vmatprep.mubr.msk.bf16.mxu0 %vm736_vm1, %v7097_v2  ;;  %4775 = vmatprep.mubr.msk.bf16.mxu1 %vm736_vm1, %v7097_v2 }
 0x190   : > { %v7125_v43 = vsel %vm1253_vm2, %v1300_v14, %v1304_v17  ;;  %v7139_v14 = vsel %vm1253_vm2, %v1304_v17, %v1308_v47  ;;  %v7152_v42 = vsel %vm1253_vm2, %v1308_v47, %v1312_v39  ;;  %v7156_v17 = vsel %vm1253_vm2, %v1314_v22, %v6556_v63  ;;  %v5826_v47 = vld [vmem:[%s8020_s1 + $0x360] sm:$0xff]   ;;  %v5830_v22 = vld [vmem:[%s8020_s1 + $0x370] sm:$0xff]  }
 0x191   : > { %v7166_v62 = vsel %vm1253_vm2, %v1312_v39, %v6556_v63  ;;  %v5827_v63 = vld [vmem:[%s8020_s1 + $0x248] sm:$0xff]   ;;  %v5832_v39 = vld [vmem:[%s8020_s1 + $0x378] sm:$0xff]  }
 0x196   : > { %1576 = vmatmul.mubr.bf16.gmra.mrb[44].mxu0 %v7111_v53  ;;  %2382 = vmatmul.mubr.bf16.gmra.mrb[44].mxu1 %v7111_v53 }
 0x197   : > { %4620 = vmatprep.mubr.msk.bf16.mxu0 %vm736_vm1, %v7114_v21  ;;  %4776 = vmatprep.mubr.msk.bf16.mxu1 %vm736_vm1, %v7114_v21 }
 0x19e   : > { %1584 = vmatmul.mubr.bf16.gmra.mrb[48].mxu0 %v7125_v43  ;;  %2390 = vmatmul.mubr.bf16.gmra.mrb[48].mxu1 %v7125_v43 }
 0x19f   : > { %4621 = vmatprep.mubr.msk.bf16.mxu0 %vm736_vm1, %v7128_v49  ;;  %4777 = vmatprep.mubr.msk.bf16.mxu1 %vm736_vm1, %v7128_v49 }
 0x1a6   : > { %1592 = vmatmul.mubr.bf16.gmra.mrb[52].mxu0 %v7139_v14  ;;  %2398 = vmatmul.mubr.bf16.gmra.mrb[52].mxu1 %v7139_v14 }
 0x1a7   : > { %4622 = vmatprep.mubr.msk.bf16.mxu0 %vm736_vm1, %v7142_v9  ;;  %4778 = vmatprep.mubr.msk.bf16.mxu1 %vm736_vm1, %v7142_v9 }
 0x1ae   : > { %1600 = vmatmul.mubr.bf16.gmra.mrb[56].mxu0 %v7152_v42  ;;  %2406 = vmatmul.mubr.bf16.gmra.mrb[56].mxu1 %v7152_v42 }
 0x1af   : > { %4623 = vmatprep.mubr.msk.bf16.mxu0 %vm736_vm1, %v7156_v17  ;;  %4779 = vmatprep.mubr.msk.bf16.mxu1 %vm736_vm1, %v7156_v17 }
 0x1b6   : > { %1608 = vmatmul.mubr.bf16.gmra.mrb[60].mxu0 %v7166_v62  ;;  %2414 = vmatmul.mubr.bf16.gmra.mrb[60].mxu1 %v7166_v62 }
 0x1b7   : > { %4840 = vmatprep.mubr.msk.bf16.mxu0 %vm736_vm1, %v6047_v28  ;;  %4996 = vmatprep.mubr.msk.bf16.mxu1 %vm736_vm1, %v6047_v28  ;;  %v5828_v28 = vld [vmem:[%s8020_s1 + $0x368] sm:$0xff]  }
 0x1be   : > { %2641 = vmatmul.mubr.bf16.vlgmr.msra.gmra.mrb[64].mxu0 %v6085_v50  ;;  %3479 = vmatmul.mubr.bf16.vlgmr.msra.gmra.mrb[64].mxu1 %v6085_v50  ;;  %v5829_v50 = vld [vmem:[%s8020_s1 + $0x250] sm:$0xff]  }
 0x1bf   : > { %2842 = vmatpush1.bf16.msra.mxu0 %v5825_v15  ;;  %3680 = vmatpush1.bf16.msra.mxu1 %v5826_v47  ;;  %v5835_v15 = vld [vmem:[%s8020_s1 + $0x268] sm:$0xff]  }
 0x1c0   : > { %4841 = vmatprep.mubr.msk.bf16.mxu0 %vm736_vm1, %v6093_v56  ;;  %4997 = vmatprep.mubr.msk.bf16.mxu1 %vm736_vm1, %v6093_v56  ;;  %v5831_v56 = vld [vmem:[%s8020_s1 + $0x258] sm:$0xff]   ;;  %v5836_v47 = vld [vmem:[%s8020_s1 + $0x388] sm:$0xff]  }
 0x1c1   : > { %2843 = vmatprep.subr.bf16.mxu0 %v8084_v5  ;;  %3681 = vmatprep.subr.bf16.mxu1 %v8084_v5 }
 0x1c3   : > { %2844 = vmatpush1.bf16.msra.mxu0 %v5827_v63  ;;  %3682 = vmatpush1.bf16.msra.mxu1 %v5828_v28  ;;  %v5839_v63 = vld [vmem:[%s8020_s1 + $0x278] sm:$0xff]  }
 0x1c4   : > { %2845 = vmatprep.subr.bf16.mxu0 %v8084_v5  ;;  %3683 = vmatprep.subr.bf16.mxu1 %v8084_v5  ;;  %v5840_v28 = vld [vmem:[%s8020_s1 + $0x398] sm:$0xff]  }
 0x1c6   : > { %2649 = vmatmul.mubr.bf16.gmra.mrb[68].mxu0 %v6126_v7  ;;  %3487 = vmatmul.mubr.bf16.gmra.mrb[68].mxu1 %v6126_v7  ;;  %v5833_v7 = vld [vmem:[%s8020_s1 + $0x260] sm:$0xff]  }
 0x1c7   : > { %4842 = vmatprep.mubr.msk.bf16.mxu0 %vm736_vm1, %v6135_v10  ;;  %4998 = vmatprep.mubr.msk.bf16.mxu1 %vm736_vm1, %v6135_v10  ;;  %v5834_v10 = vld [vmem:[%s8020_s1 + $0x380] sm:$0xff]  }
 0x1c8   : > { %2846 = vmatpush1.bf16.msra.mxu0 %v5829_v50  ;;  %3684 = vmatpush1.bf16.msra.mxu1 %v5830_v22  ;;  %v5843_v50 = vld [vmem:[%s8020_s1 + $0x288] sm:$0xff]  }
 0x1c9   : > { %2847 = vmatprep.subr.bf16.mxu0 %v8084_v5  ;;  %3685 = vmatprep.subr.bf16.mxu1 %v8084_v5  ;;  %v5844_v22 = vld [vmem:[%s8020_s1 + $0x3a8] sm:$0xff]  }
 0x1cc   : > { %2848 = vmatpush1.bf16.msra.mxu0 %v5831_v56  ;;  %3686 = vmatpush1.bf16.msra.mxu1 %v5832_v39  ;;  %v5847_v56 = vld [vmem:[%s8020_s1 + $0x298] sm:$0xff]  }
 0x1cd   : > { %2849 = vmatprep.subr.bf16.mxu0 %v8084_v5  ;;  %3687 = vmatprep.subr.bf16.mxu1 %v8084_v5  ;;  %v5848_v39 = vld [vmem:[%s8020_s1 + $0x3b8] sm:$0xff]  }
 0x1ce   : > { %2657 = vmatmul.mubr.bf16.gmra.mrb[72].mxu0 %v6173_v33  ;;  %3495 = vmatmul.mubr.bf16.gmra.mrb[72].mxu1 %v6173_v33  ;;  %v5837_v33 = vld [vmem:[%s8020_s1 + $0x270] sm:$0xff]  }
 0x1cf   : > { %4843 = vmatprep.mubr.msk.bf16.mxu0 %vm736_vm1, %v6184_v38  ;;  %4999 = vmatprep.mubr.msk.bf16.mxu1 %vm736_vm1, %v6184_v38  ;;  %v5838_v38 = vld [vmem:[%s8020_s1 + $0x390] sm:$0xff]  }
 0x1d0   : > { %2850 = vmatpush1.bf16.msra.mxu0 %v5833_v7  ;;  %3688 = vmatpush1.bf16.msra.mxu1 %v5834_v10 }
 0x1d1   : > { %2851 = vmatprep.subr.bf16.mxu0 %v8084_v5  ;;  %3689 = vmatprep.subr.bf16.mxu1 %v8084_v5 }
 0x1d4   : > { %2852 = vmatpush1.bf16.msra.mxu0 %v5835_v15  ;;  %3690 = vmatpush1.bf16.msra.mxu1 %v5836_v47 }
 0x1d5   : > { %2853 = vmatprep.subr.bf16.mxu0 %v8084_v5  ;;  %3691 = vmatprep.subr.bf16.mxu1 %v8084_v5 }
 0x1d6   : > { %2665 = vmatmul.mubr.bf16.gmra.mrb[76].mxu0 %v6232_v59  ;;  %3503 = vmatmul.mubr.bf16.gmra.mrb[76].mxu1 %v6232_v59  ;;  %v5841_v59 = vld [vmem:[%s8020_s1 + $0x280] sm:$0xff]  }
 0x1d7   : > { %4844 = vmatprep.mubr.msk.bf16.mxu0 %vm736_vm1, %v6247_v4  ;;  %5000 = vmatprep.mubr.msk.bf16.mxu1 %vm736_vm1, %v6247_v4  ;;  %v5842_v4 = vld [vmem:[%s8020_s1 + $0x3a0] sm:$0xff]  }
 0x1d8   : > { %2854 = vmatpush1.bf16.msra.mxu0 %v5837_v33  ;;  %3692 = vmatpush1.bf16.msra.mxu1 %v5838_v38  ;;  %v5900_v38 = vld [vmem:[%s6020_s18] ss:$8 sps:$4 sm:$0xff]  }
 0x1d9   : > { %2855 = vmatprep.subr.bf16.mxu0 %v8084_v5  ;;  %3693 = vmatprep.subr.bf16.mxu1 %v8084_v5 }
 0x1dc   : > { %2856 = vmatpush1.bf16.msra.mxu0 %v5839_v63  ;;  %3694 = vmatpush1.bf16.msra.mxu1 %v5840_v28 }
 0x1dd   : > { %2857 = vmatprep.subr.bf16.mxu0 %v8084_v5  ;;  %3695 = vmatprep.subr.bf16.mxu1 %v8084_v5 }
 0x1de   : > { %2673 = vmatmul.mubr.bf16.gmra.mrb[80].mxu0 %v6298_v31  ;;  %3511 = vmatmul.mubr.bf16.gmra.mrb[80].mxu1 %v6298_v31  ;;  %v5845_v31 = vld [vmem:[%s8020_s1 + $0x290] sm:$0xff]  }
 0x1df   : > { %4845 = vmatprep.mubr.msk.bf16.mxu0 %vm736_vm1, %v6305_v37  ;;  %5001 = vmatprep.mubr.msk.bf16.mxu1 %vm736_vm1, %v6305_v37  ;;  %v5846_v37 = vld [vmem:[%s8020_s1 + $0x3b0] sm:$0xff]  }
 0x1e0   : > { %2858 = vmatpush1.bf16.msra.mxu0 %v5841_v59  ;;  %3696 = vmatpush1.bf16.msra.mxu1 %v5842_v4 }
 0x1e1   : > { %2859 = vmatprep.subr.bf16.mxu0 %v8084_v5  ;;  %3697 = vmatprep.subr.bf16.mxu1 %v8084_v5 }
 0x1e4   : > { %2860 = vmatpush1.bf16.msra.mxu0 %v5843_v50  ;;  %3698 = vmatpush1.bf16.msra.mxu1 %v5844_v22 }
 0x1e5   : > { %2861 = vmatprep.subr.bf16.mxu0 %v8084_v5  ;;  %3699 = vmatprep.subr.bf16.mxu1 %v8084_v5 }
 0x1e6   : > { %2681 = vmatmul.mubr.bf16.gmra.mrb[84].mxu0 %v6352_v40  ;;  %3519 = vmatmul.mubr.bf16.gmra.mrb[84].mxu1 %v6352_v40 }
 0x1e7   : > { %4846 = vmatprep.mubr.msk.bf16.mxu0 %vm736_vm1, %v6359_v3  ;;  %5002 = vmatprep.mubr.msk.bf16.mxu1 %vm736_vm1, %v6359_v3 }
 0x1e8   : > { %2862 = vmatpush1.bf16.msra.mxu0 %v5845_v31  ;;  %3700 = vmatpush1.bf16.msra.mxu1 %v5846_v37 }
 0x1e9   : > { %2863 = vmatprep.subr.bf16.mxu0 %v8084_v5  ;;  %3701 = vmatprep.subr.bf16.mxu1 %v8084_v5 }
 0x1ec   : > { %2864 = vmatpush1.bf16.msra.mxu0 %v5847_v56  ;;  %3702 = vmatpush1.bf16.msra.mxu1 %v5848_v39 }
 0x1ed   : > { %3099 = vmatprep.subr.bf16.mxu0 %v8084_v5  ;;  %3937 = vmatprep.subr.bf16.mxu1 %v8084_v5 }
 0x1ee   : > { %2689 = vmatmul.mubr.bf16.gmra.mrb[88].mxu0 %v6391_v46  ;;  %3527 = vmatmul.mubr.bf16.gmra.mrb[88].mxu1 %v6391_v46 }
 0x1ef   : > { %4847 = vmatprep.mubr.msk.bf16.mxu0 %vm736_vm1, %v6395_v26  ;;  %5003 = vmatprep.mubr.msk.bf16.mxu1 %vm736_vm1, %v6395_v26 }
 0x1f6   : > { %2697 = vmatmul.mubr.bf16.gmra.mrb[92].mxu0 %v6414_v45  ;;  %3535 = vmatmul.mubr.bf16.gmra.mrb[92].mxu1 %v6414_v45 }
 0x1f7   : > { %4848 = vmatprep.mubr.msk.bf16.mxu0 %vm736_vm1, %v6418_v41  ;;  %5004 = vmatprep.mubr.msk.bf16.mxu1 %vm736_vm1, %v6418_v41 }
 0x1fe   : > { %2705 = vmatmul.mubr.bf16.gmra.mrb[96].mxu0 %v6441_v52  ;;  %3543 = vmatmul.mubr.bf16.gmra.mrb[96].mxu1 %v6441_v52 }
 0x1ff   : > { %4849 = vmatprep.mubr.msk.bf16.mxu0 %vm736_vm1, %v6445_v48  ;;  %5005 = vmatprep.mubr.msk.bf16.mxu1 %vm736_vm1, %v6445_v48 }
 0x206   : > { %2713 = vmatmul.mubr.bf16.gmra.mrb[100].mxu0 %v6468_v24  ;;  %3551 = vmatmul.mubr.bf16.gmra.mrb[100].mxu1 %v6468_v24 }
 0x207   : > { %4850 = vmatprep.mubr.msk.bf16.mxu0 %vm736_vm1, %v6472_v54  ;;  %5006 = vmatprep.mubr.msk.bf16.mxu1 %vm736_vm1, %v6472_v54 }
 0x20e   : > { %2721 = vmatmul.mubr.bf16.gmra.mrb[104].mxu0 %v6493_v57  ;;  %3559 = vmatmul.mubr.bf16.gmra.mrb[104].mxu1 %v6493_v57 }
 0x20f   : > { %4851 = vmatprep.mubr.msk.bf16.mxu0 %vm736_vm1, %v6496_v35  ;;  %5007 = vmatprep.mubr.msk.bf16.mxu1 %vm736_vm1, %v6496_v35 }
 0x211   : > { %v7336_v40 = vpop.f32.mrb[0].mxu0  ;;  %v7338_v3 = vpop.f32.mrb[0].mxu1 }
 0x212   : > { %v1491_v46 = vpop.f32.mrb[1].mxu0  ;;  %v2297_v45 = vpop.f32.mrb[1].mxu1 }
 0x213   : > { %v7342_v41 = vpop.f32.mrb[2].mxu0  ;;  %v7344_v52 = vpop.f32.mrb[2].mxu1 }
 0x214   : > { %v1494_v48 = vpop.f32.mrb[3].mxu0  ;;  %v2300_v54 = vpop.f32.mrb[3].mxu1 }
 0x216   : > { %2729 = vmatmul.mubr.bf16.gmra.mrb[108].mxu0 %v6513_v8  ;;  %3567 = vmatmul.mubr.bf16.gmra.mrb[108].mxu1 %v6513_v8 }
 0x217   : > { %4852 = vmatprep.mubr.msk.bf16.mxu0 %vm736_vm1, %v6516_v23  ;;  %5008 = vmatprep.mubr.msk.bf16.mxu1 %vm736_vm1, %v6516_v23 }
 0x219   : > { %v7354_v57 = vpop.f32.mrb[4].mxu0  ;;  %v7356_v35 = vpop.f32.mrb[4].mxu1 }
 0x21a   : > { %v1499_v7 = vpop.f32.mrb[5].mxu0  ;;  %v2305_v15 = vpop.f32.mrb[5].mxu1 }
 0x21b   : > { %v7360_v47 = vpop.f32.mrb[6].mxu0  ;;  %v7362_v33 = vpop.f32.mrb[6].mxu1  ;;  %v8094_v15 = vld [vmem:[#allocation3_spill] sm:$0xff] }
 0x21c   : > { %v1502_v8 = vpop.f32.mrb[7].mxu0  ;;  %v2308_v63 = vpop.f32.mrb[7].mxu1 }
 0x21e   : > { %2737 = vmatmul.mubr.bf16.gmra.mrb[112].mxu0 %v6526_v32  ;;  %3575 = vmatmul.mubr.bf16.gmra.mrb[112].mxu1 %v6526_v32 }
 0x21f   : > { %4853 = vmatprep.mubr.msk.bf16.mxu0 %vm736_vm1, %v6529_v55  ;;  %5009 = vmatprep.mubr.msk.bf16.mxu1 %vm736_vm1, %v6529_v55 }
 0x221   : > { %v7372_v23 = vpop.f32.mrb[8].mxu0  ;;  %v7374_v28 = vpop.f32.mrb[8].mxu1 }
 0x222   : > { %v1507_v59 = vpop.f32.mrb[9].mxu0  ;;  %v2313_v50 = vpop.f32.mrb[9].mxu1 }
 0x223   : > { %v7378_v22 = vpop.f32.mrb[10].mxu0  ;;  %v7380_v31 = vpop.f32.mrb[10].mxu1 }
 0x224   : > { %v1510_v32 = vpop.f32.mrb[11].mxu0  ;;  %v2316_v56 = vpop.f32.mrb[11].mxu1 }
 0x226   : > { %2745 = vmatmul.mubr.bf16.gmra.mrb[116].mxu0 %v6541_v13  ;;  %3583 = vmatmul.mubr.bf16.gmra.mrb[116].mxu1 %v6541_v13 }
 0x227   : > { %4854 = vmatprep.mubr.msk.bf16.mxu0 %vm736_vm1, %v6546_v19  ;;  %5010 = vmatprep.mubr.msk.bf16.mxu1 %vm736_vm1, %v6546_v19  ;;  %v8093_v19 = vld [vmem:[#allocation2_spill] sm:$0xff] }
 0x229   : > { %v7390_v55 = vpop.f32.mrb[12].mxu0  ;;  %v7392_v39 = vpop.f32.mrb[12].mxu1 }
 0x22a   : > { %v1515_v46 = vpop.f32.mrb[13].mxu0  ;;  %v2321_v48 = vpop.f32.mrb[13].mxu1 }
 0x22b   : > { %v7396_v54 = vpop.f32.mrb[14].mxu0  ;;  %v7398_v7 = vpop.f32.mrb[14].mxu1 }
 0x22c   : > { %v1518_v13 = vpop.f32.mrb[15].mxu0  ;;  %v2324_v8 = vpop.f32.mrb[15].mxu1 }
 0x22e   : > { %2753 = vmatmul.mubr.bf16.gmra.mrb[120].mxu0 %v6559_v6  ;;  %3591 = vmatmul.mubr.bf16.gmra.mrb[120].mxu1 %v6559_v6 }
 0x22f   : > { %4855 = vmatprep.mubr.msk.bf16.mxu0 %vm736_vm1, %v8093_v19  ;;  %5011 = vmatprep.mubr.msk.bf16.mxu1 %vm736_vm1, %v8093_v19  ;;  %v5899_v19 = vld [vmem:[%s6020_s18 + $0x4] ss:$8 sps:$4 sm:$0xff]  }
 0x231   : > { %v7408_v63 = vpop.f32.mrb[16].mxu0  ;;  %v7410_v59 = vpop.f32.mrb[16].mxu1 }
 0x232   : > { %v1523_v50 = vpop.f32.mrb[17].mxu0  ;;  %v2329_v56 = vpop.f32.mrb[17].mxu1 }
 0x233   : > { %v7414_v46 = vpop.f32.mrb[18].mxu0  ;;  %v7416_v48 = vpop.f32.mrb[18].mxu1 }
 0x234   : > { %v1526_v6 = vpop.f32.mrb[19].mxu0  ;;  %v2332_v8 = vpop.f32.mrb[19].mxu1 }
 0x235   : > { %v5901_v6 = vld [vmem:[%s6020_s18 + $0x14] ss:$8 sps:$4 sm:$0xff]  }
 0x236   : > { %2761 = vmatmul.mubr.bf16.gmra.mrb[124].mxu0 %v8094_v15  ;;  %3599 = vmatmul.mubr.bf16.gmra.mrb[124].mxu1 %v8094_v15  ;;  %v5849_v15 = vld [vmem:[%s8020_s1 + $0x300] sm:$0xff]  }
 0x237   : > { %4868 = vmatprep.mubr.msk.bf16.mxu0 %vm736_vm1, %v5899_v19  ;;  %5024 = vmatprep.mubr.msk.bf16.mxu1 %vm736_vm1, %v5899_v19  ;;  %v5850_v19 = vld [vmem:[%s8020_s1 + $0x420] sm:$0xff]  }
 0x239   : > { %v7425_v50 = vpop.f32.mrb[20].mxu0  ;;  %v7427_v56 = vpop.f32.mrb[20].mxu1 }
 0x23a   : > { %v1531_v32 = vpop.f32.mrb[21].mxu0  ;;  %v2337_v8 = vpop.f32.mrb[21].mxu1 }
 0x23b   : > { %v7431_v13 = vpop.f32.mrb[22].mxu0  ;;  %v7436_v45 = vpop.f32.mrb[22].mxu1  ;;  %v5851_v8 = vld [vmem:[%s8020_s1 + $0x308] sm:$0xff]  }
 0x23c   : > { %8095 = vst [vmem:[#allocation2_spill] sm:$0xff] %v7431_v13  ;;  %8096 = vst [vmem:[#allocation3_spill] sm:$0xff] %v7436_v45  ;;  %v1534_v37 = vpop.f32.mrb[23].mxu0  ;;  %v2340_v4 = vpop.f32.mrb[23].mxu1  ;;  %v5912_v13 = vld [vmem:[%s6020_s18 + $0x60] ss:$8 sps:$4 sm:$0xff]  }
 0x23d   : > { %v5852_v37 = vld [vmem:[%s8020_s1 + $0x428] sm:$0xff]  }
 0x23e   : > { %2874 = vmatmul.mubr.bf16.vlgmr.msra.gmra.mrb[64].mxu0 %v5900_v38  ;;  %3712 = vmatmul.mubr.bf16.vlgmr.msra.gmra.mrb[64].mxu1 %v5900_v38 }
 0x23f   : > { %3100 = vmatpush1.bf16.msra.mxu0 %v5849_v15  ;;  %3938 = vmatpush1.bf16.msra.mxu1 %v5850_v19 }
 0x240   : > { %4869 = vmatprep.mubr.msk.bf16.mxu0 %vm736_vm1, %v5901_v6  ;;  %5025 = vmatprep.mubr.msk.bf16.mxu1 %vm736_vm1, %v5901_v6  ;;  %v5853_v6 = vld [vmem:[%s8020_s1 + $0x310] sm:$0xff]  }
 0x241   : > { %v7452_v10 = vpop.f32.mrb[24].mxu0  ;;  %3101 = vmatprep.subr.bf16.mxu0 %v8084_v5  ;;  %v7456_v38 = vpop.f32.mrb[24].mxu1  ;;  %3939 = vmatprep.subr.bf16.mxu1 %v8084_v5 }
 0x242   : > { %8097 = vst [vmem:[#allocation13_spill] sm:$0xff] %v7452_v10  ;;  %8098 = vst [vmem:[#allocation14_spill] sm:$0xff] %v7456_v38  ;;  %v1539_v4 = vpop.f32.mrb[25].mxu0  ;;  %v2345_v19 = vpop.f32.mrb[25].mxu1  ;;  %v5857_v38 = vld [vmem:[%s8020_s1 + $0x320] sm:$0xff]  }
 0x243   : > { %v7461_v32 = vpop.f32.mrb[26].mxu0  ;;  %3102 = vmatpush1.bf16.msra.mxu0 %v5851_v8  ;;  %v7463_v24 = vpop.f32.mrb[26].mxu1  ;;  %3940 = vmatpush1.bf16.msra.mxu1 %v5852_v37  ;;  %v5854_v8 = vld [vmem:[%s8020_s1 + $0x430] sm:$0xff]   ;;  %v5855_v37 = vld [vmem:[%s8020_s1 + $0x318] sm:$0xff]  }
 0x244   : > { %8099 = vst [vmem:[#allocation15_spill] sm:$0xff] %v7461_v32  ;;  %8100 = vst [vmem:[#allocation16_spill] sm:$0xff] %v7463_v24  ;;  %v1542_v26 = vpop.f32.mrb[27].mxu0  ;;  %3103 = vmatprep.subr.bf16.mxu0 %v8084_v5  ;;  %v2348_v45 = vpop.f32.mrb[27].mxu1  ;;  %3941 = vmatprep.subr.bf16.mxu1 %v8084_v5  ;;  %v5902_v19 = vld [vmem:[%s6020_s18 + $0x10] ss:$8 sps:$4 sm:$0xff]  }
 0x245   : > { %v5903_v26 = vld [vmem:[%s6020_s18 + $0x24] ss:$8 sps:$4 sm:$0xff]   ;;  %v5856_v4 = vld [vmem:[%s8020_s1 + $0x438] sm:$0xff]  }
 0x246   : > { %2882 = vmatmul.mubr.bf16.gmra.mrb[68].mxu0 %v5902_v19  ;;  %3720 = vmatmul.mubr.bf16.gmra.mrb[68].mxu1 %v5902_v19 }
 0x247   : > { %4870 = vmatprep.mubr.msk.bf16.mxu0 %vm736_vm1, %v5903_v26  ;;  %5026 = vmatprep.mubr.msk.bf16.mxu1 %vm736_vm1, %v5903_v26 }
 0x248   : > { %3104 = vmatpush1.bf16.msra.mxu0 %v5853_v6  ;;  %3942 = vmatpush1.bf16.msra.mxu1 %v5854_v8  ;;  %v5904_v6 = vld [vmem:[%s6020_s18 + $0x20] ss:$8 sps:$4 sm:$0xff]  }
 0x249   : > { %v7482_v45 = vpop.f32.mrb[28].mxu0  ;;  %3105 = vmatprep.subr.bf16.mxu0 %v8084_v5  ;;  %v7488_v19 = vpop.f32.mrb[28].mxu1  ;;  %3943 = vmatprep.subr.bf16.mxu1 %v8084_v5 }
 0x24a   : > { %8101 = vst [vmem:[#allocation17_spill] sm:$0xff] %v7482_v45  ;;  %8102 = vst [vmem:[#allocation18_spill] sm:$0xff] %v7488_v19  ;;  %v1547_v15 = vpop.f32.mrb[29].mxu0  ;;  %v2353_v26 = vpop.f32.mrb[29].mxu1  ;;  %v5861_v19 = vld [vmem:[%s8020_s1 + $0x330] sm:$0xff]  }
 0x24b   : > { %v7493_v24 = vpop.f32.mrb[30].mxu0  ;;  %v7495_v8 = vpop.f32.mrb[30].mxu1  ;;  %v5858_v26 = vld [vmem:[%s8020_s1 + $0x440] sm:$0xff]  }
 0x24c   : > { %8103 = vst [vmem:[#allocation19_spill] sm:$0xff] %v7493_v24  ;;  %8104 = vst [vmem:[#allocation20_spill] sm:$0xff] %v7495_v8  ;;  %v1550_v32 = vpop.f32.mrb[31].mxu0  ;;  %3106 = vmatpush1.bf16.msra.mxu0 %v5855_v37  ;;  %v2356_v10 = vpop.f32.mrb[31].mxu1  ;;  %3944 = vmatpush1.bf16.msra.mxu1 %v5856_v4  ;;  %v5860_v37 = vld [vmem:[%s8020_s1 + $0x448] sm:$0xff]  }
 0x24d   : > { %3107 = vmatprep.subr.bf16.mxu0 %v8084_v5  ;;  %3945 = vmatprep.subr.bf16.mxu1 %v8084_v5  ;;  %v5905_v32 = vld [vmem:[%s6020_s18 + $0x34] ss:$8 sps:$4 sm:$0xff]   ;;  %v5859_v10 = vld [vmem:[%s8020_s1 + $0x328] sm:$0xff]  }
 0x24e   : > { %2890 = vmatmul.mubr.bf16.gmra.mrb[72].mxu0 %v5904_v6  ;;  %3728 = vmatmul.mubr.bf16.gmra.mrb[72].mxu1 %v5904_v6 }
 0x24f   : > { %4871 = vmatprep.mubr.msk.bf16.mxu0 %vm736_vm1, %v5905_v32  ;;  %5027 = vmatprep.mubr.msk.bf16.mxu1 %vm736_vm1, %v5905_v32 }
 0x250   : > { %3108 = vmatpush1.bf16.msra.mxu0 %v5857_v38  ;;  %3946 = vmatpush1.bf16.msra.mxu1 %v5858_v26  ;;  %v5906_v38 = vld [vmem:[%s6020_s18 + $0x30] ss:$8 sps:$4 sm:$0xff]  }
 0x251   : > { %v7514_v4 = vpop.f32.mrb[32].mxu0  ;;  %3109 = vmatprep.subr.bf16.mxu0 %v8084_v5  ;;  %v7520_v6 = vpop.f32.mrb[32].mxu1  ;;  %3947 = vmatprep.subr.bf16.mxu1 %v8084_v5 }
 0x252   : > { %8105 = vst [vmem:[#allocation21_spill] sm:$0xff] %v7514_v4  ;;  %8106 = vst [vmem:[#allocation22_spill] sm:$0xff] %v7520_v6  ;;  %v1555_v15 = vpop.f32.mrb[33].mxu0  ;;  %v2361_v32 = vpop.f32.mrb[33].mxu1  ;;  %v5865_v6 = vld [vmem:[%s8020_s1 + $0x340] sm:$0xff]  }
 0x253   : > { %v7525_v8 = vpop.f32.mrb[34].mxu0  ;;  %v7527_v26 = vpop.f32.mrb[34].mxu1  ;;  %v5862_v32 = vld [vmem:[%s8020_s1 + $0x450] sm:$0xff]  }
 0x254   : > { %8107 = vst [vmem:[#allocation23_spill] sm:$0xff] %v7525_v8  ;;  %8108 = vst [vmem:[#allocation24_spill] sm:$0xff] %v7527_v26  ;;  %v1558_v24 = vpop.f32.mrb[35].mxu0  ;;  %3110 = vmatpush1.bf16.msra.mxu0 %v5859_v10  ;;  %v2364_v45 = vpop.f32.mrb[35].mxu1  ;;  %3948 = vmatpush1.bf16.msra.mxu1 %v5860_v37  ;;  %v5864_v37 = vld [vmem:[%s8020_s1 + $0x458] sm:$0xff]  }
 0x255   : > { %3111 = vmatprep.subr.bf16.mxu0 %v8084_v5  ;;  %3949 = vmatprep.subr.bf16.mxu1 %v8084_v5  ;;  %v5907_v24 = vld [vmem:[%s6020_s18 + $0x44] ss:$8 sps:$4 sm:$0xff]   ;;  %v5863_v45 = vld [vmem:[%s8020_s1 + $0x338] sm:$0xff]  }
 0x256   : > { %2898 = vmatmul.mubr.bf16.gmra.mrb[76].mxu0 %v5906_v38  ;;  %3736 = vmatmul.mubr.bf16.gmra.mrb[76].mxu1 %v5906_v38 }
 0x257   : > { %4872 = vmatprep.mubr.msk.bf16.mxu0 %vm736_vm1, %v5907_v24  ;;  %5028 = vmatprep.mubr.msk.bf16.mxu1 %vm736_vm1, %v5907_v24 }
 0x258   : > { %3112 = vmatpush1.bf16.msra.mxu0 %v5861_v19  ;;  %3950 = vmatpush1.bf16.msra.mxu1 %v5862_v32  ;;  %v5908_v19 = vld [vmem:[%s6020_s18 + $0x40] ss:$8 sps:$4 sm:$0xff]  }
 0x259   : > { %v7546_v10 = vpop.f32.mrb[36].mxu0  ;;  %3113 = vmatprep.subr.bf16.mxu0 %v8084_v5  ;;  %v7552_v38 = vpop.f32.mrb[36].mxu1  ;;  %3951 = vmatprep.subr.bf16.mxu1 %v8084_v5 }
 0x25a   : > { %8109 = vst [vmem:[#allocation25_spill] sm:$0xff] %v7546_v10  ;;  %8110 = vst [vmem:[#allocation26_spill] sm:$0xff] %v7552_v38  ;;  %v1563_v15 = vpop.f32.mrb[37].mxu0  ;;  %v2369_v24 = vpop.f32.mrb[37].mxu1  ;;  %v5869_v38 = vld [vmem:[%s8020_s1 + $0x350] sm:$0xff]  }
 0x25b   : > { %v7557_v26 = vpop.f32.mrb[38].mxu0  ;;  %v7559_v32 = vpop.f32.mrb[38].mxu1  ;;  %v5866_v24 = vld [vmem:[%s8020_s1 + $0x460] sm:$0xff]  }
 0x25c   : > { %8111 = vst [vmem:[#allocation27_spill] sm:$0xff] %v7557_v26  ;;  %8112 = vst [vmem:[#allocation28_spill] sm:$0xff] %v7559_v32  ;;  %v1566_v8 = vpop.f32.mrb[39].mxu0  ;;  %3114 = vmatpush1.bf16.msra.mxu0 %v5863_v45  ;;  %v2372_v4 = vpop.f32.mrb[39].mxu1  ;;  %3952 = vmatpush1.bf16.msra.mxu1 %v5864_v37  ;;  %v5868_v37 = vld [vmem:[%s8020_s1 + $0x468] sm:$0xff]  }
 0x25d   : > { %3115 = vmatprep.subr.bf16.mxu0 %v8084_v5  ;;  %3953 = vmatprep.subr.bf16.mxu1 %v8084_v5  ;;  %v5909_v8 = vld [vmem:[%s6020_s18 + $0x54] ss:$8 sps:$4 sm:$0xff]   ;;  %v5867_v4 = vld [vmem:[%s8020_s1 + $0x348] sm:$0xff]  }
 0x25e   : > { %2906 = vmatmul.mubr.bf16.gmra.mrb[80].mxu0 %v5908_v19  ;;  %3744 = vmatmul.mubr.bf16.gmra.mrb[80].mxu1 %v5908_v19 }
 0x25f   : > { %4873 = vmatprep.mubr.msk.bf16.mxu0 %vm736_vm1, %v5909_v8  ;;  %5029 = vmatprep.mubr.msk.bf16.mxu1 %vm736_vm1, %v5909_v8 }
 0x260   : > { %3116 = vmatpush1.bf16.msra.mxu0 %v5865_v6  ;;  %3954 = vmatpush1.bf16.msra.mxu1 %v5866_v24  ;;  %v5910_v6 = vld [vmem:[%s6020_s18 + $0x50] ss:$8 sps:$4 sm:$0xff]  }
 0x261   : > { %v7578_v45 = vpop.f32.mrb[40].mxu0  ;;  %3117 = vmatprep.subr.bf16.mxu0 %v8084_v5  ;;  %v7584_v19 = vpop.f32.mrb[40].mxu1  ;;  %3955 = vmatprep.subr.bf16.mxu1 %v8084_v5 }
 0x262   : > { %8113 = vst [vmem:[#allocation29_spill] sm:$0xff] %v7578_v45  ;;  %8114 = vst [vmem:[#allocation30_spill] sm:$0xff] %v7584_v19  ;;  %v1571_v15 = vpop.f32.mrb[41].mxu0  ;;  %v2377_v8 = vpop.f32.mrb[41].mxu1 }
 0x263   : > { %v7589_v32 = vpop.f32.mrb[42].mxu0  ;;  %v7591_v24 = vpop.f32.mrb[42].mxu1  ;;  %v5870_v8 = vld [vmem:[%s8020_s1 + $0x470] sm:$0xff]  }
 0x264   : > { %8115 = vst [vmem:[#allocation31_spill] sm:$0xff] %v7589_v32  ;;  %8116 = vst [vmem:[#allocation32_spill] sm:$0xff] %v7591_v24  ;;  %v1574_v26 = vpop.f32.mrb[43].mxu0  ;;  %3118 = vmatpush1.bf16.msra.mxu0 %v5867_v4  ;;  %v2380_v10 = vpop.f32.mrb[43].mxu1  ;;  %3956 = vmatpush1.bf16.msra.mxu1 %v5868_v37  ;;  %v5872_v37 = vld [vmem:[%s8020_s1 + $0x478] sm:$0xff]  }
 0x265   : > { %3119 = vmatprep.subr.bf16.mxu0 %v8084_v5  ;;  %3957 = vmatprep.subr.bf16.mxu1 %v8084_v5  ;;  %v5911_v26 = vld [vmem:[%s6020_s18 + $0x64] ss:$8 sps:$4 sm:$0xff]   ;;  %v5871_v10 = vld [vmem:[%s8020_s1 + $0x358] sm:$0xff]  }
 0x266   : > { %2914 = vmatmul.mubr.bf16.gmra.mrb[84].mxu0 %v5910_v6  ;;  %3752 = vmatmul.mubr.bf16.gmra.mrb[84].mxu1 %v5910_v6 }
 0x267   : > { %4874 = vmatprep.mubr.msk.bf16.mxu0 %vm736_vm1, %v5911_v26  ;;  %5030 = vmatprep.mubr.msk.bf16.mxu1 %vm736_vm1, %v5911_v26 }
 0x268   : > { %3120 = vmatpush1.bf16.msra.mxu0 %v5869_v38  ;;  %3958 = vmatpush1.bf16.msra.mxu1 %v5870_v8 }
 0x269   : > { %v7610_v4 = vpop.f32.mrb[44].mxu0  ;;  %3121 = vmatprep.subr.bf16.mxu0 %v8084_v5  ;;  %v7616_v6 = vpop.f32.mrb[44].mxu1  ;;  %3959 = vmatprep.subr.bf16.mxu1 %v8084_v5  ;;  %v5913_v5 = vld [vmem:[%s6020_s18 + $0x74] ss:$8 sps:$4 sm:$0xff]  }
 0x26a   : > { %v1579_v15 = vpop.f32.mrb[45].mxu0  ;;  %v2385_v26 = vpop.f32.mrb[45].mxu1 }
 0x26b   : > { %v7621_v24 = vpop.f32.mrb[46].mxu0  ;;  %v7623_v32 = vpop.f32.mrb[46].mxu1 }
 0x26c   : > { %8117 = vst [vmem:[#allocation33_spill] sm:$0xff] %v7621_v24  ;;  %8118 = vst [vmem:[#allocation34_spill] sm:$0xff] %v7623_v32  ;;  %v1582_v8 = vpop.f32.mrb[47].mxu0  ;;  %3122 = vmatpush1.bf16.msra.mxu0 %v5871_v10  ;;  %v2388_v45 = vpop.f32.mrb[47].mxu1  ;;  %3960 = vmatpush1.bf16.msra.mxu1 %v5872_v37  ;;  %v5914_v24 = vld [vmem:[%s6020_s18 + $0x70] ss:$8 sps:$4 sm:$0xff]  }
 0x26e   : > { %2922 = vmatmul.mubr.bf16.gmra.mrb[88].mxu0 %v5912_v13  ;;  %3760 = vmatmul.mubr.bf16.gmra.mrb[88].mxu1 %v5912_v13 }
 0x26f   : > { %4875 = vmatprep.mubr.msk.bf16.mxu0 %vm736_vm1, %v5913_v5  ;;  %5031 = vmatprep.mubr.msk.bf16.mxu1 %vm736_vm1, %v5913_v5  ;;  %v5915_v5 = vld [vmem:[%s6020_s18 + $0x84] ss:$8 sps:$4 sm:$0xff]  }
 0x271   : > { %v7631_v15 = vpop.f32.mrb[48].mxu0  ;;  %v7633_v26 = vpop.f32.mrb[48].mxu1 }
 0x272   : > { %8119 = vst [vmem:[#allocation35_spill] sm:$0xff] %v7631_v15  ;;  %8120 = vst [vmem:[#allocation36_spill] sm:$0xff] %v7633_v26  ;;  %v1587_v10 = vpop.f32.mrb[49].mxu0  ;;  %v2393_v45 = vpop.f32.mrb[49].mxu1  ;;  %v5916_v15 = vld [vmem:[%s6020_s18 + $0x80] ss:$8 sps:$4 sm:$0xff]  }
 0x273   : > { %v7637_v37 = vpop.f32.mrb[50].mxu0  ;;  %v7639_v19 = vpop.f32.mrb[50].mxu1 }
 0x274   : > { %8121 = vst [vmem:[#allocation37_spill] sm:$0xff] %v7637_v37  ;;  %8122 = vst [vmem:[#allocation38_spill] sm:$0xff] %v7639_v19  ;;  %v1590_v13 = vpop.f32.mrb[51].mxu0  ;;  %v2396_v32 = vpop.f32.mrb[51].mxu1 }
 0x276   : > { %2930 = vmatmul.mubr.bf16.gmra.mrb[92].mxu0 %v5914_v24  ;;  %3768 = vmatmul.mubr.bf16.gmra.mrb[92].mxu1 %v5914_v24 }
 0x277   : > { %4876 = vmatprep.mubr.msk.bf16.mxu0 %vm736_vm1, %v5915_v5  ;;  %5032 = vmatprep.mubr.msk.bf16.mxu1 %vm736_vm1, %v5915_v5  ;;  %v5917_v5 = vld [vmem:[%s6020_s18 + $0x94] ss:$8 sps:$4 sm:$0xff]  }
 0x279   : > { %v7647_v10 = vpop.f32.mrb[52].mxu0  ;;  %v7649_v45 = vpop.f32.mrb[52].mxu1 }
 0x27a   : > { %8123 = vst [vmem:[#allocation39_spill] sm:$0xff] %v7647_v10  ;;  %8124 = vst [vmem:[#allocation40_spill] sm:$0xff] %v7649_v45  ;;  %v1595_v8 = vpop.f32.mrb[53].mxu0  ;;  %v2401_v38 = vpop.f32.mrb[53].mxu1  ;;  %v5918_v10 = vld [vmem:[%s6020_s18 + $0x90] ss:$8 sps:$4 sm:$0xff]  }
 0x27b   : > { %v7653_v32 = vpop.f32.mrb[54].mxu0  ;;  %v7655_v19 = vpop.f32.mrb[54].mxu1 }
 0x27c   : > { %8125 = vst [vmem:[#allocation41_spill] sm:$0xff] %v7653_v32  ;;  %8126 = vst [vmem:[#allocation42_spill] sm:$0xff] %v7655_v19  ;;  %v1598_v24 = vpop.f32.mrb[55].mxu0  ;;  %v2404_v26 = vpop.f32.mrb[55].mxu1 }
 0x27e   : > { %2938 = vmatmul.mubr.bf16.gmra.mrb[96].mxu0 %v5916_v15  ;;  %3776 = vmatmul.mubr.bf16.gmra.mrb[96].mxu1 %v5916_v15 }
 0x27f   : > { %4877 = vmatprep.mubr.msk.bf16.mxu0 %vm736_vm1, %v5917_v5  ;;  %5033 = vmatprep.mubr.msk.bf16.mxu1 %vm736_vm1, %v5917_v5  ;;  %v5919_v5 = vld [vmem:[%s6020_s18 + $0xa4] ss:$8 sps:$4 sm:$0xff]  }
 0x281   : > { %v7663_v38 = vpop.f32.mrb[56].mxu0  ;;  %v7665_v8 = vpop.f32.mrb[56].mxu1 }
 0x282   : > { %8127 = vst [vmem:[#allocation43_spill] sm:$0xff] %v7665_v8  ;;  %v1603_v13 = vpop.f32.mrb[57].mxu0  ;;  %v2409_v37 = vpop.f32.mrb[57].mxu1 }
 0x283   : > { %v7669_v26 = vpop.f32.mrb[58].mxu0  ;;  %v7671_v19 = vpop.f32.mrb[58].mxu1 }
 0x284   : > { %8128 = vst [vmem:[#allocation44_spill] sm:$0xff] %v7671_v19  ;;  %v1606_v15 = vpop.f32.mrb[59].mxu0  ;;  %v2412_v45 = vpop.f32.mrb[59].mxu1 }
 0x286   : > { %2946 = vmatmul.mubr.bf16.gmra.mrb[100].mxu0 %v5918_v10  ;;  %3784 = vmatmul.mubr.bf16.gmra.mrb[100].mxu1 %v5918_v10 }
 0x287   : > { %4878 = vmatprep.mubr.msk.bf16.mxu0 %vm736_vm1, %v5919_v5  ;;  %5034 = vmatprep.mubr.msk.bf16.mxu1 %vm736_vm1, %v5919_v5 }
 0x289   : > { %v7679_v13 = vpop.f32.mrb[60].mxu0  ;;  %v7681_v37 = vpop.f32.mrb[60].mxu1 }
 0x28a   : > { %v1611_v24 = vpop.f32.mrb[61].mxu0  ;;  %v2484_v15 = vmax.f32 %v7679_v13, %v7681_v37  ;;  %v2417_v8 = vpop.f32.mrb[61].mxu1 }
 0x28b   : > { %v7685_v32 = vpop.f32.mrb[62].mxu0  ;;  %v7687_v45 = vpop.f32.mrb[62].mxu1  ;;  %v5923_v8 = vld [vmem:[%s6020_s18 + $0xe0] ss:$8 sps:$4 sm:$0xff]   ;;  %v8129_v24 = vld [vmem:[#allocation4_spill] sm:$0xff] }
 0x28c   : > { %v1614_v10 = vpop.f32.mrb[63].mxu0  ;;  %v2485_v19 = vmax.f32 %v7685_v32, %v7687_v45  ;;  %v2420_v5 = vpop.f32.mrb[63].mxu1 }
 0x28d   : > { %v8130_v10 = vld [vmem:[#allocation5_spill] sm:$0xff] }
 0x28e   : > { %2954 = vmatmul.mubr.bf16.gmra.mrb[104].mxu0 %v7064_v1  ;;  %3792 = vmatmul.mubr.bf16.gmra.mrb[104].mxu1 %v7064_v1  ;;  %v5920_v1 = vld [vmem:[%s6020_s18 + $0xd4] ss:$8 sps:$4 sm:$0xff]  }
 0x28f   : > { %4879 = vmatprep.mubr.msk.bf16.mxu0 %vm736_vm1, %v7070_v61  ;;  %5035 = vmatprep.mubr.msk.bf16.mxu1 %vm736_vm1, %v7070_v61  ;;  %v5921_v61 = vld [vmem:[%s6020_s18 + $0xd0] ss:$8 sps:$4 sm:$0xff]  }
 0x296   : > { %2962 = vmatmul.mubr.bf16.gmra.mrb[108].mxu0 %v7084_v44  ;;  %3800 = vmatmul.mubr.bf16.gmra.mrb[108].mxu1 %v7084_v44  ;;  %v5922_v44 = vld [vmem:[%s6020_s18 + $0xe4] ss:$8 sps:$4 sm:$0xff]  }
 0x297   : > { %4880 = vmatprep.mubr.msk.bf16.mxu0 %vm736_vm1, %v7090_v27  ;;  %5036 = vmatprep.mubr.msk.bf16.mxu1 %vm736_vm1, %v7090_v27  ;;  %v5924_v27 = vld [vmem:[%s6020_s18 + $0xf4] ss:$8 sps:$4 sm:$0xff]  }
 0x29e   : > { %2970 = vmatmul.mubr.bf16.gmra.mrb[112].mxu0 %v7104_v16  ;;  %3808 = vmatmul.mubr.bf16.gmra.mrb[112].mxu1 %v7104_v16  ;;  %v5925_v16 = vld [vmem:[%s6020_s18 + $0xf0] ss:$8 sps:$4 sm:$0xff]  }
 0x29f   : > { %4881 = vmatprep.mubr.msk.bf16.mxu0 %vm736_vm1, %v5920_v1  ;;  %5037 = vmatprep.mubr.msk.bf16.mxu1 %vm736_vm1, %v5920_v1  ;;  %v8140_v1 = vmax.f32 %v7354_v57, %v7356_v35 }
 0x2a6   : > { %2978 = vmatmul.mubr.bf16.gmra.mrb[116].mxu0 %v5921_v61  ;;  %3816 = vmatmul.mubr.bf16.gmra.mrb[116].mxu1 %v5921_v61 }
 0x2a7   : > { %4882 = vmatprep.mubr.msk.bf16.mxu0 %vm736_vm1, %v5922_v44  ;;  %5038 = vmatprep.mubr.msk.bf16.mxu1 %vm736_vm1, %v5922_v44 }
 0x2ae   : > { %2986 = vmatmul.mubr.bf16.gmra.mrb[120].mxu0 %v5923_v8  ;;  %3824 = vmatmul.mubr.bf16.gmra.mrb[120].mxu1 %v5923_v8 }
 0x2af   : > { %4883 = vmatprep.mubr.msk.bf16.mxu0 %vm736_vm1, %v5924_v27  ;;  %5039 = vmatprep.mubr.msk.bf16.mxu1 %vm736_vm1, %v5924_v27 }
 0x2b6   : > { %2994 = vmatmul.mubr.bf16.gmra.mrb[124].mxu0 %v5925_v16  ;;  %3832 = vmatmul.mubr.bf16.gmra.mrb[124].mxu1 %v5925_v16 }
 0x2b7   : > { %4920 = vmatprep.mubr.msk.bf16.mxu0 %vm736_vm1, %v6834_v34  ;;  %5076 = vmatprep.mubr.msk.bf16.mxu1 %vm736_vm1, %v6834_v34  ;;  %v8131_v34 = vld [vmem:[#allocation6_spill] sm:$0xff] }
 0x2be   : > { %3132 = vmatmul.mubr.bf16.vlgmr.msra.gmra.mrb[64].mxu0 %v6846_v25  ;;  %3970 = vmatmul.mubr.bf16.vlgmr.msra.gmra.mrb[64].mxu1 %v6846_v25  ;;  %v8132_v25 = vld [vmem:[#allocation7_spill] sm:$0xff] }
 0x2bf   : > { %4921 = vmatprep.mubr.msk.bf16.mxu0 %vm736_vm1, %v8129_v24  ;;  %5077 = vmatprep.mubr.msk.bf16.mxu1 %vm736_vm1, %v8129_v24 }
 0x2c6   : > { %3140 = vmatmul.mubr.bf16.gmra.mrb[68].mxu0 %v6874_v51  ;;  %3978 = vmatmul.mubr.bf16.gmra.mrb[68].mxu1 %v6874_v51  ;;  %v8133_v51 = vld [vmem:[#allocation8_spill] sm:$0xff] }
 0x2c7   : > { %4922 = vmatprep.mubr.msk.bf16.mxu0 %vm736_vm1, %v8130_v10  ;;  %5078 = vmatprep.mubr.msk.bf16.mxu1 %vm736_vm1, %v8130_v10 }
 0x2ce   : > { %3148 = vmatmul.mubr.bf16.gmra.mrb[72].mxu0 %v6904_v18  ;;  %3986 = vmatmul.mubr.bf16.gmra.mrb[72].mxu1 %v6904_v18  ;;  %v8135_v18 = vld [vmem:[#allocation10_spill] sm:$0xff] }
 0x2cf   : > { %4923 = vmatprep.mubr.msk.bf16.mxu0 %vm736_vm1, %v6907_v0  ;;  %5079 = vmatprep.mubr.msk.bf16.mxu1 %vm736_vm1, %v6907_v0  ;;  %v8134_v0 = vld [vmem:[#allocation9_spill] sm:$0xff] }
 0x2d6   : > { %3156 = vmatmul.mubr.bf16.gmra.mrb[76].mxu0 %v6934_v20  ;;  %3994 = vmatmul.mubr.bf16.gmra.mrb[76].mxu1 %v6934_v20  ;;  %v8136_v20 = vld [vmem:[#allocation11_spill] sm:$0xff] }
 0x2d7   : > { %4924 = vmatprep.mubr.msk.bf16.mxu0 %vm736_vm1, %v6937_v29  ;;  %5080 = vmatprep.mubr.msk.bf16.mxu1 %vm736_vm1, %v6937_v29  ;;  %v8137_v29 = vld [vmem:[#allocation12_spill] sm:$0xff] }
 0x2de   : > { %3164 = vmatmul.mubr.bf16.gmra.mrb[80].mxu0 %v6964_v60  ;;  %4002 = vmatmul.mubr.bf16.gmra.mrb[80].mxu1 %v6964_v60 }
 0x2df   : > { %4925 = vmatprep.mubr.msk.bf16.mxu0 %vm736_vm1, %v6967_v11  ;;  %5081 = vmatprep.mubr.msk.bf16.mxu1 %vm736_vm1, %v6967_v11  ;;  %v8138_v11 = vmax.f32 %v7336_v40, %v7338_v3 }
 0x2e6   : > { %3172 = vmatmul.mubr.bf16.gmra.mrb[84].mxu0 %v6994_v30  ;;  %4010 = vmatmul.mubr.bf16.gmra.mrb[84].mxu1 %v6994_v30 }
 0x2e7   : > { %4926 = vmatprep.mubr.msk.bf16.mxu0 %vm736_vm1, %v6997_v58  ;;  %5082 = vmatprep.mubr.msk.bf16.mxu1 %vm736_vm1, %v6997_v58 }
 0x2ee   : > { %3180 = vmatmul.mubr.bf16.gmra.mrb[88].mxu0 %v7024_v36  ;;  %4018 = vmatmul.mubr.bf16.gmra.mrb[88].mxu1 %v7024_v36 }
 0x2ef   : > { %4927 = vmatprep.mubr.msk.bf16.mxu0 %vm736_vm1, %v7027_v12  ;;  %5083 = vmatprep.mubr.msk.bf16.mxu1 %vm736_vm1, %v7027_v12  ;;  %v7819_v12 = vld [vmem:[%s8021_s2] ss:$0 sm:$0xff] }
 0x2f6   : > { %3188 = vmatmul.mubr.bf16.gmra.mrb[92].mxu0 %v8131_v34  ;;  %4026 = vmatmul.mubr.bf16.gmra.mrb[92].mxu1 %v8131_v34  ;;  %v8141_v34 = vmax.f32 %v7360_v47, %v7362_v33  ;;  %v8142_v47 = vmax.f32 %v7372_v23, %v7374_v28 }
 0x2f7   : > { %4928 = vmatprep.mubr.msk.bf16.mxu0 %vm736_vm1, %v8132_v25  ;;  %5084 = vmatprep.mubr.msk.bf16.mxu1 %vm736_vm1, %v8132_v25 }
 0x2fe   : > { %3196 = vmatmul.mubr.bf16.gmra.mrb[96].mxu0 %v8133_v51  ;;  %4034 = vmatmul.mubr.bf16.gmra.mrb[96].mxu1 %v8133_v51 }
 0x2ff   : > { %4929 = vmatprep.mubr.msk.bf16.mxu0 %vm736_vm1, %v8134_v0  ;;  %5085 = vmatprep.mubr.msk.bf16.mxu1 %vm736_vm1, %v8134_v0 }
 0x306   : > { %3204 = vmatmul.mubr.bf16.gmra.mrb[100].mxu0 %v8135_v18  ;;  %4042 = vmatmul.mubr.bf16.gmra.mrb[100].mxu1 %v8135_v18 }
 0x307   : > { %4930 = vmatprep.mubr.msk.bf16.mxu0 %vm736_vm1, %v8136_v20  ;;  %5086 = vmatprep.mubr.msk.bf16.mxu1 %vm736_vm1, %v8136_v20 }
 0x30e   : > { %3212 = vmatmul.mubr.bf16.gmra.mrb[104].mxu0 %v8137_v29  ;;  %4050 = vmatmul.mubr.bf16.gmra.mrb[104].mxu1 %v8137_v29 }
 0x30f   : > { %4931 = vmatprep.mubr.msk.bf16.mxu0 %vm736_vm1, %v7097_v2  ;;  %5087 = vmatprep.mubr.msk.bf16.mxu1 %vm736_vm1, %v7097_v2 }
 0x316   : > { %3220 = vmatmul.mubr.bf16.gmra.mrb[108].mxu0 %v7111_v53  ;;  %4058 = vmatmul.mubr.bf16.gmra.mrb[108].mxu1 %v7111_v53 }
 0x317   : > { %4932 = vmatprep.mubr.msk.bf16.mxu0 %vm736_vm1, %v7114_v21  ;;  %5088 = vmatprep.mubr.msk.bf16.mxu1 %vm736_vm1, %v7114_v21 }
 0x31e   : > { %3228 = vmatmul.mubr.bf16.gmra.mrb[112].mxu0 %v7125_v43  ;;  %4066 = vmatmul.mubr.bf16.gmra.mrb[112].mxu1 %v7125_v43  ;;  %v8139_v43 = vmax.f32 %v7342_v41, %v7344_v52 }
 0x31f   : > { %4933 = vmatprep.mubr.msk.bf16.mxu0 %vm736_vm1, %v7128_v49  ;;  %5089 = vmatprep.mubr.msk.bf16.mxu1 %vm736_vm1, %v7128_v49 }
 0x326   : > { %3236 = vmatmul.mubr.bf16.gmra.mrb[116].mxu0 %v7139_v14  ;;  %4074 = vmatmul.mubr.bf16.gmra.mrb[116].mxu1 %v7139_v14 }
 0x327   : > { %4934 = vmatprep.mubr.msk.bf16.mxu0 %vm736_vm1, %v7142_v9  ;;  %5090 = vmatprep.mubr.msk.bf16.mxu1 %vm736_vm1, %v7142_v9 }
 0x32e   : > { %3244 = vmatmul.mubr.bf16.gmra.mrb[120].mxu0 %v7152_v42  ;;  %4082 = vmatmul.mubr.bf16.gmra.mrb[120].mxu1 %v7152_v42 }
 0x32f   : > { %4935 = vmatprep.mubr.msk.bf16.mxu0 %vm736_vm1, %v7156_v17  ;;  %5091 = vmatprep.mubr.msk.bf16.mxu1 %vm736_vm1, %v7156_v17 }
 0x336   : > { %3252 = vmatmul.mubr.bf16.gmra.mrb[124].mxu0 %v7166_v62  ;;  %4090 = vmatmul.mubr.bf16.gmra.mrb[124].mxu1 %v7166_v62 }
 0x391   : > { %v3133_v60 = vpop.f32.mrb[64].mxu0  ;;  %v3971_v58 = vpop.f32.mrb[64].mxu1 }
 0x392   : > { %v3292_v30 = vmax.f32 %v8138_v11, %v3133_v60  ;;  %v3135_v36 = vpop.f32.mrb[65].mxu0  ;;  %v3973_v53 = vpop.f32.mrb[65].mxu1 }
 0x393   : > { %v3136_v2 = vpop.f32.mrb[66].mxu0  ;;  %v3974_v14 = vpop.f32.mrb[66].mxu1 }
 0x394   : > { %v4130_v21 = vmax.f32 %v3292_v30, %v3971_v58  ;;  %v3293_v49 = vmax.f32 %v8139_v43, %v3136_v2  ;;  %v3138_v9 = vpop.f32.mrb[67].mxu0  ;;  %v3976_v42 = vpop.f32.mrb[67].mxu1 }
 0x396   : > { %v4169_v17 = vadd.f32 %v7819_v12, %v4130_v21  ;;  %v4131_v62 = vmax.f32 %v3293_v49, %v3974_v14  ;;  %v8143_v49 = vmax.f32 %v7378_v22, %v7380_v31  ;;  %v8144_v22 = vmax.f32 %v7390_v55, %v7392_v39 }
 0x398   : > { %v4201_v40 = vmax.f32 %v4169_v17, 0.0  ;;  %v4170_v3 = vadd.f32 %v7819_v12, %v4131_v62 }
 0x399   : > { %v3141_v41 = vpop.f32.mrb[68].mxu0  ;;  %v3979_v44 = vpop.f32.mrb[68].mxu1 }
 0x39a   : > { %v5128_v52 = vpack.c.bf16 %v4201_v40, %v4201_v40  ;;  %v4202_v5 = vmax.f32 %v4170_v3, 0.0  ;;  %v3294_v61 = vmax.f32 %v8140_v1, %v3141_v41  ;;  %v3143_v8 = vpop.f32.mrb[69].mxu0  ;;  %v3981_v27 = vpop.f32.mrb[69].mxu1 }
 0x39b   : > { %v3144_v16 = vpop.f32.mrb[70].mxu0  ;;  %v3982_v51 = vpop.f32.mrb[70].mxu1 }
 0x39c   : > { %4362 = vst.msk [vmem:[%s7830_s21] sm:$0xf] %vm4361_vm3, %v5128_v52  ;;  %v5129_v24 = vpack.c.bf16 %v4202_v5, %v4202_v5  ;;  %v4132_v10 = vmax.f32 %v3294_v61, %v3979_v44  ;;  %v3295_v25 = vmax.f32 %v8141_v34, %v3144_v16  ;;  %v3146_v0 = vpop.f32.mrb[71].mxu0  ;;  %v3984_v18 = vpop.f32.mrb[71].mxu1  ;;  %v8145_v16 = vmax.f32 %v7396_v54, %v7398_v7 }
 0x39d   : > { %v8146_v54 = vmax.f32 %v7408_v63, %v7410_v59 }
 0x39e   : > { %4363 = vst.msk [vmem:[%s7830_s21 + $0x4] sm:$0xf] %vm4361_vm3, %v5129_v24  ;;  %v4171_v57 = vadd.f32 %v7819_v12, %v4132_v10  ;;  %v4133_v35 = vmax.f32 %v3295_v25, %v3982_v51 }
 0x3a0   : > { %v4203_v20 = vmax.f32 %v4171_v57, 0.0  ;;  %v4172_v29 = vadd.f32 %v7819_v12, %v4133_v35 }
 0x3a1   : > { %v3149_v60 = vpop.f32.mrb[72].mxu0  ;;  %v3987_v58 = vpop.f32.mrb[72].mxu1 }
 0x3a2   : > { %v5130_v11 = vpack.c.bf16 %v4203_v20, %v4203_v20  ;;  %v4204_v30 = vmax.f32 %v4172_v29, 0.0  ;;  %v3296_v33 = vmax.f32 %v8142_v47, %v3149_v60  ;;  %v3151_v36 = vpop.f32.mrb[73].mxu0  ;;  %v3989_v53 = vpop.f32.mrb[73].mxu1 }
 0x3a3   : > { %v3152_v2 = vpop.f32.mrb[74].mxu0  ;;  %v3990_v9 = vpop.f32.mrb[74].mxu1 }
 0x3a4   : > { %4364 = vst.msk [vmem:[%s7830_s21 + $0x8] sm:$0xf] %vm4361_vm3, %v5130_v11  ;;  %v5131_v21 = vpack.c.bf16 %v4204_v30, %v4204_v30  ;;  %v4134_v43 = vmax.f32 %v3296_v33, %v3987_v58  ;;  %v3297_v14 = vmax.f32 %v8143_v49, %v3152_v2  ;;  %v3154_v42 = vpop.f32.mrb[75].mxu0  ;;  %v3992_v17 = vpop.f32.mrb[75].mxu1  ;;  %v8147_v33 = vmax.f32 %v7414_v46, %v7416_v48 }
 0x3a5   : > { %v8148_v46 = vmax.f32 %v7425_v50, %v7427_v56 }
 0x3a6   : > { %4365 = vst.msk [vmem:[%s7830_s21 + $0xc] sm:$0xf] %vm4361_vm3, %v5131_v21  ;;  %v4173_v23 = vadd.f32 %v7819_v12, %v4134_v43  ;;  %v4135_v28 = vmax.f32 %v3297_v14, %v3990_v9 }
 0x3a8   : > { %v4205_v62 = vmax.f32 %v4173_v23, 0.0  ;;  %v4174_v40 = vadd.f32 %v7819_v12, %v4135_v28 }
 0x3a9   : > { %v3157_v3 = vpop.f32.mrb[76].mxu0  ;;  %v3995_v5 = vpop.f32.mrb[76].mxu1 }
 0x3aa   : > { %v5132_v41 = vpack.c.bf16 %v4205_v62, %v4205_v62  ;;  %v4206_v52 = vmax.f32 %v4174_v40, 0.0  ;;  %v3298_v31 = vmax.f32 %v8144_v22, %v3157_v3  ;;  %v3159_v1 = vpop.f32.mrb[77].mxu0  ;;  %v3997_v61 = vpop.f32.mrb[77].mxu1  ;;  %v8149_v3 = vld [vmem:[#allocation2_spill] sm:$0xff] }
 0x3ab   : > { %v3160_v44 = vpop.f32.mrb[78].mxu0  ;;  %v3998_v10 = vpop.f32.mrb[78].mxu1 }
 0x3ac   : > { %4366 = vst.msk [vmem:[%s7830_s21 + $0x10] sm:$0xf] %vm4361_vm3, %v5132_v41  ;;  %v5133_v8 = vpack.c.bf16 %v4206_v52, %v4206_v52  ;;  %v4136_v27 = vmax.f32 %v3298_v31, %v3995_v5  ;;  %v3299_v24 = vmax.f32 %v8145_v16, %v3160_v44  ;;  %v3162_v34 = vpop.f32.mrb[79].mxu0  ;;  %v4000_v25 = vpop.f32.mrb[79].mxu1  ;;  %v8150_v41 = vld [vmem:[#allocation3_spill] sm:$0xff] }
 0x3ad   : > { %v8151_v52 = vmax.f32 %v8149_v3, %v8150_v41 }
 0x3ae   : > { %4367 = vst.msk [vmem:[%s7830_s21 + $0x14] sm:$0xf] %vm4361_vm3, %v5133_v8  ;;  %v4175_v55 = vadd.f32 %v7819_v12, %v4136_v27  ;;  %v4137_v39 = vmax.f32 %v3299_v24, %v3998_v10  ;;  %v8152_v24 = vld [vmem:[#allocation13_spill] sm:$0xff]  ;;  %v8153_v10 = vld [vmem:[#allocation14_spill] sm:$0xff] }
 0x3af   : > { %v8154_v34 = vmax.f32 %v8152_v24, %v8153_v10 }
 0x3b0   : > { %v4207_v51 = vmax.f32 %v4175_v55, 0.0  ;;  %v4176_v0 = vadd.f32 %v7819_v12, %v4137_v39 }
 0x3b1   : > { %v3165_v18 = vpop.f32.mrb[80].mxu0  ;;  %v4003_v20 = vpop.f32.mrb[80].mxu1 }
 0x3b2   : > { %v5134_v57 = vpack.c.bf16 %v4207_v51, %v4207_v51  ;;  %v4208_v35 = vmax.f32 %v4176_v0, 0.0  ;;  %v3300_v7 = vmax.f32 %v8146_v54, %v3165_v18  ;;  %v3167_v29 = vpop.f32.mrb[81].mxu0  ;;  %v4005_v60 = vpop.f32.mrb[81].mxu1  ;;  %v8156_v54 = vld [vmem:[#allocation16_spill] sm:$0xff] }
 0x3b3   : > { %v3168_v11 = vpop.f32.mrb[82].mxu0  ;;  %v4006_v36 = vpop.f32.mrb[82].mxu1 }
 0x3b4   : > { %4368 = vst.msk [vmem:[%s7830_s21 + $0x18] sm:$0xf] %vm4361_vm3, %v5134_v57  ;;  %v5135_v30 = vpack.c.bf16 %v4208_v35, %v4208_v35  ;;  %v4138_v47 = vmax.f32 %v3300_v7, %v4003_v20  ;;  %v3301_v58 = vmax.f32 %v8147_v33, %v3168_v11  ;;  %v3170_v53 = vpop.f32.mrb[83].mxu0  ;;  %v4008_v2 = vpop.f32.mrb[83].mxu1  ;;  %v8155_v35 = vld [vmem:[#allocation15_spill] sm:$0xff] }
 0x3b5   : > { %v8157_v7 = vmax.f32 %v8155_v35, %v8156_v54 }
 0x3b6   : > { %4369 = vst.msk [vmem:[%s7830_s21 + $0x1c] sm:$0xf] %vm4361_vm3, %v5135_v30  ;;  %v4177_v63 = vadd.f32 %v7819_v12, %v4138_v47  ;;  %v4139_v59 = vmax.f32 %v3301_v58, %v4006_v36 }
 0x3b8   : > { %v4209_v21 = vmax.f32 %v4177_v63, 0.0  ;;  %v4178_v43 = vadd.f32 %v7819_v12, %v4139_v59  ;;  %v8158_v63 = vld [vmem:[#allocation17_spill] sm:$0xff]  ;;  %v8159_v59 = vld [vmem:[#allocation18_spill] sm:$0xff] }
 0x3b9   : > { %v3173_v49 = vpop.f32.mrb[84].mxu0  ;;  %v4011_v42 = vpop.f32.mrb[84].mxu1 }
 0x3ba   : > { %v5136_v14 = vpack.c.bf16 %v4209_v21, %v4209_v21  ;;  %v4210_v9 = vmax.f32 %v4178_v43, 0.0  ;;  %v3302_v48 = vmax.f32 %v8148_v46, %v3173_v49  ;;  %v3175_v17 = vpop.f32.mrb[85].mxu0  ;;  %v4013_v23 = vpop.f32.mrb[85].mxu1  ;;  %v8160_v21 = vmax.f32 %v8158_v63, %v8159_v59 }
 0x3bb   : > { %v3176_v28 = vpop.f32.mrb[86].mxu0  ;;  %v4014_v31 = vpop.f32.mrb[86].mxu1  ;;  %v8161_v17 = vld [vmem:[#allocation19_spill] sm:$0xff]  ;;  %v8162_v23 = vld [vmem:[#allocation20_spill] sm:$0xff] }
 0x3bc   : > { %4370 = vst.msk [vmem:[%s7830_s21 + $0x20] sm:$0xf] %vm4361_vm3, %v5136_v14  ;;  %v5137_v62 = vpack.c.bf16 %v4210_v9, %v4210_v9  ;;  %v4140_v40 = vmax.f32 %v3302_v48, %v4011_v42  ;;  %v3303_v22 = vmax.f32 %v8151_v52, %v3176_v28  ;;  %v3178_v5 = vpop.f32.mrb[87].mxu0  ;;  %v4016_v1 = vpop.f32.mrb[87].mxu1  ;;  %v8163_v28 = vmax.f32 %v8161_v17, %v8162_v23 }
 0x3be   : > { %4371 = vst.msk [vmem:[%s7830_s21 + $0x24] sm:$0xf] %vm4361_vm3, %v5137_v62  ;;  %v4179_v50 = vadd.f32 %v7819_v12, %v4140_v40  ;;  %v4141_v56 = vmax.f32 %v3303_v22, %v4014_v31 }
 0x3c0   : > { %v4211_v61 = vmax.f32 %v4179_v50, 0.0  ;;  %v4180_v44 = vadd.f32 %v7819_v12, %v4141_v56 }
 0x3c1   : > { %v3181_v8 = vpop.f32.mrb[88].mxu0  ;;  %v4019_v55 = vpop.f32.mrb[88].mxu1 }
 0x3c2   : > { %v5138_v27 = vpack.c.bf16 %v4211_v61, %v4211_v61  ;;  %v4212_v16 = vmax.f32 %v4180_v44, 0.0  ;;  %v3304_v25 = vmax.f32 %v8154_v34, %v3181_v8  ;;  %v3183_v39 = vpop.f32.mrb[89].mxu0  ;;  %v4021_v51 = vpop.f32.mrb[89].mxu1  ;;  %v8164_v61 = vld [vmem:[#allocation21_spill] sm:$0xff]  ;;  %v8165_v44 = vld [vmem:[#allocation22_spill] sm:$0xff] }
 0x3c3   : > { %v3184_v0 = vpop.f32.mrb[90].mxu0  ;;  %v4022_v29 = vpop.f32.mrb[90].mxu1  ;;  %v8166_v8 = vmax.f32 %v8164_v61, %v8165_v44  ;;  %v8167_v39 = vld [vmem:[#allocation23_spill] sm:$0xff]  ;;  %v8168_v51 = vld [vmem:[#allocation24_spill] sm:$0xff] }
 0x3c4   : > { %4372 = vst.msk [vmem:[%s7830_s21 + $0x28] sm:$0xf] %vm4361_vm3, %v5138_v27  ;;  %v5139_v18 = vpack.c.bf16 %v4212_v16, %v4212_v16  ;;  %v4142_v57 = vmax.f32 %v3304_v25, %v4019_v55  ;;  %v3305_v20 = vmax.f32 %v8157_v7, %v3184_v0  ;;  %v3186_v60 = vpop.f32.mrb[91].mxu0  ;;  %v4024_v11 = vpop.f32.mrb[91].mxu1  ;;  %v8169_v0 = vmax.f32 %v8167_v39, %v8168_v51 }
 0x3c6   : > { %4373 = vst.msk [vmem:[%s7830_s21 + $0x2c] sm:$0xf] %vm4361_vm3, %v5139_v18  ;;  %v4181_v30 = vadd.f32 %v7819_v12, %v4142_v57  ;;  %v4143_v47 = vmax.f32 %v3305_v20, %v4022_v29 }
 0x3c8   : > { %v4213_v33 = vmax.f32 %v4181_v30, 0.0  ;;  %v4182_v58 = vadd.f32 %v7819_v12, %v4143_v47 }
 0x3c9   : > { %v3189_v36 = vpop.f32.mrb[92].mxu0  ;;  %v4027_v49 = vpop.f32.mrb[92].mxu1 }
 0x3ca   : > { %v5140_v53 = vpack.c.bf16 %v4213_v33, %v4213_v33  ;;  %v4214_v2 = vmax.f32 %v4182_v58, 0.0  ;;  %v3306_v43 = vmax.f32 %v8160_v21, %v3189_v36  ;;  %v3191_v14 = vpop.f32.mrb[93].mxu0  ;;  %v4029_v9 = vpop.f32.mrb[93].mxu1  ;;  %v8170_v33 = vld [vmem:[#allocation25_spill] sm:$0xff]  ;;  %v8171_v58 = vld [vmem:[#allocation26_spill] sm:$0xff] }
 0x3cb   : > { %v3192_v46 = vpop.f32.mrb[94].mxu0  ;;  %v4030_v40 = vpop.f32.mrb[94].mxu1  ;;  %v8172_v36 = vmax.f32 %v8170_v33, %v8171_v58  ;;  %v8173_v14 = vld [vmem:[#allocation27_spill] sm:$0xff]  ;;  %v8174_v9 = vld [vmem:[#allocation28_spill] sm:$0xff] }
 0x3cc   : > { %4374 = vst.msk [vmem:[%s7830_s21 + $0x30] sm:$0xf] %vm4361_vm3, %v5140_v53  ;;  %v5141_v48 = vpack.c.bf16 %v4214_v2, %v4214_v2  ;;  %v4144_v42 = vmax.f32 %v3306_v43, %v4027_v49  ;;  %v3307_v62 = vmax.f32 %v8163_v28, %v3192_v46  ;;  %v3194_v3 = vpop.f32.mrb[95].mxu0  ;;  %v4032_v41 = vpop.f32.mrb[95].mxu1  ;;  %v8175_v46 = vmax.f32 %v8173_v14, %v8174_v9 }
 0x3ce   : > { %4375 = vst.msk [vmem:[%s7830_s21 + $0x34] sm:$0xf] %vm4361_vm3, %v5141_v48  ;;  %v4183_v52 = vadd.f32 %v7819_v12, %v4144_v42  ;;  %v4145_v22 = vmax.f32 %v3307_v62, %v4030_v40 }
 0x3d0   : > { %v4215_v31 = vmax.f32 %v4183_v52, 0.0  ;;  %v4184_v5 = vadd.f32 %v7819_v12, %v4145_v22 }
 0x3d1   : > { %v3197_v1 = vpop.f32.mrb[96].mxu0  ;;  %v4035_v16 = vpop.f32.mrb[96].mxu1 }
 0x3d2   : > { %v5142_v50 = vpack.c.bf16 %v4215_v31, %v4215_v31  ;;  %v4216_v56 = vmax.f32 %v4184_v5, 0.0  ;;  %v3308_v27 = vmax.f32 %v8166_v8, %v3197_v1  ;;  %v3199_v24 = vpop.f32.mrb[97].mxu0  ;;  %v4037_v10 = vpop.f32.mrb[97].mxu1  ;;  %v8176_v31 = vld [vmem:[#allocation29_spill] sm:$0xff]  ;;  %v8177_v5 = vld [vmem:[#allocation30_spill] sm:$0xff] }
 0x3d3   : > { %v3200_v34 = vpop.f32.mrb[98].mxu0  ;;  %v4038_v57 = vpop.f32.mrb[98].mxu1  ;;  %v8178_v1 = vmax.f32 %v8176_v31, %v8177_v5  ;;  %v8179_v24 = vld [vmem:[#allocation31_spill] sm:$0xff]  ;;  %v8180_v10 = vld [vmem:[#allocation32_spill] sm:$0xff]  ;;  %v8189_v5 = vld [vmem:[#allocation37_spill] sm:$0xff] }
 0x3d4   : > { %4376 = vst.msk [vmem:[%s7830_s21 + $0x38] sm:$0xf] %vm4361_vm3, %v5142_v50  ;;  %v5143_v25 = vpack.c.bf16 %v4216_v56, %v4216_v56  ;;  %v4146_v55 = vmax.f32 %v3308_v27, %v4035_v16  ;;  %v3309_v18 = vmax.f32 %v8169_v0, %v3200_v34  ;;  %v3202_v35 = vpop.f32.mrb[99].mxu0  ;;  %v4040_v54 = vpop.f32.mrb[99].mxu1  ;;  %v8181_v34 = vmax.f32 %v8179_v24, %v8180_v10 }
 0x3d6   : > { %4377 = vst.msk [vmem:[%s7830_s21 + $0x3c] sm:$0xf] %vm4361_vm3, %v5143_v25  ;;  %v4185_v7 = vadd.f32 %v7819_v12, %v4146_v55  ;;  %v4147_v20 = vmax.f32 %v3309_v18, %v4038_v57 }
 0x3d8   : > { %v4217_v29 = vmax.f32 %v4185_v7, 0.0  ;;  %v4186_v60 = vadd.f32 %v7819_v12, %v4147_v20 }
 0x3d9   : > { %v3205_v11 = vpop.f32.mrb[100].mxu0  ;;  %v4043_v2 = vpop.f32.mrb[100].mxu1 }
 0x3da   : > { %v5144_v30 = vpack.c.bf16 %v4217_v29, %v4217_v29  ;;  %v4218_v47 = vmax.f32 %v4186_v60, 0.0  ;;  %v3310_v53 = vmax.f32 %v8172_v36, %v3205_v11  ;;  %v3207_v63 = vpop.f32.mrb[101].mxu0  ;;  %v4045_v59 = vpop.f32.mrb[101].mxu1  ;;  %v8182_v29 = vmax.f32 %v7610_v4, %v7616_v6 }
 0x3db   : > { %v3208_v21 = vpop.f32.mrb[102].mxu0  ;;  %v4046_v42 = vpop.f32.mrb[102].mxu1 }
 0x3dc   : > { %4378 = vst.msk [vmem:[%s7830_s21 + $0x40] sm:$0xf] %vm4361_vm3, %v5144_v30  ;;  %v5145_v43 = vpack.c.bf16 %v4218_v47, %v4218_v47  ;;  %v4148_v49 = vmax.f32 %v3310_v53, %v4043_v2  ;;  %v3311_v48 = vmax.f32 %v8175_v46, %v3208_v21  ;;  %v3210_v17 = vpop.f32.mrb[103].mxu0  ;;  %v4048_v23 = vpop.f32.mrb[103].mxu1  ;;  %v8183_v53 = vld [vmem:[#allocation33_spill] sm:$0xff]  ;;  %v8184_v2 = vld [vmem:[#allocation34_spill] sm:$0xff] }
 0x3dd   : > { %v8185_v63 = vmax.f32 %v8183_v53, %v8184_v2  ;;  %v8186_v17 = vld [vmem:[#allocation35_spill] sm:$0xff]  ;;  %v8187_v23 = vld [vmem:[#allocation36_spill] sm:$0xff] }
 0x3de   : > { %4379 = vst.msk [vmem:[%s7830_s21 + $0x44] sm:$0xf] %vm4361_vm3, %v5145_v43  ;;  %v4187_v28 = vadd.f32 %v7819_v12, %v4148_v49  ;;  %v4149_v62 = vmax.f32 %v3311_v48, %v4046_v42 }
 0x3e0   : > { %v4219_v40 = vmax.f32 %v4187_v28, 0.0  ;;  %v4188_v3 = vadd.f32 %v7819_v12, %v4149_v62  ;;  %v8188_v28 = vmax.f32 %v8186_v17, %v8187_v23 }
 0x3e1   : > { %v3213_v41 = vpop.f32.mrb[104].mxu0  ;;  %v4051_v56 = vpop.f32.mrb[104].mxu1 }
 0x3e2   : > { %v5146_v52 = vpack.c.bf16 %v4219_v40, %v4219_v40  ;;  %v4220_v22 = vmax.f32 %v4188_v3, 0.0  ;;  %v3312_v50 = vmax.f32 %v8178_v1, %v3213_v41  ;;  %v3215_v61 = vpop.f32.mrb[105].mxu0  ;;  %v4053_v44 = vpop.f32.mrb[105].mxu1  ;;  %v8190_v1 = vld [vmem:[#allocation38_spill] sm:$0xff] }
 0x3e3   : > { %v3216_v8 = vpop.f32.mrb[106].mxu0  ;;  %v4054_v55 = vpop.f32.mrb[106].mxu1 }
 0x3e4   : > { %4380 = vst.msk [vmem:[%s7830_s21 + $0x48] sm:$0xf] %vm4361_vm3, %v5146_v52  ;;  %v5147_v27 = vpack.c.bf16 %v4220_v22, %v4220_v22  ;;  %v4150_v16 = vmax.f32 %v3312_v50, %v4051_v56  ;;  %v3313_v25 = vmax.f32 %v8181_v34, %v3216_v8  ;;  %v3218_v39 = vpop.f32.mrb[107].mxu0  ;;  %v4056_v51 = vpop.f32.mrb[107].mxu1  ;;  %v8191_v50 = vmax.f32 %v8189_v5, %v8190_v1 }
 0x3e5   : > { %v8192_v39 = vld [vmem:[#allocation39_spill] sm:$0xff]  ;;  %v8193_v51 = vld [vmem:[#allocation40_spill] sm:$0xff] }
 0x3e6   : > { %4381 = vst.msk [vmem:[%s7830_s21 + $0x4c] sm:$0xf] %vm4361_vm3, %v5147_v27  ;;  %v4189_v0 = vadd.f32 %v7819_v12, %v4150_v16  ;;  %v4151_v18 = vmax.f32 %v3313_v25, %v4054_v55 }
 0x3e8   : > { %v4221_v57 = vmax.f32 %v4189_v0, 0.0  ;;  %v4190_v35 = vadd.f32 %v7819_v12, %v4151_v18  ;;  %v8194_v0 = vmax.f32 %v8192_v39, %v8193_v51 }
 0x3e9   : > { %v3221_v54 = vpop.f32.mrb[108].mxu0  ;;  %v4059_v11 = vpop.f32.mrb[108].mxu1 }
 0x3ea   : > { %v5148_v7 = vpack.c.bf16 %v4221_v57, %v4221_v57  ;;  %v4222_v20 = vmax.f32 %v4190_v35, 0.0  ;;  %v3314_v60 = vmax.f32 %v8182_v29, %v3221_v54  ;;  %v3223_v30 = vpop.f32.mrb[109].mxu0  ;;  %v4061_v47 = vpop.f32.mrb[109].mxu1 }
 0x3eb   : > { %v3224_v33 = vpop.f32.mrb[110].mxu0  ;;  %v4062_v21 = vpop.f32.mrb[110].mxu1 }
 0x3ec   : > { %4382 = vst.msk [vmem:[%s7830_s21 + $0x50] sm:$0xf] %vm4361_vm3, %v5148_v7  ;;  %v5149_v58 = vpack.c.bf16 %v4222_v20, %v4222_v20  ;;  %v4152_v36 = vmax.f32 %v3314_v60, %v4059_v11  ;;  %v3315_v59 = vmax.f32 %v8185_v63, %v3224_v33  ;;  %v3226_v43 = vpop.f32.mrb[111].mxu0  ;;  %v4064_v49 = vpop.f32.mrb[111].mxu1  ;;  %v8195_v60 = vld [vmem:[#allocation41_spill] sm:$0xff]  ;;  %v8196_v11 = vld [vmem:[#allocation42_spill] sm:$0xff] }
 0x3ed   : > { %v8197_v30 = vmax.f32 %v8195_v60, %v8196_v11 }
 0x3ee   : > { %4383 = vst.msk [vmem:[%s7830_s21 + $0x54] sm:$0xf] %vm4361_vm3, %v5149_v58  ;;  %v4191_v4 = vadd.f32 %v7819_v12, %v4152_v36  ;;  %v4153_v6 = vmax.f32 %v3315_v59, %v4062_v21 }
 0x3f0   : > { %v4223_v14 = vmax.f32 %v4191_v4, 0.0  ;;  %v4192_v9 = vadd.f32 %v7819_v12, %v4153_v6  ;;  %v8198_v4 = vld [vmem:[#allocation43_spill] sm:$0xff] }
 0x3f1   : > { %v3229_v46 = vpop.f32.mrb[112].mxu0  ;;  %v4067_v40 = vpop.f32.mrb[112].mxu1  ;;  %v8199_v6 = vmax.f32 %v7663_v38, %v8198_v4 }
 0x3f2   : > { %v5150_v48 = vpack.c.bf16 %v4223_v14, %v4223_v14  ;;  %v4224_v42 = vmax.f32 %v4192_v9, 0.0  ;;  %v3316_v62 = vmax.f32 %v8188_v28, %v3229_v46  ;;  %v3231_v3 = vpop.f32.mrb[113].mxu0  ;;  %v4069_v41 = vpop.f32.mrb[113].mxu1  ;;  %v8200_v28 = vld [vmem:[#allocation44_spill] sm:$0xff] }
 0x3f3   : > { %v3232_v52 = vpop.f32.mrb[114].mxu0  ;;  %v4070_v61 = vpop.f32.mrb[114].mxu1 }
 0x3f4   : > { %4384 = vst.msk [vmem:[%s7830_s21 + $0x58] sm:$0xf] %vm4361_vm3, %v5150_v48  ;;  %v5151_v22 = vpack.c.bf16 %v4224_v42, %v4224_v42  ;;  %v4154_v31 = vmax.f32 %v3316_v62, %v4067_v40  ;;  %v3317_v56 = vmax.f32 %v8191_v50, %v3232_v52  ;;  %v3234_v44 = vpop.f32.mrb[115].mxu0  ;;  %v4072_v8 = vpop.f32.mrb[115].mxu1  ;;  %v8201_v62 = vmax.f32 %v7669_v26, %v8200_v28 }
 0x3f6   : > { %4385 = vst.msk [vmem:[%s7830_s21 + $0x5c] sm:$0xf] %vm4361_vm3, %v5151_v22  ;;  %v4193_v27 = vadd.f32 %v7819_v12, %v4154_v31  ;;  %v4155_v16 = vmax.f32 %v3317_v56, %v4070_v61 }
 0x3f8   : > { %v4225_v24 = vmax.f32 %v4193_v27, 0.0  ;;  %v4194_v10 = vadd.f32 %v7819_v12, %v4155_v16 }
 0x3f9   : > { %v3237_v34 = vpop.f32.mrb[116].mxu0  ;;  %v4075_v57 = vpop.f32.mrb[116].mxu1 }
 0x3fa   : > { %v5152_v25 = vpack.c.bf16 %v4225_v24, %v4225_v24  ;;  %v4226_v55 = vmax.f32 %v4194_v10, 0.0  ;;  %v3318_v18 = vmax.f32 %v8194_v0, %v3237_v34  ;;  %v3239_v35 = vpop.f32.mrb[117].mxu0  ;;  %v4077_v54 = vpop.f32.mrb[117].mxu1 }
 0x3fb   : > { %v3240_v7 = vpop.f32.mrb[118].mxu0  ;;  %v4078_v33 = vpop.f32.mrb[118].mxu1 }
 0x3fc   : > { %4386 = vst.msk [vmem:[%s7830_s21 + $0x60] sm:$0xf] %vm4361_vm3, %v5152_v25  ;;  %v5153_v20 = vpack.c.bf16 %v4226_v55, %v4226_v55  ;;  %v4156_v29 = vmax.f32 %v3318_v18, %v4075_v57  ;;  %v3319_v47 = vmax.f32 %v8197_v30, %v3240_v7  ;;  %v3242_v58 = vpop.f32.mrb[119].mxu0  ;;  %v4080_v36 = vpop.f32.mrb[119].mxu1 }
 0x3fe   : > { %4387 = vst.msk [vmem:[%s7830_s21 + $0x64] sm:$0xf] %vm4361_vm3, %v5153_v20  ;;  %v4195_v53 = vadd.f32 %v7819_v12, %v4156_v29  ;;  %v4157_v2 = vmax.f32 %v3319_v47, %v4078_v33 }
 0x400   : > { %v4227_v63 = vmax.f32 %v4195_v53, 0.0  ;;  %v4196_v59 = vadd.f32 %v7819_v12, %v4157_v2 }
 0x401   : > { %v3245_v21 = vpop.f32.mrb[120].mxu0  ;;  %v4083_v9 = vpop.f32.mrb[120].mxu1 }
 0x402   : > { %v5154_v43 = vpack.c.bf16 %v4227_v63, %v4227_v63  ;;  %v4228_v49 = vmax.f32 %v4196_v59, 0.0  ;;  %v3320_v14 = vmax.f32 %v8199_v6, %v3245_v21  ;;  %v3247_v46 = vpop.f32.mrb[121].mxu0  ;;  %v4085_v48 = vpop.f32.mrb[121].mxu1 }
 0x403   : > { %v3248_v42 = vpop.f32.mrb[122].mxu0  ;;  %v4086_v3 = vpop.f32.mrb[122].mxu1 }
 0x404   : > { %4388 = vst.msk [vmem:[%s7830_s21 + $0x68] sm:$0xf] %vm4361_vm3, %v5154_v43  ;;  %v5155_v17 = vpack.c.bf16 %v4228_v49, %v4228_v49  ;;  %v4158_v23 = vmax.f32 %v3320_v14, %v4083_v9  ;;  %v3321_v40 = vmax.f32 %v8201_v62, %v3248_v42  ;;  %v3250_v41 = vpop.f32.mrb[123].mxu0  ;;  %v4088_v52 = vpop.f32.mrb[123].mxu1 }
 0x406   : > { %4389 = vst.msk [vmem:[%s7830_s21 + $0x6c] sm:$0xf] %vm4361_vm3, %v5155_v17  ;;  %v4197_v38 = vadd.f32 %v7819_v12, %v4158_v23  ;;  %v4159_v22 = vmax.f32 %v3321_v40, %v4086_v3 }
 0x408   : > { %v4229_v31 = vmax.f32 %v4197_v38, 0.0  ;;  %v4198_v5 = vadd.f32 %v7819_v12, %v4159_v22 }
 0x409   : > { %v3253_v1 = vpop.f32.mrb[124].mxu0  ;;  %v4091_v61 = vpop.f32.mrb[124].mxu1 }
 0x40a   : > { %v5156_v50 = vpack.c.bf16 %v4229_v31, %v4229_v31  ;;  %v4230_v56 = vmax.f32 %v4198_v5, 0.0  ;;  %v3322_v26 = vmax.f32 %v2484_v15, %v3253_v1  ;;  %v3255_v44 = vpop.f32.mrb[125].mxu0  ;;  %v4093_v8 = vpop.f32.mrb[125].mxu1 }
 0x40b   : > { %v3256_v27 = vpop.f32.mrb[126].mxu0  ;;  %v4094_v34 = vpop.f32.mrb[126].mxu1 }
 0x40c   : > { %4390 = vst.msk [vmem:[%s7830_s21 + $0x70] sm:$0xf] %vm4361_vm3, %v5156_v50  ;;  %v5157_v16 = vpack.c.bf16 %v4230_v56, %v4230_v56  ;;  %v4160_v24 = vmax.f32 %v3322_v26, %v4091_v61  ;;  %v3323_v10 = vmax.f32 %v2485_v19, %v3256_v27  ;;  %v3258_v25 = vpop.f32.mrb[127].mxu0  ;;  %v4096_v55 = vpop.f32.mrb[127].mxu1 }
 0x40e   : > { %4391 = vst.msk [vmem:[%s7830_s21 + $0x74] sm:$0xf] %vm4361_vm3, %v5157_v16  ;;  %v4199_v13 = vadd.f32 %v7819_v12, %v4160_v24  ;;  %v4161_v37 = vmax.f32 %v3323_v10, %v4094_v34 }
 0x410   : > { %v4231_v15 = vmax.f32 %v4199_v13, 0.0  ;;  %v4200_v39 = vadd.f32 %v7819_v12, %v4161_v37 }
 0x412   : > { %v5158_v51 = vpack.c.bf16 %v4231_v15, %v4231_v15  ;;  %v4232_v0 = vmax.f32 %v4200_v39, 0.0 }
 0x414   : > { %4392 = vst.msk [vmem:[%s7830_s21 + $0x78] sm:$0xf] %vm4361_vm3, %v5158_v51  ;;  %v5159_v18 = vpack.c.bf16 %v4232_v0, %v4232_v0 }
 0x416   : > { %4393 = vst.msk [vmem:[%s7830_s21 + $0x7c] sm:$0xf] %vm4361_vm3, %v5159_v18 }
 0x417 PF: > { %s13_s12 = sadd.s32 1, %s5932_s12  }
 0x418   : > { %p10_p4 = scmp.ge.s32.totalorder %s13_s12, 4  }
 0x41a   :  { %12 = sbr.rel (!%p10_p4) target bundleno = 1 (0x1), region = 73 }

// kernel: net_forward.5
= control target key start
LH: loop header
LB: loop body
LE: loop exit
PB: predicated region body
PF: predicated region fallthrough
CT: control target
= control target key end

     0   :  { %s1141_s24 = smov 0   ;;  %s1321_s0 = inlined_call_operand.vmem [shape: bf16[32,400], index: 0, kind: input, shape index: {}]   ;;  %s1322_s1 = inlined_call_operand.vmem [shape: bf16[400,128], index: 1, kind: input, shape index: {}]   ;;  %s1323_s2 = inlined_call_operand.vmem [shape: f32[1,128], index: 2, kind: input, shape index: {}]   ;;  %s1324_s3 = inlined_call_operand.vmem [shape: bf16[128,128], index: 3, kind: input, shape index: {}]   ;;  %s1325_s4 = inlined_call_operand.vmem [shape: f32[1,128], index: 4, kind: input, shape index: {}]   ;;  %s1326_s5 = inlined_call_operand.vmem [shape: bf16[128,128], index: 5, kind: input, shape index: {}]   ;;  %s1327_s6 = inlined_call_operand.vmem [shape: f32[1,128], index: 6, kind: input, shape index: {}]   ;;  %s1328_s7 = inlined_call_operand.vmem [shape: f32[32,128], index: 7, kind: output, shape index: {}]  }
   0x1 LB: > { %s890_s25 = sadd.s32 4294967295, %s1096_s24   ;;  %p894_p0 = scmp.ge.s32.totalorder %s1096_s24, 1  ;;  %s1096_s24 = sphi %s1141_s24, %s17_s24  }
   0x2   : > { %p239_p1 = scmp.lt.s32.totalorder %s1096_s24, 3 }
   0x4   : > { %p240_p2 = pnand %p894_p0, %p239_p1 }
   0x5   : > { %v1043_v0 = vld [vmem:[%s1322_s1 + $0x40] sm:$0xff] (!%p240_p2)   ;;  %v1098_v1 = vmov (!%p240_p2), 0   ;;  %v1046_v4 = vld [vmem:[%s1322_s1 + $0x48] sm:$0xff] (!%p240_p2)   ;;  %v1049_v7 = vld [vmem:[%s1322_s1 + $0x50] sm:$0xff] (!%p240_p2)   ;;  %s895_s21 = sshll.u32 (!%p240_p2), %s890_s25, 1  ;;  %vm516_vm0 = vcmask (!%p240_p2), 130048  }
   0x6   : > { %243 = sbr.rel (%p240_p2) target bundleno = 701 (0x2bd), region = 48  ;;  %561 = vmatprep.subr.bf16.mxu1 (!%p240_p2), %v1098_v1  ;;  %v1044_v2 = vld [vmem:[%s1322_s1 + $0x80] sm:$0xff] (!%p240_p2)   ;;  %952 = vmatprep.subr.bf16.mxu0 (!%p240_p2), %v1043_v0  ;;  %v1047_v5 = vld [vmem:[%s1322_s1 + $0x88] sm:$0xff] (!%p240_p2)   ;;  %v1050_v8 = vld [vmem:[%s1322_s1 + $0x90] sm:$0xff] (!%p240_p2)   ;;  %p273_p3 = scmp.lt.s32.totalorder (!%p240_p2), %s895_s21, 3  ;;  %v1099_v31 = vmov (!%p240_p2), 0.0  }
   0x7   : > { %v1045_v3 = vld [vmem:[%s1322_s1] sm:$0xff] (!%p240_p2)   ;;  %562 = vmatpush1.bf16.msra.mxu1 (!%p240_p2), %v1044_v2  ;;  %v1048_v6 = vld [vmem:[%s1322_s1 + $0x8] sm:$0xff] (!%p240_p2)   ;;  %v1051_v9 = vld [vmem:[%s1322_s1 + $0x10] sm:$0xff] (!%p240_p2)   ;;  %vm1100_vm1 = vmmov (!%p240_p2), 0  }
   0x8   : > { %953 = vmatpush3.bf16.msra.mxu0 (!%p240_p2), %v1045_v3  ;;  %563 = vmatprep.subr.bf16.mxu1 (!%p240_p2), %v1098_v1  ;;  %v1052_v10 = vld [vmem:[%s1322_s1 + $0x58] sm:$0xff] (!%p240_p2)   ;;  %v1055_v13 = vld [vmem:[%s1322_s1 + $0x60] sm:$0xff] (!%p240_p2)   ;;  %v1058_v16 = vld [vmem:[%s1322_s1 + $0x68] sm:$0xff] (!%p240_p2)  }
   0x9   : > { %954 = vmatprep.subr.bf16.mxu0 (!%p240_p2), %v1046_v4  ;;  %v1053_v11 = vld [vmem:[%s1322_s1 + $0x98] sm:$0xff] (!%p240_p2)   ;;  %v1056_v14 = vld [vmem:[%s1322_s1 + $0xa0] sm:$0xff] (!%p240_p2)   ;;  %v1059_v17 = vld [vmem:[%s1322_s1 + $0xa8] sm:$0xff] (!%p240_p2)  }
   0xa   : > { %v1054_v12 = vld [vmem:[%s1322_s1 + $0x18] sm:$0xff] (!%p240_p2)   ;;  %v1057_v15 = vld [vmem:[%s1322_s1 + $0x20] sm:$0xff] (!%p240_p2)   ;;  %v1060_v18 = vld [vmem:[%s1322_s1 + $0x28] sm:$0xff] (!%p240_p2)  }
   0xb   : > { %564 = vmatpush1.bf16.msra.mxu1 (!%p240_p2), %v1047_v5  ;;  %v1061_v19 = vld [vmem:[%s1322_s1 + $0x70] sm:$0xff] (!%p240_p2)   ;;  %v1064_v22 = vld [vmem:[%s1322_s1 + $0x78] sm:$0xff] (!%p240_p2)   ;;  %v1070_v28 = vld [vmem:[%s1322_s1 + $0xc0] sm:$0xff] (!%p240_p2)  }
   0xc   : > { %955 = vmatpush3.bf16.msra.mxu0 (!%p240_p2), %v1048_v6  ;;  %565 = vmatprep.subr.bf16.mxu1 (!%p240_p2), %v1098_v1  ;;  %v1062_v20 = vld [vmem:[%s1322_s1 + $0xb0] sm:$0xff] (!%p240_p2)   ;;  %v1065_v24 = vld [vmem:[%s1322_s1 + $0xb8] sm:$0xff] (!%p240_p2)   ;;  %v1074_v30 = vld [vmem:[%s1324_s3] sm:$0xff] (!%p240_p2)  }
   0xd   : > { %956 = vmatprep.subr.bf16.mxu0 %v1049_v7  ;;  %s1330_s21 = smov (!%p273_p3, %s895_s21), 3  ;;  %v1063_v21 = vld [vmem:[%s1322_s1 + $0x30] sm:$0xff]   ;;  %v1066_v26 = vld [vmem:[%s1322_s1 + $0x38] sm:$0xff]   ;;  %v1075_v32 = vld [vmem:[%s1324_s3 + $0x8] sm:$0xff]  }
   0xe   : > { %s951_s16 = sshll.u32 %s1330_s21, 4  ;;  %v1076_v33 = vld [vmem:[%s1324_s3 + $0x10] sm:$0xff]   ;;  %v1077_v34 = vld [vmem:[%s1324_s3 + $0x18] sm:$0xff]   ;;  %v1078_v35 = vld [vmem:[%s1324_s3 + $0x20] sm:$0xff]   ;;  %s899_s9 = sshll.u32 %s1330_s21, 3 }
   0xf   : > { %566 = vmatpush1.bf16.msra.mxu1 %v1050_v8  ;;  %s277_s28 = scalar_lea.vmem %s1321_s0, %s951_s16  ;;  %v1079_v36 = vld [vmem:[%s1324_s3 + $0x28] sm:$0xff]   ;;  %v1080_v37 = vld [vmem:[%s1324_s3 + $0x30] sm:$0xff]   ;;  %v1081_v38 = vld [vmem:[%s1324_s3 + $0x38] sm:$0xff]   ;;  %s283_s14 = scalar_lea.vmem %s1328_s7, %s899_s9 }
  0x10   : > { %957 = vmatpush3.bf16.msra.mxu0 %v1051_v9  ;;  %567 = vmatprep.subr.bf16.mxu1 %v1098_v1  ;;  %v1069_v23 = vld [vmem:[%s277_s28 + $0x4] ss:$16 sps:$4 sm:$0xff]   ;;  %v1073_v25 = vld [vmem:[%s277_s28 + $0xc] ss:$16 sps:$4 sm:$0xff]   ;;  %v1067_v27 = vld [vmem:[%s277_s28] ss:$16 sps:$4 sm:$0xff]  }
  0x11   : > { %958 = vmatprep.subr.bf16.mxu0 %v1052_v10  ;;  %552 = vmatprep.mubr.bf16.mxu0 %v1069_v23  ;;  %v1071_v29 = vld [vmem:[%s277_s28 + $0x8] ss:$16 sps:$4 sm:$0xff]   ;;  %v1082_v39 = vld [vmem:[%s1326_s5] sm:$0xff]   ;;  %v1084_v41 = vld [vmem:[%s1326_s5 + $0x10] sm:$0xff]  }
  0x12   : > { %930 = vmatprep.mubr.msk.bf16.mxu1 %vm516_vm0, %v1073_v25  ;;  %v1083_v40 = vld [vmem:[%s1326_s5 + $0x8] sm:$0xff]   ;;  %v1085_v42 = vld [vmem:[%s1326_s5 + $0x18] sm:$0xff]   ;;  %v1086_v43 = vld [vmem:[%s1326_s5 + $0x20] sm:$0xff]  }
  0x13   : > { %568 = vmatpush1.bf16.msra.mxu1 %v1053_v11  ;;  %v1087_v44 = vld [vmem:[%s1326_s5 + $0x28] sm:$0xff]   ;;  %v900_v47 = vld [vmem:[%s1323_s2] ss:$0 sm:$0xff]  ;;  %v1088_v63 = vld [vmem:[%s1326_s5 + $0x30] sm:$0xff]  }
  0x14   : > { %959 = vmatpush3.bf16.msra.mxu0 %v1054_v12  ;;  %569 = vmatprep.subr.bf16.mxu1 %v1098_v1  ;;  %v1089_v0 = vld [vmem:[%s1326_s5 + $0x38] sm:$0xff]   ;;  %v940_v11 = vld [vmem:[%s1327_s6] ss:$0 sm:$0xff] }
  0x15   : > { %960 = vmatprep.subr.bf16.mxu0 %v1055_v13 }
  0x17   : > { %570 = vmatpush1.bf16.msra.mxu1 %v1056_v14 }
  0x18   : > { %961 = vmatpush3.bf16.msra.mxu0 %v1057_v15  ;;  %571 = vmatprep.subr.bf16.mxu1 %v1098_v1 }
  0x19   : > { %962 = vmatprep.subr.bf16.mxu0 %v1058_v16 }
  0x1b   : > { %572 = vmatpush1.bf16.msra.mxu1 %v1059_v17 }
  0x1c   : > { %963 = vmatpush3.bf16.msra.mxu0 %v1060_v18  ;;  %573 = vmatprep.subr.bf16.mxu1 %v1098_v1 }
  0x1d   : > { %964 = vmatprep.subr.bf16.mxu0 %v1061_v19 }
  0x1f   : > { %574 = vmatpush1.bf16.msra.mxu1 %v1062_v20 }
  0x20   : > { %965 = vmatpush3.bf16.msra.mxu0 %v1063_v21  ;;  %575 = vmatprep.subr.bf16.mxu1 %v1098_v1 }
  0x21   : > { %966 = vmatprep.subr.bf16.mxu0 %v1064_v22 }
  0x23   : > { %576 = vmatpush1.bf16.msra.mxu1 %v1065_v24 }
  0x24   : > { %967 = vmatpush3.bf16.msra.mxu0 %v1066_v26  ;;  %577 = vmatprep.subr.bf16.mxu1 %v1098_v1  ;;  %v931_v1 = vld [vmem:[%s1325_s4] ss:$0 sm:$0xff] }
  0x25   : > { %992 = vmatprep.subr.bf16.mxu0 %v1099_v31 }
  0x27   : > { %553 = vmatmul.mubr.bf16.vlgmr.msra.gmra.mrb[0].mxu0 %v1067_v27  ;;  %578 = vmatpush1.bf16.msra.mxu1 %v1070_v28 }
  0x28   : > { %993 = vmatpush3.bf16.msra.mxu0 %v1074_v30  ;;  %1012 = vmatprep.subr.bf16.mxu1 %v1099_v31 }
  0x29   : > { %994 = vmatprep.subr.bf16.mxu0 %v1099_v31  ;;  %1008 = vmatprep.mubr.msk.bf16.mxu0 %vm1100_vm1, %v1099_v31 }
  0x2a   : > { %594 = vmatmul.mubr.bf16.vlgmr.msra.gmra.mrb[0].mxu1 %v1071_v29 }
  0x2b   : > { %1028 = vmatprep.mubr.msk.bf16.mxu1 %vm1100_vm1, %v1099_v31  ;;  %1013 = vmatpush3.bf16.msra.mxu1 %v1082_v39 }
  0x2c   : > { %995 = vmatpush3.bf16.msra.mxu0 %v1075_v32  ;;  %1014 = vmatprep.subr.bf16.mxu1 %v1099_v31 }
  0x2d   : > { %996 = vmatprep.subr.bf16.mxu0 %v1099_v31 }
  0x2f   : > { %1015 = vmatpush3.bf16.msra.mxu1 %v1083_v40 }
  0x30   : > { %997 = vmatpush3.bf16.msra.mxu0 %v1076_v33  ;;  %1016 = vmatprep.subr.bf16.mxu1 %v1099_v31 }
  0x31   : > { %998 = vmatprep.subr.bf16.mxu0 %v1099_v31 }
  0x33   : > { %1017 = vmatpush3.bf16.msra.mxu1 %v1084_v41 }
  0x34   : > { %999 = vmatpush3.bf16.msra.mxu0 %v1077_v34  ;;  %1018 = vmatprep.subr.bf16.mxu1 %v1099_v31 }
  0x35   : > { %1000 = vmatprep.subr.bf16.mxu0 %v1099_v31 }
  0x37   : > { %1019 = vmatpush3.bf16.msra.mxu1 %v1085_v42 }
  0x38   : > { %1001 = vmatpush3.bf16.msra.mxu0 %v1078_v35  ;;  %1020 = vmatprep.subr.bf16.mxu1 %v1099_v31 }
  0x39   : > { %1002 = vmatprep.subr.bf16.mxu0 %v1099_v31 }
  0x3b   : > { %1021 = vmatpush3.bf16.msra.mxu1 %v1086_v43 }
  0x3c   : > { %1003 = vmatpush3.bf16.msra.mxu0 %v1079_v36  ;;  %1022 = vmatprep.subr.bf16.mxu1 %v1099_v31 }
  0x3d   : > { %1004 = vmatprep.subr.bf16.mxu0 %v1099_v31 }
  0x3f   : > { %1023 = vmatpush3.bf16.msra.mxu1 %v1087_v44 }
  0x40   : > { %1005 = vmatpush3.bf16.msra.mxu0 %v1080_v37  ;;  %1024 = vmatprep.subr.bf16.mxu1 %v1099_v31 }
  0x41   : > { %1006 = vmatprep.subr.bf16.mxu0 %v1099_v31 }
  0x43   : > { %1025 = vmatpush3.bf16.msra.mxu1 %v1088_v63 }
  0x44   : > { %1007 = vmatpush3.bf16.msra.mxu0 %v1081_v38  ;;  %1026 = vmatprep.subr.bf16.mxu1 %v1099_v31 }
  0x47   : > { %1027 = vmatpush3.bf16.msra.mxu1 %v1089_v0 }
  0xfa   : > { %v968_v45 = vpop.f32.mrb[0].mxu0 }
  0xfb   : > { %v969_v46 = vpop.f32.mrb[1].mxu0 }
  0xfc   : > { %v970_v48 = vadd.f32 %v969_v46, %v968_v45  ;;  %v971_v49 = vpop.f32.mrb[2].mxu0 }
  0xfd   : > { %v972_v50 = vpop.f32.mrb[3].mxu0  ;;  %v595_v51 = vpop.f32.mrb[0].mxu1 }
  0xfe   : > { %v973_v52 = vadd.f32 %v972_v50, %v971_v49  ;;  %v555_v53 = vadd.f32 %v970_v48, %v900_v47  ;;  %v597_v54 = vpop.f32.mrb[1].mxu1 }
  0xff   : > { %v598_v55 = vpop.f32.mrb[2].mxu1 }
 0x100   : > { %v596_v56 = vadd.f32 %v595_v51, %v555_v53  ;;  %v558_v57 = vadd.f32 %v973_v52, %v900_v47  ;;  %v600_v58 = vpop.f32.mrb[3].mxu1 }
 0x102   : > { %v599_v59 = vadd.f32 %v598_v55, %v558_v57  ;;  %v602_v60 = vmax.f32 %v596_v56, 0.0 }
 0x104   : > { %v603_v61 = vmax.f32 %v599_v59, 0.0 }
 0x106   : > { %v604_v62 = vpack.c.bf16 %v603_v61, %v602_v60 }
 0x108   : > { %1009 = vmatmul.mubr.bf16.vlgmr.msra.gmra.mrb[4].mxu0 %v604_v62 }
 0x1db   : > { %v710_v2 = vpop.f32.mrb[4].mxu0 }
 0x1dc   : > { %v711_v3 = vadd.f32 %v931_v1, %v710_v2  ;;  %v1010_v4 = vpop.f32.mrb[5].mxu0 }
 0x1dd   : > { %v713_v5 = vpop.f32.mrb[6].mxu0 }
 0x1de   : > { %v714_v6 = vadd.f32 %v931_v1, %v713_v5  ;;  %v1011_v7 = vpop.f32.mrb[7].mxu0  ;;  %v717_v8 = vmax.f32 %v711_v3, 0.0 }
 0x1e0   : > { %v718_v9 = vmax.f32 %v714_v6, 0.0 }
 0x1e2   : > { %v719_v10 = vpack.c.bf16 %v718_v9, %v717_v8 }
 0x1e4   : > { %1029 = vmatmul.mubr.bf16.vlgmr.msra.gmra.mrb[4].mxu1 %v719_v10 }
 0x2b7   : > { %v825_v12 = vpop.f32.mrb[4].mxu1 }
 0x2b8   : > { %v826_v13 = vadd.f32 %v940_v11, %v825_v12  ;;  %v1030_v14 = vpop.f32.mrb[5].mxu1 }
 0x2b9   : > { %v828_v15 = vpop.f32.mrb[6].mxu1 }
 0x2ba   : > { %832 = vst [vmem:[%s283_s14] sm:$0xff] %v826_v13  ;;  %v829_v16 = vadd.f32 %v940_v11, %v828_v15  ;;  %v1031_v17 = vpop.f32.mrb[7].mxu1 }
 0x2bc   : > { %833 = vst [vmem:[%s283_s14 + $0x8] sm:$0xff] %v829_v16 }
 0x2bd PF: > { %s17_s24 = sadd.s32 1, %s1096_s24  }
 0x2be   : > { %p14_p4 = scmp.ge.s32.totalorder %s17_s24, 4  }
 0x2c0   :  { %16 = sbr.rel (!%p14_p4) target bundleno = 1 (0x1), region = 78 }

// kernel: net_forward.4
= control target key start
LH: loop header
LB: loop body
LE: loop exit
PB: predicated region body
PF: predicated region fallthrough
CT: control target
= control target key end

     0   :  { %s4010_s12 = smov 0   ;;  %s5263_s0 = inlined_call_operand.vmem [shape: bf16[256,168], index: 0, kind: input, shape index: {}]   ;;  %s5264_s1 = inlined_call_operand.vmem [shape: bf16[12,168,80], index: 1, kind: input, shape index: {}]   ;;  %s5265_s2 = inlined_call_operand.vmem [shape: f32[1,80], index: 2, kind: input, shape index: {}]   ;;  %s5266_s3 = inlined_call_operand.vmem [shape: bf16[256,80], index: 3, kind: output, shape index: {}]  }
   0x1 LB: > { %s3023_s13 = sadd.s32 4294967295, %s3987_s12   ;;  %p3027_p0 = scmp.ge.s32.totalorder %s3987_s12, 1  ;;  %s3987_s12 = sphi %s4010_s12, %s13_s12  }
   0x2   : > { %p139_p1 = scmp.lt.s32.totalorder %s3987_s12, 3 }
   0x4   : > { %p140_p2 = pnand %p3027_p0, %p139_p1 }
   0x5   : > { %v3809_v0 = vld [vmem:[%s5264_s1 + $0x54] sm:$0xff] (!%p140_p2)   ;;  %v3989_v1 = vmov (!%p140_p2), 0   ;;  %v3811_v3 = vld [vmem:[%s5264_s1 + $0x5c] sm:$0xff] (!%p140_p2)   ;;  %s3028_s22 = sshll.u32 (!%p140_p2), %s3023_s13, 4  ;;  %v3813_v5 = vld [vmem:[%s5264_s1 + $0x64] sm:$0xff] (!%p140_p2)   ;;  %vm505_vm1 = vcmask (!%p140_p2), 326656  }
   0x6   : > { %143 = sbr.rel (%p140_p2) target bundleno = 651 (0x28b), region = 32  ;;  %534 = vmatprep.subr.bf16.mxu0 (!%p140_p2), %v3989_v1  ;;  %1196 = vmatprep.subr.bf16.mxu1 (!%p140_p2), %v3989_v1  ;;  %v3810_v2 = vld [vmem:[%s5264_s1 + $0x150] sm:$0xff] (!%p140_p2)   ;;  %v3812_v4 = vld [vmem:[%s5264_s1 + $0x158] sm:$0xff] (!%p140_p2)   ;;  %v3814_v6 = vld [vmem:[%s5264_s1 + $0x160] sm:$0xff] (!%p140_p2)   ;;  %p165_p3 = scmp.lt.s32.totalorder (!%p140_p2), %s3028_s22, 31  ;;  %vm530_vm2 = vcmask (!%p140_p2), 1043456  }
   0x7   : > { %535 = vmatpush1.bf16.msra.mxu0 (!%p140_p2), %v3809_v0  ;;  %1197 = vmatpush1.bf16.msra.mxu1 (!%p140_p2), %v3810_v2  ;;  %v3815_v7 = vld [vmem:[%s5264_s1 + $0x6c] sm:$0xff] (!%p140_p2)   ;;  %v3817_v9 = vld [vmem:[%s5264_s1 + $0x74] sm:$0xff] (!%p140_p2)   ;;  %v3819_v11 = vld [vmem:[%s5264_s1 + $0x7c] sm:$0xff] (!%p140_p2)   ;;  %vm301_vm0 = vsmask.f32 (!%p140_p2), 7424  ;;  %vm841_vm3 = vcmask (!%p140_p2), 1046528  }
   0x8   : > { %536 = vmatprep.subr.bf16.mxu0 (!%p140_p2), %v3989_v1  ;;  %1198 = vmatprep.subr.bf16.mxu1 (!%p140_p2), %v3989_v1  ;;  %v3816_v8 = vld [vmem:[%s5264_s1 + $0x168] sm:$0xff] (!%p140_p2)   ;;  %v3818_v10 = vld [vmem:[%s5264_s1 + $0x170] sm:$0xff] (!%p140_p2)   ;;  %v3820_v12 = vld [vmem:[%s5264_s1 + $0x178] sm:$0xff] (!%p140_p2)   ;;  %vm2950_vm4 = vcmask (!%p140_p2), 650240  }
   0x9   : > { %v3821_v13 = vld [vmem:[%s5264_s1 + $0x84] sm:$0xff] (!%p140_p2)   ;;  %v3823_v21 = vld [vmem:[%s5264_s1 + $0x8c] sm:$0xff] (!%p140_p2)   ;;  %v3825_v26 = vld [vmem:[%s5264_s1 + $0x94] sm:$0xff] (!%p140_p2)  }
   0xa   : > { %v3822_v15 = vld [vmem:[%s5264_s1 + $0x180] sm:$0xff] (!%p140_p2)   ;;  %v3824_v23 = vld [vmem:[%s5264_s1 + $0x188] sm:$0xff] (!%p140_p2)   ;;  %v3826_v30 = vld [vmem:[%s5264_s1 + $0x190] sm:$0xff] (!%p140_p2)  }
   0xb   : > { %537 = vmatpush1.bf16.msra.mxu0 (!%p140_p2), %v3811_v3  ;;  %1199 = vmatpush1.bf16.msra.mxu1 (!%p140_p2), %v3812_v4  ;;  %v3827_v31 = vld [vmem:[%s5264_s1 + $0x9c] sm:$0xff] (!%p140_p2)   ;;  %v3829_v37 = vld [vmem:[%s5264_s1 + $0xa4] ss:$0 sps:$4 sm:$0xff] (!%p140_p2)   ;;  %v3841_v58 = vld [vmem:[%s5264_s1 + $0x8] sm:$0xff] (!%p140_p2)  }
   0xc   : > { %538 = vmatprep.subr.bf16.mxu0 (!%p140_p2), %v3989_v1  ;;  %1200 = vmatprep.subr.bf16.mxu1 (!%p140_p2), %v3989_v1  ;;  %v3828_v32 = vld [vmem:[%s5264_s1 + $0x198] sm:$0xff] (!%p140_p2)   ;;  %v3830_v38 = vld [vmem:[%s5264_s1 + $0x1a0] ss:$0 sps:$4 sm:$0xff] (!%p140_p2)   ;;  %v532_v44 = vsel (!%p140_p2), %vm530_vm2, %v3829_v37, 0  ;;  %v3843_v61 = vld [vmem:[%s5264_s1 + $0x104] sm:$0xff] (!%p140_p2)  }
   0xd   : > { %s5268_s22 = smov (!%p165_p3, %s3028_s22), 31  ;;  %v1194_v45 = vsel %vm530_vm2, %v3830_v38, 0  ;;  %v3837_v50 = vld [vmem:[%s5264_s1] sm:$0xff]   ;;  %v3844_v4 = vld [vmem:[%s5264_s1 + $0x10] sm:$0xff]  }
   0xe   : > { %s3527_s8 = sshll.u32 %s5268_s22, 3  ;;  %v3838_v51 = vld [vmem:[%s5264_s1 + $0xfc] sm:$0xff]   ;;  %s3032_s18 = sshll.u32 %s5268_s22, 2 }
   0xf   : > { %539 = vmatpush1.bf16.msra.mxu0 %v3813_v5  ;;  %1201 = vmatpush1.bf16.msra.mxu1 %v3814_v6  ;;  %s4071_s16 = scalar_lea.vmem %s5263_s0, %s3527_s8  ;;  %s5170_s21 = scalar_lea.vmem %s5266_s3, %s3032_s18 }
  0x10   : > { %540 = vmatprep.subr.bf16.mxu0 %v3989_v1  ;;  %1202 = vmatprep.subr.bf16.mxu1 %v3989_v1  ;;  %v4078_v14 = vld [vmem:[%s4071_s16 + $0x4] ss:$8 sps:$4 sm:$0xff]   ;;  %v4085_v16 = vld [vmem:[%s4071_s16 + $0x14] ss:$8 sps:$4 sm:$0xff]   ;;  %v4092_v20 = vld [vmem:[%s4071_s16] ss:$8 sps:$4 sm:$0xff]  }
  0x11   : > { %v315_v17 = vshrl.u32 %v4078_v14, 16  ;;  %v317_v18 = vshll.u32 %v4078_v14, 16  ;;  %v322_v19 = vshll.u32 %v4085_v16, 16  ;;  %v4106_v27 = vld [vmem:[%s4071_s16 + $0x10] ss:$8 sps:$4 sm:$0xff]   ;;  %v305_v28 = vshll.u32 %v4092_v20, 16 }
  0x12   : > { %v310_v33 = vshll.u32 %v4106_v27, 16  ;;  %v4129_v34 = vld [vmem:[%s4071_s16 + $0x24] ss:$8 sps:$4 sm:$0xff]   ;;  %v303_v35 = vshrl.u32 %v4092_v20, 16  ;;  %v334_v40 = vshrl.u32 %v4085_v16, 16  ;;  %v326_v52 = vshrl.u32 %v4106_v27, 16 }
  0x13   : > { %541 = vmatpush1.bf16.msra.mxu0 %v3815_v7  ;;  %1203 = vmatpush1.bf16.msra.mxu1 %v3816_v8  ;;  %v319_v22 = vrot.slane %v317_v18, 1  ;;  %v324_v24 = vrot.slane %v322_v19, 1  ;;  %v307_v36 = vrot.slane %v305_v28, 1  ;;  %v338_v41 = vshll.u32 %v4129_v34, 16  ;;  %v4143_v42 = vld [vmem:[%s4071_s16 + $0x20] ss:$8 sps:$4 sm:$0xff]  }
  0x14   : > { %542 = vmatprep.subr.bf16.mxu0 %v3989_v1  ;;  %1204 = vmatprep.subr.bf16.mxu1 %v3989_v1  ;;  %v312_v39 = vrot.slane %v310_v33, 1  ;;  %v4150_v46 = vld [vmem:[%s4071_s16 + $0x34] ss:$8 sps:$4 sm:$0xff]   ;;  %v330_v53 = vshll.u32 %v4143_v42, 16  ;;  %v350_v54 = vshrl.u32 %v4129_v34, 16  ;;  %v342_v5 = vshrl.u32 %v4143_v42, 16 }
  0x15   : > { %v320_v25 = vor.u32 %v319_v22, %v315_v17  ;;  %v308_v43 = vor.u32 %v307_v36, %v303_v35  ;;  %v336_v47 = vor.u32 %v334_v40, %v324_v24  ;;  %v340_v48 = vrot.slane %v338_v41, 1  ;;  %v4168_v56 = vld [vmem:[%s4071_s16 + $0x30] ss:$8 sps:$4 sm:$0xff]   ;;  %v4182_v62 = vld [vmem:[%s4071_s16 + $0x44] ss:$8 sps:$4 sm:$0xff]   ;;  %v3855_v28 = vld [vmem:[%s5264_s1 + $0x11c] sm:$0xff]  }
  0x16   : > { %v354_v55 = vshll.u32 %v4150_v46, 16  ;;  %v328_v59 = vor.u32 %v326_v52, %v312_v39  ;;  %v332_v60 = vrot.slane %v330_v53, 1  ;;  %v346_v2 = vshll.u32 %v4168_v56, 16  ;;  %v3850_v19 = vld [vmem:[%s5264_s1 + $0x114] sm:$0xff]   ;;  %v3858_v36 = vld [vmem:[%s5264_s1 + $0x28] sm:$0xff]  }
  0x17   : > { %543 = vmatpush1.bf16.msra.mxu0 %v3817_v9  ;;  %1205 = vmatpush1.bf16.msra.mxu1 %v3818_v10  ;;  %v4110_v29 = vsel %vm301_vm0, %v320_v25, %v324_v24  ;;  %v4153_v49 = vsel %vm301_vm0, %v308_v43, %v312_v39  ;;  %v4172_v57 = vsel %vm301_vm0, %v336_v47, %v340_v48  ;;  %v366_v6 = vshrl.u32 %v4150_v46, 16  ;;  %v3847_v9 = vld [vmem:[%s5264_s1 + $0x10c] sm:$0xff]   ;;  %v3854_v24 = vld [vmem:[%s5264_s1 + $0x20] sm:$0xff]  }
  0x18   : > { %544 = vmatprep.subr.bf16.mxu0 %v3989_v1  ;;  %1206 = vmatprep.subr.bf16.mxu1 %v3989_v1  ;;  %v352_v63 = vor.u32 %v350_v54, %v340_v48  ;;  %v356_v0 = vrot.slane %v354_v55, 1  ;;  %v4192_v3 = vsel %vm301_vm0, %v328_v59, %v332_v60  ;;  %v370_v7 = vshll.u32 %v4182_v62, 16  ;;  %v4259_v38 = vld [vmem:[%s4071_s16 + $0x64] ss:$8 sps:$4 sm:$0xff]   ;;  %v4286_v52 = vld [vmem:[%s4071_s16 + $0x60] ss:$8 sps:$4 sm:$0xff]  }
  0x19   : > { %3081 = vmatprep.mubr.msk.bf16.mxu0 %vm505_vm1, %v4110_v29  ;;  %3201 = vmatprep.mubr.msk.bf16.mxu1 %vm505_vm1, %v4110_v29  ;;  %v348_v10 = vrot.slane %v346_v2, 1  ;;  %v3860_v40 = vld [vmem:[%s5264_s1 + $0x124] sm:$0xff]   ;;  %v402_v48 = vshll.u32 %v4259_v38, 16  ;;  %v4292_v54 = vld [vmem:[%s4071_s16 + $0x74] ss:$8 sps:$4 sm:$0xff]   ;;  %v414_v2 = vshrl.u32 %v4259_v38, 16 }
  0x1a   : > { %v4203_v8 = vsel %vm301_vm0, %v352_v63, %v356_v0  ;;  %v368_v17 = vor.u32 %v366_v6, %v356_v0  ;;  %v372_v18 = vrot.slane %v370_v7, 1  ;;  %v3866_v59 = vld [vmem:[%s5264_s1 + $0x38] sm:$0xff]   ;;  %v394_v0 = vshll.u32 %v4286_v52, 16  ;;  %v3871_v6 = vld [vmem:[%s5264_s1 + $0x40] sm:$0xff]  }
  0x1b   : > { %545 = vmatpush1.bf16.msra.mxu0 %v3819_v11  ;;  %1207 = vmatpush1.bf16.msra.mxu1 %v3820_v12  ;;  %v3849_v11 = vld [vmem:[%s5264_s1 + $0x18] sm:$0xff]   ;;  %v4213_v12 = vld [vmem:[%s4071_s16 + $0x40] ss:$8 sps:$4 sm:$0xff]  }
  0x1c   : > { %546 = vmatprep.subr.bf16.mxu0 %v3989_v1  ;;  %1208 = vmatprep.subr.bf16.mxu1 %v3989_v1  ;;  %v362_v22 = vshll.u32 %v4213_v12, 16  ;;  %v374_v43 = vshrl.u32 %v4213_v12, 16  ;;  %v3872_v7 = vld [vmem:[%s5264_s1 + $0x13c] sm:$0xff]  }
  0x1f   : > { %547 = vmatpush1.bf16.msra.mxu0 %v3821_v13  ;;  %1209 = vmatpush1.bf16.msra.mxu1 %v3822_v15  ;;  %v344_v13 = vor.u32 %v342_v5, %v332_v60  ;;  %v4217_v15 = vld [vmem:[%s4071_s16 + $0x54] ss:$8 sps:$4 sm:$0xff]   ;;  %v418_v5 = vshll.u32 %v4292_v54, 16 }
  0x20   : > { %548 = vmatprep.subr.bf16.mxu0 %v3989_v1  ;;  %1210 = vmatprep.subr.bf16.mxu1 %v3989_v1  ;;  %v386_v25 = vshll.u32 %v4217_v15, 16  ;;  %v398_v47 = vshrl.u32 %v4217_v15, 16  ;;  %v3867_v60 = vld [vmem:[%s5264_s1 + $0x134] sm:$0xff]  }
  0x22   : > { %v388_v35 = vrot.slane %v386_v25, 1  ;;  %v406_v25 = vshrl.u32 %v4286_v52, 16 }
  0x23   : > { %549 = vmatpush1.bf16.msra.mxu0 %v3823_v21  ;;  %1211 = vmatpush1.bf16.msra.mxu1 %v3824_v23  ;;  %v358_v21 = vshrl.u32 %v4168_v56, 16  ;;  %v4231_v23 = vsel %vm301_vm0, %v344_v13, %v348_v10  ;;  %v3873_v13 = vld [vmem:[%s5264_s1 + $0x48] sm:$0xff]  }
  0x24   : > { %550 = vmatprep.subr.bf16.mxu0 %v3989_v1  ;;  %1212 = vmatprep.subr.bf16.mxu1 %v3989_v1  ;;  %v400_v55 = vor.u32 %v398_v47, %v388_v35 }
  0x25   : > { %v360_v33 = vor.u32 %v358_v21, %v348_v10  ;;  %v3875_v21 = vld [vmem:[%s5264_s1 + $0x50] ss:$0 sps:$4 sm:$0xff]  }
  0x27   : > { %551 = vmatpush1.bf16.msra.mxu0 %v3825_v26  ;;  %1213 = vmatpush1.bf16.msra.mxu1 %v3826_v30  ;;  %v4238_v26 = vsel %vm301_vm0, %v368_v17, %v372_v18  ;;  %v382_v30 = vshrl.u32 %v4182_v62, 16 }
  0x28   : > { %552 = vmatprep.subr.bf16.mxu0 %v3989_v1  ;;  %1214 = vmatprep.subr.bf16.mxu1 %v3989_v1 }
  0x29   : > { %v384_v37 = vor.u32 %v382_v30, %v372_v18  ;;  %v420_v18 = vrot.slane %v418_v5, 1  ;;  %v3891_v5 = vld [vmem:[%s5264_s1 + $0xe0] sm:$0xff]  }
  0x2b   : > { %553 = vmatpush1.bf16.msra.mxu0 %v3827_v31  ;;  %1215 = vmatpush1.bf16.msra.mxu1 %v3828_v32  ;;  %v4246_v31 = vld [vmem:[%s4071_s16 + $0x50] ss:$8 sps:$4 sm:$0xff]   ;;  %v364_v32 = vrot.slane %v362_v22, 1  ;;  %v3876_v22 = vld [vmem:[%s5264_s1 + $0x14c] ss:$0 sps:$4 sm:$0xff]  }
  0x2c   : > { %554 = vmatprep.subr.bf16.mxu0 %v3989_v1  ;;  %1216 = vmatprep.subr.bf16.mxu1 %v3989_v1  ;;  %v378_v39 = vshll.u32 %v4246_v31, 16 }
  0x2d   : > { %v4268_v41 = vsel %vm301_vm0, %v360_v33, %v364_v32  ;;  %v376_v53 = vor.u32 %v374_v43, %v364_v32  ;;  %v430_v32 = vshrl.u32 %v4292_v54, 16  ;;  %v719_v33 = vsel %vm530_vm2, %v3875_v21, 0 }
  0x2f   : > { %555 = vmatpush1.bf16.msra.mxu0 %v532_v44  ;;  %1217 = vmatpush1.bf16.msra.mxu1 %v1194_v45  ;;  %v3861_v44 = vld [vmem:[%s5264_s1 + $0x30] sm:$0xff]   ;;  %v4275_v45 = vsel %vm301_vm0, %v384_v37, %v388_v35  ;;  %v1357_v35 = vsel %vm530_vm2, %v3876_v22, 0  ;;  %v4526_v22 = vld [vmem:[%s4071_s16 + $0x4] ss:$8 sps:$4 sm:$0xff]  }
  0x30   : > { %721 = vmatprep.subr.bf16.mxu0 %v3989_v1  ;;  %1359 = vmatprep.subr.bf16.mxu1 %v3989_v1 }
  0x32   : > { %567 = vmatmul.mubr.bf16.vlgmr.msra.gmra.mrb[0].mxu0 %v4153_v49  ;;  %1229 = vmatmul.mubr.bf16.vlgmr.msra.gmra.mrb[0].mxu1 %v4153_v49 }
  0x33   : > { %722 = vmatpush1.bf16.msra.mxu0 %v3837_v50  ;;  %1360 = vmatpush1.bf16.msra.mxu1 %v3838_v51  ;;  %v380_v50 = vrot.slane %v378_v39, 1  ;;  %v3862_v51 = vld [vmem:[%s5264_s1 + $0x12c] sm:$0xff]   ;;  %v4365_v39 = vrot.slane %v3989_v1, 1 }
  0x34   : > { %723 = vmatprep.subr.bf16.mxu0 %v3989_v1  ;;  %3082 = vmatprep.mubr.msk.bf16.mxu0 %vm505_vm1, %v4172_v57 }
  0x35   : > { %3202 = vmatprep.mubr.msk.bf16.mxu1 %vm505_vm1, %v4172_v57  ;;  %1361 = vmatprep.subr.bf16.mxu1 %v3989_v1  ;;  %v4306_v63 = vsel %vm301_vm0, %v376_v53, %v380_v50  ;;  %v3878_v53 = vld [vmem:[%s5264_s1 + $0x1a4] sm:$0xff]  }
  0x37   : > { %724 = vmatpush1.bf16.msra.mxu0 %v3841_v58  ;;  %1362 = vmatpush1.bf16.msra.mxu1 %v3843_v61  ;;  %v404_v58 = vrot.slane %v402_v48, 1  ;;  %v390_v61 = vshrl.u32 %v4246_v31, 16 }
  0x38   : > { %725 = vmatprep.subr.bf16.mxu0 %v3989_v1  ;;  %1363 = vmatprep.subr.bf16.mxu1 %v3989_v1 }
  0x39   : > { %v392_v10 = vor.u32 %v390_v61, %v380_v50  ;;  %v416_v17 = vor.u32 %v414_v2, %v404_v58  ;;  %v3888_v61 = vld [vmem:[%s5264_s1 + $0x1cc] sm:$0xff]   ;;  %v3890_v2 = vld [vmem:[%s5264_s1 + $0x1d4] sm:$0xff]  }
  0x3a   : > { %575 = vmatmul.mubr.bf16.gmra.mrb[4].mxu0 %v4192_v3  ;;  %1237 = vmatmul.mubr.bf16.gmra.mrb[4].mxu1 %v4192_v3 }
  0x3b   : > { %726 = vmatpush1.bf16.msra.mxu0 %v3844_v4  ;;  %3083 = vmatprep.mubr.msk.bf16.mxu0 %vm505_vm1, %v4203_v8  ;;  %v4311_v4 = vsel %vm301_vm0, %v400_v55, %v404_v58  ;;  %v4351_v30 = vsel %vm301_vm0, %v416_v17, %v420_v18  ;;  %v3879_v55 = vld [vmem:[%s5264_s1 + $0xb0] sm:$0xff]   ;;  %v3897_v17 = vld [vmem:[%s5264_s1 + $0xf8] ss:$0 sps:$4 sm:$0xff]  }
  0x3c   : > { %3203 = vmatprep.mubr.msk.bf16.mxu1 %vm505_vm1, %v4203_v8  ;;  %1364 = vmatpush1.bf16.msra.mxu1 %v3847_v9  ;;  %v4323_v9 = vld [vmem:[%s4071_s16 + $0x70] ss:$8 sps:$4 sm:$0xff]  }
  0x3d   : > { %727 = vmatprep.subr.bf16.mxu0 %v3989_v1  ;;  %1365 = vmatprep.subr.bf16.mxu1 %v3989_v1  ;;  %v3882_v58 = vld [vmem:[%s5264_s1 + $0x1b4] sm:$0xff]  }
  0x3f   : > { %728 = vmatpush1.bf16.msra.mxu0 %v3849_v11  ;;  %v396_v11 = vrot.slane %v394_v0, 1  ;;  %v3889_v0 = vld [vmem:[%s5264_s1 + $0xd8] sm:$0xff]  }
  0x40   : > { %729 = vmatprep.subr.bf16.mxu0 %v3989_v1  ;;  %1366 = vmatpush1.bf16.msra.mxu1 %v3850_v19  ;;  %v3874_v19 = vld [vmem:[%s5264_s1 + $0x144] sm:$0xff]  }
  0x41   : > { %1367 = vmatprep.subr.bf16.mxu1 %v3989_v1 }
  0x42   : > { %583 = vmatmul.mubr.bf16.gmra.mrb[8].mxu0 %v4231_v23  ;;  %1245 = vmatmul.mubr.bf16.gmra.mrb[8].mxu1 %v4231_v23 }
  0x43   : > { %3084 = vmatprep.mubr.msk.bf16.mxu0 %vm505_vm1, %v4238_v26  ;;  %3204 = vmatprep.mubr.msk.bf16.mxu1 %vm505_vm1, %v4238_v26 }
  0x44   : > { %730 = vmatpush1.bf16.msra.mxu0 %v3854_v24  ;;  %1368 = vmatpush1.bf16.msra.mxu1 %v3855_v28  ;;  %v4346_v24 = vsel %vm301_vm0, %v392_v10, %v396_v11  ;;  %v410_v28 = vshll.u32 %v4323_v9, 16  ;;  %v3894_v10 = vld [vmem:[%s5264_s1 + $0x1e4] sm:$0xff]  }
  0x45   : > { %731 = vmatprep.subr.bf16.mxu0 %v3989_v1  ;;  %1369 = vmatprep.subr.bf16.mxu1 %v3989_v1 }
  0x46   : > { %v412_v37 = vrot.slane %v410_v28, 1  ;;  %v4530_v28 = vld [vmem:[%s4071_s16 + $0x14] ss:$8 sps:$4 sm:$0xff]  }
  0x48   : > { %732 = vmatpush1.bf16.msra.mxu0 %v3858_v36  ;;  %1370 = vmatpush1.bf16.msra.mxu1 %v3860_v40  ;;  %v408_v36 = vor.u32 %v406_v25, %v396_v11  ;;  %v432_v40 = vor.u32 %v430_v32, %v420_v18  ;;  %v3895_v11 = vld [vmem:[%s5264_s1 + $0xf0] sm:$0xff]   ;;  %v845_v25 = vrot.slane %v4526_v22, 1  ;;  %v846_v32 = vrot.slane %v4530_v28, 1 }
  0x49   : > { %733 = vmatprep.subr.bf16.mxu0 %v3989_v1  ;;  %1371 = vmatprep.subr.bf16.mxu1 %v3989_v1  ;;  %v3898_v18 = vld [vmem:[%s5264_s1 + $0x1f4] ss:$0 sps:$4 sm:$0xff]  }
  0x4a   : > { %591 = vmatmul.mubr.bf16.gmra.mrb[12].mxu0 %v4268_v41  ;;  %1253 = vmatmul.mubr.bf16.gmra.mrb[12].mxu1 %v4268_v41  ;;  %v4370_v43 = vsel %vm301_vm0, %v408_v36, %v412_v37  ;;  %v4375_v47 = vsel %vm301_vm0, %v432_v40, %v4365_v39  ;;  %v1542_v21 = vsel %vm530_vm2, %v3898_v18, 0  ;;  %v3912_v18 = vld [vmem:[%s5264_s1 + $0x378] sm:$0xff]  }
  0x4b   : > { %3085 = vmatprep.mubr.msk.bf16.mxu0 %vm505_vm1, %v4275_v45  ;;  %3205 = vmatprep.mubr.msk.bf16.mxu1 %vm505_vm1, %v4275_v45 }
  0x4c   : > { %734 = vmatpush1.bf16.msra.mxu0 %v3861_v44  ;;  %1372 = vmatpush1.bf16.msra.mxu1 %v3862_v51  ;;  %v422_v44 = vshrl.u32 %v4323_v9, 16  ;;  %v3877_v51 = vld [vmem:[%s5264_s1 + $0xa8] sm:$0xff]  }
  0x4d   : > { %735 = vmatprep.subr.bf16.mxu0 %v3989_v1  ;;  %1373 = vmatprep.subr.bf16.mxu1 %v3989_v1 }
  0x4e   : > { %v424_v48 = vor.u32 %v422_v44, %v412_v37  ;;  %v4545_v37 = vld [vmem:[%s4071_s16 + $0x10] ss:$8 sps:$4 sm:$0xff]   ;;  %v4551_v44 = vld [vmem:[%s4071_s16 + $0x24] ss:$8 sps:$4 sm:$0xff]  }
  0x4f   : > { %v843_v40 = vrot.slane %v4545_v37, 1 }
  0x50   : > { %736 = vmatpush1.bf16.msra.mxu0 %v3866_v59  ;;  %1374 = vmatpush1.bf16.msra.mxu1 %v3867_v60  ;;  %v4385_v50 = vsel %vm301_vm0, %v424_v48, %v4365_v39  ;;  %v3884_v59 = vld [vmem:[%s5264_s1 + $0x1bc] sm:$0xff]   ;;  %v3886_v60 = vld [vmem:[%s5264_s1 + $0x1c4] sm:$0xff]   ;;  %v850_v48 = vrot.slane %v4551_v44, 1 }
  0x51   : > { %737 = vmatprep.subr.bf16.mxu0 %v3989_v1  ;;  %1375 = vmatprep.subr.bf16.mxu1 %v3989_v1 }
  0x52   : > { %599 = vmatmul.mubr.bf16.gmra.mrb[16].mxu0 %v4306_v63  ;;  %1261 = vmatmul.mubr.bf16.gmra.mrb[16].mxu1 %v4306_v63 }
  0x53   : > { %3086 = vmatprep.mubr.msk.bf16.mxu0 %vm505_vm1, %v4311_v4  ;;  %3206 = vmatprep.mubr.msk.bf16.mxu1 %vm505_vm1, %v4311_v4 }
  0x54   : > { %738 = vmatpush1.bf16.msra.mxu0 %v3871_v6  ;;  %1376 = vmatpush1.bf16.msra.mxu1 %v3872_v7  ;;  %v3892_v6 = vld [vmem:[%s5264_s1 + $0x1dc] sm:$0xff]   ;;  %v3893_v7 = vld [vmem:[%s5264_s1 + $0xe8] sm:$0xff]  }
  0x55   : > { %739 = vmatprep.subr.bf16.mxu0 %v3989_v1  ;;  %1377 = vmatprep.subr.bf16.mxu1 %v3989_v1 }
  0x58   : > { %740 = vmatpush1.bf16.msra.mxu0 %v3873_v13  ;;  %1378 = vmatpush1.bf16.msra.mxu1 %v3874_v19  ;;  %v3896_v13 = vld [vmem:[%s5264_s1 + $0x1ec] sm:$0xff]   ;;  %v971_v19 = vsel %vm530_vm2, %v3897_v17, 0 }
  0x59   : > { %741 = vmatprep.subr.bf16.mxu0 %v3989_v1  ;;  %1379 = vmatprep.subr.bf16.mxu1 %v3989_v1 }
  0x5a   : > { %607 = vmatmul.mubr.bf16.gmra.mrb[20].mxu0 %v4346_v24  ;;  %1269 = vmatmul.mubr.bf16.gmra.mrb[20].mxu1 %v4346_v24 }
  0x5b   : > { %3087 = vmatprep.mubr.msk.bf16.mxu0 %vm505_vm1, %v4351_v30  ;;  %3207 = vmatprep.mubr.msk.bf16.mxu1 %vm505_vm1, %v4351_v30 }
  0x5c   : > { %742 = vmatpush1.bf16.msra.mxu0 %v719_v33  ;;  %1380 = vmatpush1.bf16.msra.mxu1 %v1357_v35  ;;  %v4534_v33 = vsel %vm841_vm3, %v845_v25, %v846_v32  ;;  %v4541_v35 = vld [vmem:[%s4071_s16] ss:$8 sps:$4 sm:$0xff]  }
  0x5d   : > { %973 = vmatprep.subr.bf16.mxu0 %v3989_v1  ;;  %1544 = vmatprep.subr.bf16.mxu1 %v3989_v1  ;;  %v842_v36 = vrot.slane %v4541_v35, 1  ;;  %v3913_v25 = vld [vmem:[%s5264_s1 + $0x284] sm:$0xff]  }
  0x62   : > { %615 = vmatmul.mubr.bf16.gmra.mrb[24].mxu0 %v4370_v43  ;;  %1277 = vmatmul.mubr.bf16.gmra.mrb[24].mxu1 %v4370_v43 }
  0x63   : > { %3088 = vmatprep.mubr.msk.bf16.mxu0 %vm505_vm1, %v4375_v47  ;;  %3208 = vmatprep.mubr.msk.bf16.mxu1 %vm505_vm1, %v4375_v47 }
  0x6a   : > { %623 = vmatmul.mubr.bf16.gmra.mrb[28].mxu0 %v4385_v50  ;;  %1285 = vmatmul.mubr.bf16.gmra.mrb[28].mxu1 %v4385_v50 }
  0x6b   : > { %3100 = vmatprep.mubr.msk.bf16.mxu0 %vm505_vm1, %v4078_v14  ;;  %3220 = vmatprep.mubr.msk.bf16.mxu1 %vm505_vm1, %v4078_v14  ;;  %v3880_v14 = vld [vmem:[%s5264_s1 + $0x1ac] sm:$0xff]  }
  0x72   : > { %754 = vmatmul.mubr.bf16.vlgmr.msra.gmra.mrb[0].mxu0 %v4092_v20  ;;  %1392 = vmatmul.mubr.bf16.vlgmr.msra.gmra.mrb[0].mxu1 %v4092_v20  ;;  %v3881_v20 = vld [vmem:[%s5264_s1 + $0xb8] sm:$0xff]  }
  0x73   : > { %974 = vmatpush1.bf16.msra.mxu0 %v3877_v51  ;;  %1545 = vmatpush1.bf16.msra.mxu1 %v3878_v53  ;;  %v4555_v51 = vsel %vm841_vm3, %v842_v36, %v843_v40  ;;  %v3899_v53 = vld [vmem:[%s5264_s1 + $0x24c] sm:$0xff]  }
  0x74   : > { %975 = vmatprep.subr.bf16.mxu0 %v3989_v1  ;;  %3101 = vmatprep.mubr.msk.bf16.mxu0 %vm505_vm1, %v4085_v16 }
  0x75   : > { %3221 = vmatprep.mubr.msk.bf16.mxu1 %vm505_vm1, %v4085_v16  ;;  %1546 = vmatprep.subr.bf16.mxu1 %v3989_v1  ;;  %v3883_v16 = vld [vmem:[%s5264_s1 + $0xc0] sm:$0xff]  }
  0x77   : > { %976 = vmatpush1.bf16.msra.mxu0 %v3879_v55  ;;  %1547 = vmatpush1.bf16.msra.mxu1 %v3880_v14  ;;  %v3900_v55 = vld [vmem:[%s5264_s1 + $0x348] sm:$0xff]   ;;  %v4565_v14 = vsel %vm841_vm3, %v846_v32, %v850_v48  ;;  %v3914_v32 = vld [vmem:[%s5264_s1 + $0x380] sm:$0xff]  }
  0x78   : > { %977 = vmatprep.subr.bf16.mxu0 %v3989_v1  ;;  %1548 = vmatprep.subr.bf16.mxu1 %v3989_v1 }
  0x7a   : > { %762 = vmatmul.mubr.bf16.gmra.mrb[4].mxu0 %v4106_v27  ;;  %1400 = vmatmul.mubr.bf16.gmra.mrb[4].mxu1 %v4106_v27  ;;  %v3885_v27 = vld [vmem:[%s5264_s1 + $0xc8] sm:$0xff]  }
  0x7b   : > { %978 = vmatpush1.bf16.msra.mxu0 %v3881_v20  ;;  %3102 = vmatprep.mubr.msk.bf16.mxu0 %vm505_vm1, %v4129_v34  ;;  %v3901_v20 = vld [vmem:[%s5264_s1 + $0x254] sm:$0xff]  }
  0x7c   : > { %3222 = vmatprep.mubr.msk.bf16.mxu1 %vm505_vm1, %v4129_v34  ;;  %1549 = vmatpush1.bf16.msra.mxu1 %v3882_v58  ;;  %v3887_v34 = vld [vmem:[%s5264_s1 + $0xd0] sm:$0xff]   ;;  %v848_v58 = vrot.slane %v4143_v42, 1 }
  0x7d   : > { %979 = vmatprep.subr.bf16.mxu0 %v3989_v1  ;;  %1550 = vmatprep.subr.bf16.mxu1 %v3989_v1 }
  0x7f   : > { %980 = vmatpush1.bf16.msra.mxu0 %v3883_v16  ;;  %v3902_v16 = vld [vmem:[%s5264_s1 + $0x350] sm:$0xff]  }
  0x80   : > { %981 = vmatprep.subr.bf16.mxu0 %v3989_v1  ;;  %1551 = vmatpush1.bf16.msra.mxu1 %v3884_v59  ;;  %v854_v59 = vrot.slane %v4150_v46, 1 }
  0x81   : > { %1552 = vmatprep.subr.bf16.mxu1 %v3989_v1 }
  0x82   : > { %770 = vmatmul.mubr.bf16.gmra.mrb[8].mxu0 %v4143_v42  ;;  %1408 = vmatmul.mubr.bf16.gmra.mrb[8].mxu1 %v4143_v42  ;;  %v4583_v42 = vsel %vm841_vm3, %v843_v40, %v848_v58  ;;  %v3916_v40 = vld [vmem:[%s5264_s1 + $0x388] sm:$0xff]  }
  0x83   : > { %3103 = vmatprep.mubr.msk.bf16.mxu0 %vm505_vm1, %v4150_v46  ;;  %3223 = vmatprep.mubr.msk.bf16.mxu1 %vm505_vm1, %v4150_v46  ;;  %v3904_v46 = vld [vmem:[%s5264_s1 + $0x358] sm:$0xff]  }
  0x84   : > { %982 = vmatpush1.bf16.msra.mxu0 %v3885_v27  ;;  %1553 = vmatpush1.bf16.msra.mxu1 %v3886_v60  ;;  %v3903_v27 = vld [vmem:[%s5264_s1 + $0x25c] sm:$0xff]   ;;  %v4591_v60 = vsel %vm841_vm3, %v850_v48, %v854_v59  ;;  %v864_v48 = vrot.slane %v4286_v52, 1 }
  0x85   : > { %983 = vmatprep.subr.bf16.mxu0 %v3989_v1  ;;  %1554 = vmatprep.subr.bf16.mxu1 %v3989_v1 }
  0x88   : > { %984 = vmatpush1.bf16.msra.mxu0 %v3887_v34  ;;  %1555 = vmatpush1.bf16.msra.mxu1 %v3888_v61  ;;  %v852_v34 = vrot.slane %v4168_v56, 1  ;;  %v3905_v61 = vld [vmem:[%s5264_s1 + $0x264] sm:$0xff]  }
  0x89   : > { %985 = vmatprep.subr.bf16.mxu0 %v3989_v1  ;;  %1556 = vmatprep.subr.bf16.mxu1 %v3989_v1 }
  0x8a   : > { %778 = vmatmul.mubr.bf16.gmra.mrb[12].mxu0 %v4168_v56  ;;  %1416 = vmatmul.mubr.bf16.gmra.mrb[12].mxu1 %v4168_v56  ;;  %v4613_v56 = vsel %vm841_vm3, %v848_v58, %v852_v34 }
  0x8b   : > { %3104 = vmatprep.mubr.msk.bf16.mxu0 %vm505_vm1, %v4182_v62  ;;  %3224 = vmatprep.mubr.msk.bf16.mxu1 %vm505_vm1, %v4182_v62 }
  0x8c   : > { %986 = vmatpush1.bf16.msra.mxu0 %v3889_v0  ;;  %1557 = vmatpush1.bf16.msra.mxu1 %v3890_v2  ;;  %v858_v0 = vrot.slane %v4182_v62, 1  ;;  %v3906_v2 = vld [vmem:[%s5264_s1 + $0x360] sm:$0xff]   ;;  %v3907_v62 = vld [vmem:[%s5264_s1 + $0x26c] sm:$0xff]  }
  0x8d   : > { %987 = vmatprep.subr.bf16.mxu0 %v3989_v1  ;;  %1558 = vmatprep.subr.bf16.mxu1 %v3989_v1 }
  0x90   : > { %988 = vmatpush1.bf16.msra.mxu0 %v3891_v5  ;;  %1559 = vmatpush1.bf16.msra.mxu1 %v3892_v6  ;;  %v4616_v5 = vsel %vm841_vm3, %v854_v59, %v858_v0  ;;  %v3908_v6 = vld [vmem:[%s5264_s1 + $0x368] sm:$0xff]  }
  0x91   : > { %989 = vmatprep.subr.bf16.mxu0 %v3989_v1  ;;  %1560 = vmatprep.subr.bf16.mxu1 %v3989_v1 }
  0x92   : > { %786 = vmatmul.mubr.bf16.gmra.mrb[16].mxu0 %v4213_v12  ;;  %1424 = vmatmul.mubr.bf16.gmra.mrb[16].mxu1 %v4213_v12 }
  0x93   : > { %3105 = vmatprep.mubr.msk.bf16.mxu0 %vm505_vm1, %v4217_v15  ;;  %3225 = vmatprep.mubr.msk.bf16.mxu1 %vm505_vm1, %v4217_v15 }
  0x94   : > { %990 = vmatpush1.bf16.msra.mxu0 %v3893_v7  ;;  %1561 = vmatpush1.bf16.msra.mxu1 %v3894_v10  ;;  %v856_v7 = vrot.slane %v4213_v12, 1  ;;  %v862_v10 = vrot.slane %v4217_v15, 1  ;;  %v3911_v15 = vld [vmem:[%s5264_s1 + $0x27c] sm:$0xff]  }
  0x95   : > { %991 = vmatprep.subr.bf16.mxu0 %v3989_v1  ;;  %1562 = vmatprep.subr.bf16.mxu1 %v3989_v1 }
  0x96   : > { %v4643_v12 = vsel %vm841_vm3, %v852_v34, %v856_v7  ;;  %v4646_v17 = vsel %vm841_vm3, %v858_v0, %v862_v10  ;;  %v3921_v0 = vld [vmem:[%s5264_s1 + $0x1f8] sm:$0xff]  }
  0x98   : > { %992 = vmatpush1.bf16.msra.mxu0 %v3895_v11  ;;  %1563 = vmatpush1.bf16.msra.mxu1 %v3896_v13  ;;  %v3909_v11 = vld [vmem:[%s5264_s1 + $0x274] sm:$0xff]  }
  0x99   : > { %993 = vmatprep.subr.bf16.mxu0 %v3989_v1  ;;  %1564 = vmatprep.subr.bf16.mxu1 %v3989_v1  ;;  %v3910_v13 = vld [vmem:[%s5264_s1 + $0x370] sm:$0xff]  }
  0x9a   : > { %794 = vmatmul.mubr.bf16.gmra.mrb[20].mxu0 %v4246_v31  ;;  %1432 = vmatmul.mubr.bf16.gmra.mrb[20].mxu1 %v4246_v31 }
  0x9b   : > { %3106 = vmatprep.mubr.msk.bf16.mxu0 %vm505_vm1, %v4259_v38  ;;  %3226 = vmatprep.mubr.msk.bf16.mxu1 %vm505_vm1, %v4259_v38 }
  0x9c   : > { %994 = vmatpush1.bf16.msra.mxu0 %v971_v19  ;;  %1565 = vmatpush1.bf16.msra.mxu1 %v1542_v21  ;;  %v860_v19 = vrot.slane %v4246_v31, 1  ;;  %v866_v21 = vrot.slane %v4259_v38, 1  ;;  %v3915_v38 = vld [vmem:[%s5264_s1 + $0x28c] sm:$0xff]  }
  0x9d   : > { %1783 = vmatprep.subr.bf16.mxu0 %v3989_v1  ;;  %2370 = vmatprep.subr.bf16.mxu1 %v3989_v1 }
  0x9e   : > { %v4673_v31 = vsel %vm841_vm3, %v856_v7, %v860_v19  ;;  %v4676_v36 = vsel %vm841_vm3, %v862_v10, %v866_v21  ;;  %v4709_v58 = vsel %vm841_vm3, %v860_v19, %v864_v48  ;;  %v3931_v7 = vld [vmem:[%s5264_s1 + $0x220] sm:$0xff]  }
  0x9f   : > { %v3932_v10 = vld [vmem:[%s5264_s1 + $0x31c] sm:$0xff]  }
  0xa2   : > { %802 = vmatmul.mubr.bf16.gmra.mrb[24].mxu0 %v4286_v52  ;;  %1440 = vmatmul.mubr.bf16.gmra.mrb[24].mxu1 %v4286_v52  ;;  %v3919_v52 = vld [vmem:[%s5264_s1 + $0x29c] ss:$0 sps:$4 sm:$0xff]  }
  0xa3   : > { %3107 = vmatprep.mubr.msk.bf16.mxu0 %vm505_vm1, %v4292_v54  ;;  %3227 = vmatprep.mubr.msk.bf16.mxu1 %vm505_vm1, %v4292_v54  ;;  %v1781_v59 = vsel %vm530_vm2, %v3919_v52, 0  ;;  %v3957_v52 = vld [vmem:[%s5264_s1 + $0x2d8] sm:$0xff]  }
  0xaa   : > { %810 = vmatmul.mubr.bf16.gmra.mrb[28].mxu0 %v4323_v9  ;;  %1448 = vmatmul.mubr.bf16.gmra.mrb[28].mxu1 %v4323_v9 }
  0xab   : > { %3140 = vmatprep.mubr.msk.bf16.mxu0 %vm505_vm1, %v4534_v33  ;;  %3260 = vmatprep.mubr.msk.bf16.mxu1 %vm505_vm1, %v4534_v33 }
  0xb2   : > { %1006 = vmatmul.mubr.bf16.vlgmr.msra.gmra.mrb[0].mxu0 %v4555_v51  ;;  %1577 = vmatmul.mubr.bf16.vlgmr.msra.gmra.mrb[0].mxu1 %v4555_v51 }
  0xb3   : > { %1784 = vmatpush1.bf16.msra.mxu0 %v3899_v53  ;;  %2371 = vmatpush1.bf16.msra.mxu1 %v3900_v55  ;;  %v870_v53 = vrot.slane %v4292_v54, 1  ;;  %v3917_v55 = vld [vmem:[%s5264_s1 + $0x294] sm:$0xff]  }
  0xb4   : > { %1785 = vmatprep.subr.bf16.mxu0 %v3989_v1  ;;  %3141 = vmatprep.mubr.msk.bf16.mxu0 %vm505_vm1, %v4565_v14  ;;  %v3920_v54 = vld [vmem:[%s5264_s1 + $0x398] ss:$0 sps:$4 sm:$0xff]  }
  0xb5   : > { %3261 = vmatprep.mubr.msk.bf16.mxu1 %vm505_vm1, %v4565_v14  ;;  %2372 = vmatprep.subr.bf16.mxu1 %v3989_v1 }
  0xb7   : > { %1786 = vmatpush1.bf16.msra.mxu0 %v3901_v20  ;;  %2373 = vmatpush1.bf16.msra.mxu1 %v3902_v16  ;;  %v3918_v20 = vld [vmem:[%s5264_s1 + $0x390] sm:$0xff]   ;;  %v4712_v16 = vsel %vm841_vm3, %v866_v21, %v870_v53 }
  0xb8   : > { %1787 = vmatprep.subr.bf16.mxu0 %v3989_v1  ;;  %2374 = vmatprep.subr.bf16.mxu1 %v3989_v1 }
  0xba   : > { %1014 = vmatmul.mubr.bf16.gmra.mrb[4].mxu0 %v4583_v42  ;;  %1585 = vmatmul.mubr.bf16.gmra.mrb[4].mxu1 %v4583_v42 }
  0xbb   : > { %1788 = vmatpush1.bf16.msra.mxu0 %v3903_v27  ;;  %3142 = vmatprep.mubr.msk.bf16.mxu0 %vm505_vm1, %v4591_v60  ;;  %v2368_v27 = vsel %vm530_vm2, %v3920_v54, 0  ;;  %v3958_v54 = vld [vmem:[%s5264_s1 + $0x3d4] sm:$0xff]  }
  0xbc   : > { %3262 = vmatprep.mubr.msk.bf16.mxu1 %vm505_vm1, %v4591_v60  ;;  %2375 = vmatpush1.bf16.msra.mxu1 %v3904_v46  ;;  %v868_v46 = vrot.slane %v4323_v9, 1 }
  0xbd   : > { %1789 = vmatprep.subr.bf16.mxu0 %v3989_v1  ;;  %2376 = vmatprep.subr.bf16.mxu1 %v3989_v1 }
  0xbe   : > { %v4728_v34 = vsel %vm841_vm3, %v864_v48, %v868_v46  ;;  %v4742_v9 = vsel %vm841_vm3, %v868_v46, %v4365_v39  ;;  %v3955_v48 = vld [vmem:[%s5264_s1 + $0x2d0] sm:$0xff]   ;;  %v3974_v46 = vld [vmem:[%s4071_s16 + $0x40] ss:$8 sps:$4 sm:$0xff]  }
  0xbf   : > { %1790 = vmatpush1.bf16.msra.mxu0 %v3905_v61  ;;  %v4732_v61 = vsel %vm841_vm3, %v870_v53, %v4365_v39  ;;  %v3923_v39 = vld [vmem:[%s5264_s1 + $0x200] sm:$0xff]   ;;  %v3956_v53 = vld [vmem:[%s5264_s1 + $0x3cc] sm:$0xff]  }
  0xc0   : > { %1791 = vmatprep.subr.bf16.mxu0 %v3989_v1  ;;  %2377 = vmatpush1.bf16.msra.mxu1 %v3906_v2  ;;  %v3922_v2 = vld [vmem:[%s5264_s1 + $0x2f4] sm:$0xff]  }
  0xc1   : > { %2378 = vmatprep.subr.bf16.mxu1 %v3989_v1 }
  0xc2   : > { %1022 = vmatmul.mubr.bf16.gmra.mrb[8].mxu0 %v4613_v56  ;;  %1593 = vmatmul.mubr.bf16.gmra.mrb[8].mxu1 %v4613_v56 }
  0xc3   : > { %3143 = vmatprep.mubr.msk.bf16.mxu0 %vm505_vm1, %v4616_v5  ;;  %3263 = vmatprep.mubr.msk.bf16.mxu1 %vm505_vm1, %v4616_v5 }
  0xc4   : > { %1792 = vmatpush1.bf16.msra.mxu0 %v3907_v62  ;;  %2379 = vmatpush1.bf16.msra.mxu1 %v3908_v6  ;;  %v3926_v62 = vld [vmem:[%s5264_s1 + $0x304] sm:$0xff]   ;;  %v3928_v6 = vld [vmem:[%s5264_s1 + $0x30c] sm:$0xff]  }
  0xc5   : > { %1793 = vmatprep.subr.bf16.mxu0 %v3989_v1  ;;  %2380 = vmatprep.subr.bf16.mxu1 %v3989_v1 }
  0xc8   : > { %1794 = vmatpush1.bf16.msra.mxu0 %v3909_v11  ;;  %2381 = vmatpush1.bf16.msra.mxu1 %v3910_v13  ;;  %v3935_v11 = vld [vmem:[%s5264_s1 + $0x230] sm:$0xff]  }
  0xc9   : > { %1795 = vmatprep.subr.bf16.mxu0 %v3989_v1  ;;  %2382 = vmatprep.subr.bf16.mxu1 %v3989_v1  ;;  %v3936_v13 = vld [vmem:[%s5264_s1 + $0x32c] sm:$0xff]  }
  0xca   : > { %1030 = vmatmul.mubr.bf16.gmra.mrb[12].mxu0 %v4643_v12  ;;  %1601 = vmatmul.mubr.bf16.gmra.mrb[12].mxu1 %v4643_v12 }
  0xcb   : > { %3144 = vmatprep.mubr.msk.bf16.mxu0 %vm505_vm1, %v4646_v17  ;;  %3264 = vmatprep.mubr.msk.bf16.mxu1 %vm505_vm1, %v4646_v17 }
  0xcc   : > { %1796 = vmatpush1.bf16.msra.mxu0 %v3911_v15  ;;  %2383 = vmatpush1.bf16.msra.mxu1 %v3912_v18  ;;  %v3939_v15 = vld [vmem:[%s5264_s1 + $0x240] sm:$0xff]  }
  0xcd   : > { %1797 = vmatprep.subr.bf16.mxu0 %v3989_v1  ;;  %2384 = vmatprep.subr.bf16.mxu1 %v3989_v1  ;;  %v3940_v18 = vld [vmem:[%s5264_s1 + $0x33c] sm:$0xff]  }
  0xd0   : > { %1798 = vmatpush1.bf16.msra.mxu0 %v3913_v25  ;;  %2385 = vmatpush1.bf16.msra.mxu1 %v3914_v32  ;;  %v3970_v25 = vld [vmem:[%s4071_s16 + $0x20] ss:$8 sps:$4 sm:$0xff]   ;;  %v3971_v32 = vld [vmem:[%s4071_s16 + $0x34] ss:$8 sps:$4 sm:$0xff]  }
  0xd1   : > { %1799 = vmatprep.subr.bf16.mxu0 %v3989_v1  ;;  %2386 = vmatprep.subr.bf16.mxu1 %v3989_v1 }
  0xd2   : > { %1038 = vmatmul.mubr.bf16.gmra.mrb[16].mxu0 %v4673_v31  ;;  %1609 = vmatmul.mubr.bf16.gmra.mrb[16].mxu1 %v4673_v31 }
  0xd3   : > { %3145 = vmatprep.mubr.msk.bf16.mxu0 %vm505_vm1, %v4676_v36  ;;  %3265 = vmatprep.mubr.msk.bf16.mxu1 %vm505_vm1, %v4676_v36 }
  0xd4   : > { %1800 = vmatpush1.bf16.msra.mxu0 %v3915_v38  ;;  %2387 = vmatpush1.bf16.msra.mxu1 %v3916_v40  ;;  %v3953_v38 = vld [vmem:[%s5264_s1 + $0x2c8] sm:$0xff]  }
  0xd5   : > { %1801 = vmatprep.subr.bf16.mxu0 %v3989_v1  ;;  %2388 = vmatprep.subr.bf16.mxu1 %v3989_v1  ;;  %v3954_v40 = vld [vmem:[%s5264_s1 + $0x3c4] sm:$0xff]  }
  0xd8   : > { %1802 = vmatpush1.bf16.msra.mxu0 %v3917_v55  ;;  %2389 = vmatpush1.bf16.msra.mxu1 %v3918_v20  ;;  %v3972_v55 = vld [vmem:[%s4071_s16 + $0x30] ss:$8 sps:$4 sm:$0xff]   ;;  %v3973_v20 = vld [vmem:[%s4071_s16 + $0x44] ss:$8 sps:$4 sm:$0xff]  }
  0xd9   : > { %1803 = vmatprep.subr.bf16.mxu0 %v3989_v1  ;;  %2390 = vmatprep.subr.bf16.mxu1 %v3989_v1 }
  0xda   : > { %1046 = vmatmul.mubr.bf16.gmra.mrb[20].mxu0 %v4709_v58  ;;  %1617 = vmatmul.mubr.bf16.gmra.mrb[20].mxu1 %v4709_v58 }
  0xdb   : > { %3146 = vmatprep.mubr.msk.bf16.mxu0 %vm505_vm1, %v4712_v16  ;;  %3266 = vmatprep.mubr.msk.bf16.mxu1 %vm505_vm1, %v4712_v16 }
  0xdc   : > { %1804 = vmatpush1.bf16.msra.mxu0 %v1781_v59  ;;  %2391 = vmatpush1.bf16.msra.mxu1 %v2368_v27  ;;  %v3959_v59 = vld [vmem:[%s5264_s1 + $0x2e0] sm:$0xff]  }
  0xdd   : > { %1946 = vmatprep.subr.bf16.mxu0 %v3989_v1  ;;  %2533 = vmatprep.subr.bf16.mxu1 %v3989_v1  ;;  %v3960_v27 = vld [vmem:[%s5264_s1 + $0x3dc] sm:$0xff]  }
  0xe2   : > { %1054 = vmatmul.mubr.bf16.gmra.mrb[24].mxu0 %v4728_v34  ;;  %1625 = vmatmul.mubr.bf16.gmra.mrb[24].mxu1 %v4728_v34 }
  0xe3   : > { %3147 = vmatprep.mubr.msk.bf16.mxu0 %vm505_vm1, %v4732_v61  ;;  %3267 = vmatprep.mubr.msk.bf16.mxu1 %vm505_vm1, %v4732_v61 }
  0xea   : > { %1062 = vmatmul.mubr.bf16.gmra.mrb[28].mxu0 %v4742_v9  ;;  %1633 = vmatmul.mubr.bf16.gmra.mrb[28].mxu1 %v4742_v9 }
  0xeb   : > { %3321 = vmatprep.mubr.msk.bf16.mxu0 %vm505_vm1, %v4110_v29  ;;  %3441 = vmatprep.mubr.msk.bf16.mxu1 %vm505_vm1, %v4110_v29  ;;  %v3924_v29 = vld [vmem:[%s5264_s1 + $0x2fc] sm:$0xff]  }
  0xf2   : > { %1816 = vmatmul.mubr.bf16.vlgmr.msra.gmra.mrb[32].mxu0 %v4153_v49  ;;  %2403 = vmatmul.mubr.bf16.vlgmr.msra.gmra.mrb[32].mxu1 %v4153_v49  ;;  %v3925_v49 = vld [vmem:[%s5264_s1 + $0x208] sm:$0xff]  }
  0xf3   : > { %1947 = vmatpush1.bf16.msra.mxu0 %v3921_v0  ;;  %2534 = vmatpush1.bf16.msra.mxu1 %v3922_v2  ;;  %v3975_v0 = vld [vmem:[%s4071_s16 + $0x54] ss:$8 sps:$4 sm:$0xff]   ;;  %v3961_v2 = vld [vmem:[%s5264_s1 + $0x2e8] sm:$0xff]  }
  0xf4   : > { %1948 = vmatprep.subr.bf16.mxu0 %v3989_v1  ;;  %3322 = vmatprep.mubr.msk.bf16.mxu0 %vm505_vm1, %v4172_v57 }
  0xf5   : > { %3442 = vmatprep.mubr.msk.bf16.mxu1 %vm505_vm1, %v4172_v57  ;;  %2535 = vmatprep.subr.bf16.mxu1 %v3989_v1  ;;  %v3927_v57 = vld [vmem:[%s5264_s1 + $0x210] sm:$0xff]  }
  0xf7   : > { %1949 = vmatpush1.bf16.msra.mxu0 %v3923_v39  ;;  %2536 = vmatpush1.bf16.msra.mxu1 %v3924_v29  ;;  %v3962_v39 = vld [vmem:[%s5264_s1 + $0x3e4] sm:$0xff]   ;;  %v3963_v29 = vld [vmem:[%s5264_s1 + $0x2f0] ss:$0 sps:$4 sm:$0xff]  }
  0xf8   : > { %1950 = vmatprep.subr.bf16.mxu0 %v3989_v1  ;;  %2537 = vmatprep.subr.bf16.mxu1 %v3989_v1 }
  0xfa   : > { %1824 = vmatmul.mubr.bf16.gmra.mrb[36].mxu0 %v4192_v3  ;;  %2411 = vmatmul.mubr.bf16.gmra.mrb[36].mxu1 %v4192_v3  ;;  %v3929_v3 = vld [vmem:[%s5264_s1 + $0x218] sm:$0xff]  }
  0xfb   : > { %1951 = vmatpush1.bf16.msra.mxu0 %v3925_v49  ;;  %3323 = vmatprep.mubr.msk.bf16.mxu0 %vm505_vm1, %v4203_v8  ;;  %v3964_v49 = vld [vmem:[%s5264_s1 + $0x3ec] ss:$0 sps:$4 sm:$0xff]  }
  0xfc   : > { %3443 = vmatprep.mubr.msk.bf16.mxu1 %vm505_vm1, %v4203_v8  ;;  %2538 = vmatpush1.bf16.msra.mxu1 %v3926_v62  ;;  %v3930_v8 = vld [vmem:[%s5264_s1 + $0x314] sm:$0xff]   ;;  %v2129_v62 = vsel %vm530_vm2, %v3963_v29, 0 }
  0xfd   : > { %1952 = vmatprep.subr.bf16.mxu0 %v3989_v1  ;;  %2539 = vmatprep.subr.bf16.mxu1 %v3989_v1 }
  0xff   : > { %1953 = vmatpush1.bf16.msra.mxu0 %v3927_v57  ;;  %v3976_v57 = vld [vmem:[%s4071_s16 + $0x50] ss:$8 sps:$4 sm:$0xff]  }
 0x100   : > { %1954 = vmatprep.subr.bf16.mxu0 %v3989_v1  ;;  %2540 = vmatpush1.bf16.msra.mxu1 %v3928_v6  ;;  %v2716_v6 = vsel %vm530_vm2, %v3964_v49, 0 }
 0x101   : > { %2541 = vmatprep.subr.bf16.mxu1 %v3989_v1 }
 0x102   : > { %1832 = vmatmul.mubr.bf16.gmra.mrb[40].mxu0 %v4231_v23  ;;  %2419 = vmatmul.mubr.bf16.gmra.mrb[40].mxu1 %v4231_v23  ;;  %v3933_v23 = vld [vmem:[%s5264_s1 + $0x228] sm:$0xff]  }
 0x103   : > { %3324 = vmatprep.mubr.msk.bf16.mxu0 %vm505_vm1, %v4238_v26  ;;  %3444 = vmatprep.mubr.msk.bf16.mxu1 %vm505_vm1, %v4238_v26  ;;  %v3934_v26 = vld [vmem:[%s5264_s1 + $0x324] sm:$0xff]  }
 0x104   : > { %1955 = vmatpush1.bf16.msra.mxu0 %v3929_v3  ;;  %2542 = vmatpush1.bf16.msra.mxu1 %v3930_v8  ;;  %v3977_v3 = vld [vmem:[%s4071_s16 + $0x64] ss:$8 sps:$4 sm:$0xff]   ;;  %v3978_v8 = vld [vmem:[%s4071_s16 + $0x60] ss:$8 sps:$4 sm:$0xff]  }
 0x105   : > { %1956 = vmatprep.subr.bf16.mxu0 %v3989_v1  ;;  %2543 = vmatprep.subr.bf16.mxu1 %v3989_v1 }
 0x108   : > { %1957 = vmatpush1.bf16.msra.mxu0 %v3931_v7  ;;  %2544 = vmatpush1.bf16.msra.mxu1 %v3932_v10  ;;  %v3979_v7 = vld [vmem:[%s4071_s16 + $0x74] ss:$8 sps:$4 sm:$0xff]   ;;  %v3980_v10 = vld [vmem:[%s4071_s16 + $0x70] ss:$8 sps:$4 sm:$0xff]  }
 0x109   : > { %1958 = vmatprep.subr.bf16.mxu0 %v3989_v1  ;;  %2545 = vmatprep.subr.bf16.mxu1 %v3989_v1 }
 0x10a   : > { %1840 = vmatmul.mubr.bf16.gmra.mrb[44].mxu0 %v4268_v41  ;;  %2427 = vmatmul.mubr.bf16.gmra.mrb[44].mxu1 %v4268_v41  ;;  %v3937_v41 = vld [vmem:[%s5264_s1 + $0x238] sm:$0xff]  }
 0x10b   : > { %3325 = vmatprep.mubr.msk.bf16.mxu0 %vm505_vm1, %v4275_v45  ;;  %3445 = vmatprep.mubr.msk.bf16.mxu1 %vm505_vm1, %v4275_v45  ;;  %v3938_v45 = vld [vmem:[%s5264_s1 + $0x334] sm:$0xff]  }
 0x10c   : > { %1959 = vmatpush1.bf16.msra.mxu0 %v3933_v23  ;;  %2546 = vmatpush1.bf16.msra.mxu1 %v3934_v26 }
 0x10d   : > { %1960 = vmatprep.subr.bf16.mxu0 %v3989_v1  ;;  %2547 = vmatprep.subr.bf16.mxu1 %v3989_v1 }
 0x110   : > { %1961 = vmatpush1.bf16.msra.mxu0 %v3935_v11  ;;  %2548 = vmatpush1.bf16.msra.mxu1 %v3936_v13 }
 0x111   : > { %1962 = vmatprep.subr.bf16.mxu0 %v3989_v1  ;;  %2549 = vmatprep.subr.bf16.mxu1 %v3989_v1 }
 0x112   : > { %1848 = vmatmul.mubr.bf16.gmra.mrb[48].mxu0 %v4306_v63  ;;  %2435 = vmatmul.mubr.bf16.gmra.mrb[48].mxu1 %v4306_v63  ;;  %v3941_v63 = vld [vmem:[%s5264_s1 + $0x248] ss:$0 sps:$4 sm:$0xff]  }
 0x113   : > { %3326 = vmatprep.mubr.msk.bf16.mxu0 %vm505_vm1, %v4311_v4  ;;  %3446 = vmatprep.mubr.msk.bf16.mxu1 %vm505_vm1, %v4311_v4  ;;  %v3942_v4 = vld [vmem:[%s5264_s1 + $0x344] ss:$0 sps:$4 sm:$0xff]   ;;  %v1944_v19 = vsel %vm530_vm2, %v3941_v63, 0 }
 0x114   : > { %1963 = vmatpush1.bf16.msra.mxu0 %v3937_v41  ;;  %2550 = vmatpush1.bf16.msra.mxu1 %v3938_v45  ;;  %v2531_v21 = vsel %vm530_vm2, %v3942_v4, 0 }
 0x115   : > { %1964 = vmatprep.subr.bf16.mxu0 %v3989_v1  ;;  %2551 = vmatprep.subr.bf16.mxu1 %v3989_v1 }
 0x118   : > { %1965 = vmatpush1.bf16.msra.mxu0 %v3939_v15  ;;  %2552 = vmatpush1.bf16.msra.mxu1 %v3940_v18 }
 0x119   : > { %1966 = vmatprep.subr.bf16.mxu0 %v3989_v1  ;;  %2553 = vmatprep.subr.bf16.mxu1 %v3989_v1 }
 0x11a   : > { %1856 = vmatmul.mubr.bf16.gmra.mrb[52].mxu0 %v4346_v24  ;;  %2443 = vmatmul.mubr.bf16.gmra.mrb[52].mxu1 %v4346_v24  ;;  %v3943_v24 = vld [vmem:[%s5264_s1 + $0x2a0] sm:$0xff]  }
 0x11b   : > { %3327 = vmatprep.mubr.msk.bf16.mxu0 %vm505_vm1, %v4351_v30  ;;  %3447 = vmatprep.mubr.msk.bf16.mxu1 %vm505_vm1, %v4351_v30  ;;  %v3944_v30 = vld [vmem:[%s5264_s1 + $0x39c] sm:$0xff]  }
 0x11c   : > { %1967 = vmatpush1.bf16.msra.mxu0 %v1944_v19  ;;  %2554 = vmatpush1.bf16.msra.mxu1 %v2531_v21 }
 0x11d   : > { %2131 = vmatprep.subr.bf16.mxu0 %v3989_v1  ;;  %2718 = vmatprep.subr.bf16.mxu1 %v3989_v1 }
 0x122   : > { %1864 = vmatmul.mubr.bf16.gmra.mrb[56].mxu0 %v4370_v43  ;;  %2451 = vmatmul.mubr.bf16.gmra.mrb[56].mxu1 %v4370_v43  ;;  %v3945_v43 = vld [vmem:[%s5264_s1 + $0x2a8] sm:$0xff]  }
 0x123   : > { %3328 = vmatprep.mubr.msk.bf16.mxu0 %vm505_vm1, %v4375_v47  ;;  %3448 = vmatprep.mubr.msk.bf16.mxu1 %vm505_vm1, %v4375_v47  ;;  %v3946_v47 = vld [vmem:[%s5264_s1 + $0x3a4] sm:$0xff]  }
 0x12a   : > { %1872 = vmatmul.mubr.bf16.gmra.mrb[60].mxu0 %v4385_v50  ;;  %2459 = vmatmul.mubr.bf16.gmra.mrb[60].mxu1 %v4385_v50  ;;  %v3947_v50 = vld [vmem:[%s5264_s1 + $0x2b0] sm:$0xff]  }
 0x12b   : > { %3340 = vmatprep.mubr.msk.bf16.mxu0 %vm505_vm1, %v4526_v22  ;;  %3460 = vmatprep.mubr.msk.bf16.mxu1 %vm505_vm1, %v4526_v22  ;;  %v3948_v22 = vld [vmem:[%s5264_s1 + $0x3ac] sm:$0xff]  }
 0x132   : > { %1979 = vmatmul.mubr.bf16.vlgmr.msra.gmra.mrb[32].mxu0 %v4541_v35  ;;  %2566 = vmatmul.mubr.bf16.vlgmr.msra.gmra.mrb[32].mxu1 %v4541_v35  ;;  %v3950_v35 = vld [vmem:[%s5264_s1 + $0x3b4] sm:$0xff]  }
 0x133   : > { %2132 = vmatpush1.bf16.msra.mxu0 %v3943_v24  ;;  %2719 = vmatpush1.bf16.msra.mxu1 %v3944_v30 }
 0x134   : > { %2133 = vmatprep.subr.bf16.mxu0 %v3989_v1  ;;  %3341 = vmatprep.mubr.msk.bf16.mxu0 %vm505_vm1, %v4530_v28 }
 0x135   : > { %3461 = vmatprep.mubr.msk.bf16.mxu1 %vm505_vm1, %v4530_v28  ;;  %2720 = vmatprep.subr.bf16.mxu1 %v3989_v1  ;;  %v3949_v28 = vld [vmem:[%s5264_s1 + $0x2b8] sm:$0xff]  }
 0x137   : > { %2134 = vmatpush1.bf16.msra.mxu0 %v3945_v43  ;;  %2721 = vmatpush1.bf16.msra.mxu1 %v3946_v47 }
 0x138   : > { %2135 = vmatprep.subr.bf16.mxu0 %v3989_v1  ;;  %2722 = vmatprep.subr.bf16.mxu1 %v3989_v1 }
 0x13a   : > { %1987 = vmatmul.mubr.bf16.gmra.mrb[36].mxu0 %v4545_v37  ;;  %2574 = vmatmul.mubr.bf16.gmra.mrb[36].mxu1 %v4545_v37  ;;  %v3951_v37 = vld [vmem:[%s5264_s1 + $0x2c0] sm:$0xff]  }
 0x13b   : > { %2136 = vmatpush1.bf16.msra.mxu0 %v3947_v50  ;;  %3342 = vmatprep.mubr.msk.bf16.mxu0 %vm505_vm1, %v4551_v44 }
 0x13c   : > { %3462 = vmatprep.mubr.msk.bf16.mxu1 %vm505_vm1, %v4551_v44  ;;  %2723 = vmatpush1.bf16.msra.mxu1 %v3948_v22  ;;  %v3952_v44 = vld [vmem:[%s5264_s1 + $0x3bc] sm:$0xff]  }
 0x13d   : > { %2137 = vmatprep.subr.bf16.mxu0 %v3989_v1  ;;  %2724 = vmatprep.subr.bf16.mxu1 %v3989_v1 }
 0x13f   : > { %2138 = vmatpush1.bf16.msra.mxu0 %v3949_v28 }
 0x140   : > { %2139 = vmatprep.subr.bf16.mxu0 %v3989_v1  ;;  %2725 = vmatpush1.bf16.msra.mxu1 %v3950_v35 }
 0x141   : > { %2726 = vmatprep.subr.bf16.mxu1 %v3989_v1 }
 0x142   : > { %1995 = vmatmul.mubr.bf16.gmra.mrb[40].mxu0 %v3970_v25  ;;  %2582 = vmatmul.mubr.bf16.gmra.mrb[40].mxu1 %v3970_v25 }
 0x143   : > { %3343 = vmatprep.mubr.msk.bf16.mxu0 %vm505_vm1, %v3971_v32  ;;  %3463 = vmatprep.mubr.msk.bf16.mxu1 %vm505_vm1, %v3971_v32 }
 0x144   : > { %2140 = vmatpush1.bf16.msra.mxu0 %v3951_v37  ;;  %2727 = vmatpush1.bf16.msra.mxu1 %v3952_v44 }
 0x145   : > { %2141 = vmatprep.subr.bf16.mxu0 %v3989_v1  ;;  %2728 = vmatprep.subr.bf16.mxu1 %v3989_v1 }
 0x148   : > { %2142 = vmatpush1.bf16.msra.mxu0 %v3953_v38  ;;  %2729 = vmatpush1.bf16.msra.mxu1 %v3954_v40 }
 0x149   : > { %2143 = vmatprep.subr.bf16.mxu0 %v3989_v1  ;;  %2730 = vmatprep.subr.bf16.mxu1 %v3989_v1 }
 0x14a   : > { %2003 = vmatmul.mubr.bf16.gmra.mrb[44].mxu0 %v3972_v55  ;;  %2590 = vmatmul.mubr.bf16.gmra.mrb[44].mxu1 %v3972_v55 }
 0x14b   : > { %3344 = vmatprep.mubr.msk.bf16.mxu0 %vm505_vm1, %v3973_v20  ;;  %3464 = vmatprep.mubr.msk.bf16.mxu1 %vm505_vm1, %v3973_v20 }
 0x14c   : > { %2144 = vmatpush1.bf16.msra.mxu0 %v3955_v48  ;;  %2731 = vmatpush1.bf16.msra.mxu1 %v3956_v53 }
 0x14d   : > { %2145 = vmatprep.subr.bf16.mxu0 %v3989_v1  ;;  %2732 = vmatprep.subr.bf16.mxu1 %v3989_v1 }
 0x150   : > { %2146 = vmatpush1.bf16.msra.mxu0 %v3957_v52  ;;  %2733 = vmatpush1.bf16.msra.mxu1 %v3958_v54 }
 0x151   : > { %2147 = vmatprep.subr.bf16.mxu0 %v3989_v1  ;;  %2734 = vmatprep.subr.bf16.mxu1 %v3989_v1 }
 0x152   : > { %2011 = vmatmul.mubr.bf16.gmra.mrb[48].mxu0 %v3974_v46  ;;  %2598 = vmatmul.mubr.bf16.gmra.mrb[48].mxu1 %v3974_v46 }
 0x153   : > { %3345 = vmatprep.mubr.msk.bf16.mxu0 %vm505_vm1, %v3975_v0  ;;  %3465 = vmatprep.mubr.msk.bf16.mxu1 %vm505_vm1, %v3975_v0 }
 0x154   : > { %2148 = vmatpush1.bf16.msra.mxu0 %v3959_v59  ;;  %2735 = vmatpush1.bf16.msra.mxu1 %v3960_v27 }
 0x155   : > { %2149 = vmatprep.subr.bf16.mxu0 %v3989_v1  ;;  %2736 = vmatprep.subr.bf16.mxu1 %v3989_v1 }
 0x158   : > { %2150 = vmatpush1.bf16.msra.mxu0 %v3961_v2  ;;  %2737 = vmatpush1.bf16.msra.mxu1 %v3962_v39 }
 0x159   : > { %2151 = vmatprep.subr.bf16.mxu0 %v3989_v1  ;;  %2738 = vmatprep.subr.bf16.mxu1 %v3989_v1 }
 0x15a   : > { %2019 = vmatmul.mubr.bf16.gmra.mrb[52].mxu0 %v3976_v57  ;;  %2606 = vmatmul.mubr.bf16.gmra.mrb[52].mxu1 %v3976_v57 }
 0x15b   : > { %3346 = vmatprep.mubr.msk.bf16.mxu0 %vm505_vm1, %v3977_v3  ;;  %3466 = vmatprep.mubr.msk.bf16.mxu1 %vm505_vm1, %v3977_v3 }
 0x15c   : > { %2152 = vmatpush1.bf16.msra.mxu0 %v2129_v62  ;;  %2739 = vmatpush1.bf16.msra.mxu1 %v2716_v6 }
 0x162   : > { %2027 = vmatmul.mubr.bf16.gmra.mrb[56].mxu0 %v3978_v8  ;;  %2614 = vmatmul.mubr.bf16.gmra.mrb[56].mxu1 %v3978_v8 }
 0x163   : > { %3347 = vmatprep.mubr.msk.bf16.mxu0 %vm505_vm1, %v3979_v7  ;;  %3467 = vmatprep.mubr.msk.bf16.mxu1 %vm505_vm1, %v3979_v7 }
 0x16a   : > { %2035 = vmatmul.mubr.bf16.gmra.mrb[60].mxu0 %v3980_v10  ;;  %2622 = vmatmul.mubr.bf16.gmra.mrb[60].mxu1 %v3980_v10 }
 0x16b   : > { %3380 = vmatprep.mubr.msk.bf16.mxu0 %vm505_vm1, %v4534_v33  ;;  %3500 = vmatprep.mubr.msk.bf16.mxu1 %vm505_vm1, %v4534_v33 }
 0x172   : > { %2164 = vmatmul.mubr.bf16.vlgmr.msra.gmra.mrb[32].mxu0 %v4555_v51  ;;  %2751 = vmatmul.mubr.bf16.vlgmr.msra.gmra.mrb[32].mxu1 %v4555_v51 }
 0x173   : > { %3381 = vmatprep.mubr.msk.bf16.mxu0 %vm505_vm1, %v4565_v14  ;;  %3501 = vmatprep.mubr.msk.bf16.mxu1 %vm505_vm1, %v4565_v14 }
 0x17a   : > { %2172 = vmatmul.mubr.bf16.gmra.mrb[36].mxu0 %v4583_v42  ;;  %2759 = vmatmul.mubr.bf16.gmra.mrb[36].mxu1 %v4583_v42 }
 0x17b   : > { %3382 = vmatprep.mubr.msk.bf16.mxu0 %vm505_vm1, %v4591_v60  ;;  %3502 = vmatprep.mubr.msk.bf16.mxu1 %vm505_vm1, %v4591_v60 }
 0x182   : > { %2180 = vmatmul.mubr.bf16.gmra.mrb[40].mxu0 %v4613_v56  ;;  %2767 = vmatmul.mubr.bf16.gmra.mrb[40].mxu1 %v4613_v56 }
 0x183   : > { %3383 = vmatprep.mubr.msk.bf16.mxu0 %vm505_vm1, %v4616_v5  ;;  %3503 = vmatprep.mubr.msk.bf16.mxu1 %vm505_vm1, %v4616_v5 }
 0x185   : > { %v5031_v1 = vpop.f32.mrb[0].mxu0  ;;  %v5033_v33 = vpop.f32.mrb[0].mxu1 }
 0x186   : > { %v1009_v51 = vpop.f32.mrb[1].mxu0  ;;  %v1657_v14 = vmax.f32 %v5031_v1, %v5033_v33  ;;  %v1580_v42 = vpop.f32.mrb[1].mxu1 }
 0x187   : > { %v5037_v60 = vpop.f32.mrb[2].mxu0  ;;  %v5039_v23 = vpop.f32.mrb[2].mxu1 }
 0x188   : > { %v1012_v56 = vpop.f32.mrb[3].mxu0  ;;  %v1658_v26 = vmax.f32 %v5037_v60, %v5039_v23  ;;  %v1583_v11 = vpop.f32.mrb[3].mxu1 }
 0x18a   : > { %2188 = vmatmul.mubr.bf16.gmra.mrb[44].mxu0 %v4643_v12  ;;  %2775 = vmatmul.mubr.bf16.gmra.mrb[44].mxu1 %v4643_v12 }
 0x18b   : > { %3384 = vmatprep.mubr.msk.bf16.mxu0 %vm505_vm1, %v4646_v17  ;;  %3504 = vmatprep.mubr.msk.bf16.mxu1 %vm505_vm1, %v4646_v17 }
 0x18d   : > { %v5049_v5 = vpop.f32.mrb[4].mxu0  ;;  %v5051_v13 = vpop.f32.mrb[4].mxu1 }
 0x18e   : > { %v1017_v41 = vpop.f32.mrb[5].mxu0  ;;  %v1659_v45 = vmax.f32 %v5049_v5, %v5051_v13  ;;  %v1588_v15 = vpop.f32.mrb[5].mxu1 }
 0x18f   : > { %v5055_v18 = vpop.f32.mrb[6].mxu0  ;;  %v5057_v63 = vpop.f32.mrb[6].mxu1 }
 0x190   : > { %v1020_v12 = vpop.f32.mrb[7].mxu0  ;;  %v1660_v4 = vmax.f32 %v5055_v18, %v5057_v63  ;;  %v1591_v19 = vpop.f32.mrb[7].mxu1 }
 0x192   : > { %2196 = vmatmul.mubr.bf16.gmra.mrb[48].mxu0 %v4673_v31  ;;  %2783 = vmatmul.mubr.bf16.gmra.mrb[48].mxu1 %v4673_v31 }
 0x193   : > { %3385 = vmatprep.mubr.msk.bf16.mxu0 %vm505_vm1, %v4676_v36  ;;  %3505 = vmatprep.mubr.msk.bf16.mxu1 %vm505_vm1, %v4676_v36 }
 0x195   : > { %v5067_v17 = vpop.f32.mrb[8].mxu0  ;;  %v5069_v21 = vpop.f32.mrb[8].mxu1 }
 0x196   : > { %v1025_v24 = vpop.f32.mrb[9].mxu0  ;;  %v1661_v30 = vmax.f32 %v5067_v17, %v5069_v21  ;;  %v1596_v43 = vpop.f32.mrb[9].mxu1 }
 0x197   : > { %v5073_v47 = vpop.f32.mrb[10].mxu0  ;;  %v5075_v50 = vpop.f32.mrb[10].mxu1 }
 0x198   : > { %v1028_v31 = vpop.f32.mrb[11].mxu0  ;;  %v1662_v22 = vmax.f32 %v5073_v47, %v5075_v50  ;;  %v1599_v28 = vpop.f32.mrb[11].mxu1 }
 0x19a   : > { %2204 = vmatmul.mubr.bf16.gmra.mrb[52].mxu0 %v4709_v58  ;;  %2791 = vmatmul.mubr.bf16.gmra.mrb[52].mxu1 %v4709_v58 }
 0x19b   : > { %3386 = vmatprep.mubr.msk.bf16.mxu0 %vm505_vm1, %v4712_v16  ;;  %3506 = vmatprep.mubr.msk.bf16.mxu1 %vm505_vm1, %v4712_v16 }
 0x19d   : > { %v5085_v36 = vpop.f32.mrb[12].mxu0  ;;  %v5087_v35 = vpop.f32.mrb[12].mxu1 }
 0x19e   : > { %v1033_v37 = vpop.f32.mrb[13].mxu0  ;;  %v1663_v44 = vmax.f32 %v5085_v36, %v5087_v35  ;;  %v1604_v25 = vpop.f32.mrb[13].mxu1 }
 0x19f   : > { %v5091_v32 = vpop.f32.mrb[14].mxu0  ;;  %v5093_v38 = vpop.f32.mrb[14].mxu1 }
 0x1a0   : > { %v1036_v58 = vpop.f32.mrb[15].mxu0  ;;  %v1664_v40 = vmax.f32 %v5091_v32, %v5093_v38  ;;  %v1607_v48 = vpop.f32.mrb[15].mxu1 }
 0x1a2   : > { %2212 = vmatmul.mubr.bf16.gmra.mrb[56].mxu0 %v4728_v34  ;;  %2799 = vmatmul.mubr.bf16.gmra.mrb[56].mxu1 %v4728_v34 }
 0x1a3   : > { %3387 = vmatprep.mubr.msk.bf16.mxu0 %vm505_vm1, %v4732_v61  ;;  %3507 = vmatprep.mubr.msk.bf16.mxu1 %vm505_vm1, %v4732_v61 }
 0x1a5   : > { %v5103_v16 = vpop.f32.mrb[16].mxu0  ;;  %v5105_v53 = vpop.f32.mrb[16].mxu1 }
 0x1a6   : > { %v1041_v55 = vpop.f32.mrb[17].mxu0  ;;  %v1665_v20 = vmax.f32 %v5103_v16, %v5105_v53  ;;  %v1612_v52 = vpop.f32.mrb[17].mxu1 }
 0x1a7   : > { %v5109_v54 = vpop.f32.mrb[18].mxu0  ;;  %v5111_v59 = vpop.f32.mrb[18].mxu1 }
 0x1a8   : > { %v1044_v34 = vpop.f32.mrb[19].mxu0  ;;  %v1666_v27 = vmax.f32 %v5109_v54, %v5111_v59  ;;  %v1615_v46 = vpop.f32.mrb[19].mxu1 }
 0x1aa   : > { %2220 = vmatmul.mubr.bf16.gmra.mrb[60].mxu0 %v4742_v9  ;;  %2807 = vmatmul.mubr.bf16.gmra.mrb[60].mxu1 %v4742_v9 }
 0x1ad   : > { %v5117_v61 = vpop.f32.mrb[20].mxu0  ;;  %v5119_v0 = vpop.f32.mrb[20].mxu1 }
 0x1ae   : > { %v1049_v2 = vpop.f32.mrb[21].mxu0  ;;  %v1667_v39 = vmax.f32 %v5117_v61, %v5119_v0  ;;  %v1620_v29 = vpop.f32.mrb[21].mxu1 }
 0x1af   : > { %v5123_v49 = vpop.f32.mrb[22].mxu0  ;;  %v5125_v62 = vpop.f32.mrb[22].mxu1  ;;  %v5159_v2 = vld [vmem:[%s5265_s2] ss:$0 sm:$0xff] }
 0x1b0   : > { %v1052_v57 = vpop.f32.mrb[23].mxu0  ;;  %v1668_v6 = vmax.f32 %v5123_v49, %v5125_v62  ;;  %v1623_v3 = vpop.f32.mrb[23].mxu1 }
 0x1b5   : > { %v5129_v8 = vpop.f32.mrb[24].mxu0  ;;  %v5131_v9 = vpop.f32.mrb[24].mxu1 }
 0x1b6   : > { %v1057_v7 = vpop.f32.mrb[25].mxu0  ;;  %v1669_v10 = vmax.f32 %v5129_v8, %v5131_v9  ;;  %v1628_v51 = vpop.f32.mrb[25].mxu1 }
 0x1b7   : > { %v5135_v42 = vpop.f32.mrb[26].mxu0  ;;  %v5137_v56 = vpop.f32.mrb[26].mxu1 }
 0x1b8   : > { %v1060_v11 = vpop.f32.mrb[27].mxu0  ;;  %v1670_v41 = vmax.f32 %v5135_v42, %v5137_v56  ;;  %v1631_v15 = vpop.f32.mrb[27].mxu1 }
 0x1bd   : > { %v5141_v12 = vpop.f32.mrb[28].mxu0  ;;  %v5143_v19 = vpop.f32.mrb[28].mxu1 }
 0x1be   : > { %v1065_v24 = vpop.f32.mrb[29].mxu0  ;;  %v1671_v43 = vmax.f32 %v5141_v12, %v5143_v19  ;;  %v1636_v31 = vpop.f32.mrb[29].mxu1 }
 0x1bf   : > { %v5147_v28 = vpop.f32.mrb[30].mxu0  ;;  %v5149_v37 = vpop.f32.mrb[30].mxu1 }
 0x1c0   : > { %v1068_v25 = vpop.f32.mrb[31].mxu0  ;;  %v1672_v58 = vmax.f32 %v5147_v28, %v5149_v37  ;;  %v1639_v48 = vpop.f32.mrb[31].mxu1 }
 0x245   : > { %v2165_v55 = vpop.f32.mrb[32].mxu0  ;;  %v2752_v34 = vpop.f32.mrb[32].mxu1 }
 0x246   : > { %v2244_v52 = vmax.f32 %v1657_v14, %v2165_v55  ;;  %v2167_v46 = vpop.f32.mrb[33].mxu0  ;;  %v2754_v29 = vpop.f32.mrb[33].mxu1 }
 0x247   : > { %v2168_v57 = vpop.f32.mrb[34].mxu0  ;;  %v2755_v51 = vpop.f32.mrb[34].mxu1 }
 0x248   : > { %v2831_v3 = vmax.f32 %v2244_v52, %v2752_v34  ;;  %v2245_v7 = vmax.f32 %v1658_v26, %v2168_v57  ;;  %v2170_v11 = vpop.f32.mrb[35].mxu0  ;;  %v2757_v15 = vpop.f32.mrb[35].mxu1 }
 0x24a   : > { %v2854_v1 = vadd.f32 %v5159_v2, %v2831_v3  ;;  %v2832_v33 = vmax.f32 %v2245_v7, %v2755_v51 }
 0x24c   : > { %v2870_v14 = vmax.f32 %v2854_v1, 0.0  ;;  %v2855_v24 = vadd.f32 %v5159_v2, %v2832_v33 }
 0x24d   : > { %v2173_v60 = vpop.f32.mrb[36].mxu0  ;;  %v2760_v25 = vpop.f32.mrb[36].mxu1 }
 0x24e   : > { %v3528_v23 = vpack.c.bf16 %v2870_v14, %v2870_v14  ;;  %v2871_v26 = vmax.f32 %v2855_v24, 0.0  ;;  %v2246_v31 = vmax.f32 %v1659_v45, %v2173_v60  ;;  %v2175_v48 = vpop.f32.mrb[37].mxu0  ;;  %v2762_v55 = vpop.f32.mrb[37].mxu1 }
 0x24f   : > { %v2176_v52 = vpop.f32.mrb[38].mxu0  ;;  %v2763_v57 = vpop.f32.mrb[38].mxu1 }
 0x250   : > { %2951 = vst.msk [vmem:[%s5170_s21] sm:$0xf] %vm2950_vm4, %v3528_v23  ;;  %v3529_v34 = vpack.c.bf16 %v2871_v26, %v2871_v26  ;;  %v2833_v46 = vmax.f32 %v2246_v31, %v2760_v25  ;;  %v2247_v29 = vmax.f32 %v1660_v4, %v2176_v52  ;;  %v2178_v3 = vpop.f32.mrb[39].mxu0  ;;  %v2765_v7 = vpop.f32.mrb[39].mxu1 }
 0x252   : > { %2952 = vst.msk [vmem:[%s5170_s21 + $0x4] sm:$0xf] %vm2950_vm4, %v3529_v34  ;;  %v2856_v5 = vadd.f32 %v5159_v2, %v2833_v46  ;;  %v2834_v13 = vmax.f32 %v2247_v29, %v2763_v57 }
 0x254   : > { %v2872_v45 = vmax.f32 %v2856_v5, 0.0  ;;  %v2857_v51 = vadd.f32 %v5159_v2, %v2834_v13 }
 0x255   : > { %v2181_v11 = vpop.f32.mrb[40].mxu0  ;;  %v2768_v63 = vpop.f32.mrb[40].mxu1 }
 0x256   : > { %v3530_v15 = vpack.c.bf16 %v2872_v45, %v2872_v45  ;;  %v2873_v1 = vmax.f32 %v2857_v51, 0.0  ;;  %v2248_v18 = vmax.f32 %v1661_v30, %v2181_v11  ;;  %v2183_v4 = vpop.f32.mrb[41].mxu0  ;;  %v2770_v33 = vpop.f32.mrb[41].mxu1 }
 0x257   : > { %v2184_v14 = vpop.f32.mrb[42].mxu0  ;;  %v2771_v26 = vpop.f32.mrb[42].mxu1 }
 0x258   : > { %2953 = vst.msk [vmem:[%s5170_s21 + $0x8] sm:$0xf] %vm2950_vm4, %v3530_v15  ;;  %v3531_v24 = vpack.c.bf16 %v2873_v1, %v2873_v1  ;;  %v2835_v60 = vmax.f32 %v2248_v18, %v2768_v63  ;;  %v2249_v23 = vmax.f32 %v1662_v22, %v2184_v14  ;;  %v2186_v31 = vpop.f32.mrb[43].mxu0  ;;  %v2773_v25 = vpop.f32.mrb[43].mxu1 }
 0x25a   : > { %2954 = vst.msk [vmem:[%s5170_s21 + $0xc] sm:$0xf] %vm2950_vm4, %v3531_v24  ;;  %v2858_v17 = vadd.f32 %v5159_v2, %v2835_v60  ;;  %v2836_v21 = vmax.f32 %v2249_v23, %v2771_v26 }
 0x25c   : > { %v2874_v30 = vmax.f32 %v2858_v17, 0.0  ;;  %v2859_v48 = vadd.f32 %v5159_v2, %v2836_v21 }
 0x25d   : > { %v2189_v55 = vpop.f32.mrb[44].mxu0  ;;  %v2776_v50 = vpop.f32.mrb[44].mxu1 }
 0x25e   : > { %v3532_v52 = vpack.c.bf16 %v2874_v30, %v2874_v30  ;;  %v2875_v34 = vmax.f32 %v2859_v48, 0.0  ;;  %v2250_v47 = vmax.f32 %v1663_v44, %v2189_v55  ;;  %v2191_v22 = vpop.f32.mrb[45].mxu0  ;;  %v2778_v46 = vpop.f32.mrb[45].mxu1 }
 0x25f   : > { %v2192_v29 = vpop.f32.mrb[46].mxu0  ;;  %v2779_v5 = vpop.f32.mrb[46].mxu1 }
 0x260   : > { %2955 = vst.msk [vmem:[%s5170_s21 + $0x10] sm:$0xf] %vm2950_vm4, %v3532_v52  ;;  %v3533_v57 = vpack.c.bf16 %v2875_v34, %v2875_v34  ;;  %v2837_v3 = vmax.f32 %v2250_v47, %v2776_v50  ;;  %v2251_v7 = vmax.f32 %v1664_v40, %v2192_v29  ;;  %v2194_v13 = vpop.f32.mrb[47].mxu0  ;;  %v2781_v45 = vpop.f32.mrb[47].mxu1 }
 0x262   : > { %2956 = vst.msk [vmem:[%s5170_s21 + $0x14] sm:$0xf] %vm2950_vm4, %v3533_v57  ;;  %v2860_v36 = vadd.f32 %v5159_v2, %v2837_v3  ;;  %v2838_v35 = vmax.f32 %v2251_v7, %v2779_v5 }
 0x264   : > { %v2876_v44 = vmax.f32 %v2860_v36, 0.0  ;;  %v2861_v51 = vadd.f32 %v5159_v2, %v2838_v35 }
 0x265   : > { %v2197_v11 = vpop.f32.mrb[48].mxu0  ;;  %v2784_v38 = vpop.f32.mrb[48].mxu1 }
 0x266   : > { %v3534_v15 = vpack.c.bf16 %v2876_v44, %v2876_v44  ;;  %v2877_v1 = vmax.f32 %v2861_v51, 0.0  ;;  %v2252_v32 = vmax.f32 %v1665_v20, %v2197_v11  ;;  %v2199_v40 = vpop.f32.mrb[49].mxu0  ;;  %v2786_v18 = vpop.f32.mrb[49].mxu1 }
 0x267   : > { %v2200_v63 = vpop.f32.mrb[50].mxu0  ;;  %v2787_v24 = vpop.f32.mrb[50].mxu1 }
 0x268   : > { %2957 = vst.msk [vmem:[%s5170_s21 + $0x18] sm:$0xf] %vm2950_vm4, %v3534_v15  ;;  %v3535_v4 = vpack.c.bf16 %v2877_v1, %v2877_v1  ;;  %v2839_v33 = vmax.f32 %v2252_v32, %v2784_v38  ;;  %v2253_v14 = vmax.f32 %v1666_v27, %v2200_v63  ;;  %v2202_v60 = vpop.f32.mrb[51].mxu0  ;;  %v2789_v23 = vpop.f32.mrb[51].mxu1 }
 0x26a   : > { %2958 = vst.msk [vmem:[%s5170_s21 + $0x1c] sm:$0xf] %vm2950_vm4, %v3535_v4  ;;  %v2862_v16 = vadd.f32 %v5159_v2, %v2839_v33  ;;  %v2840_v53 = vmax.f32 %v2253_v14, %v2787_v24 }
 0x26c   : > { %v2878_v20 = vmax.f32 %v2862_v16, 0.0  ;;  %v2863_v26 = vadd.f32 %v5159_v2, %v2840_v53 }
 0x26d   : > { %v2205_v31 = vpop.f32.mrb[52].mxu0  ;;  %v2792_v59 = vpop.f32.mrb[52].mxu1 }
 0x26e   : > { %v3536_v25 = vpack.c.bf16 %v2878_v20, %v2878_v20  ;;  %v2879_v17 = vmax.f32 %v2863_v26, 0.0  ;;  %v2254_v54 = vmax.f32 %v1667_v39, %v2205_v31  ;;  %v2207_v27 = vpop.f32.mrb[53].mxu0  ;;  %v2794_v21 = vpop.f32.mrb[53].mxu1 }
 0x26f   : > { %v2208_v30 = vpop.f32.mrb[54].mxu0  ;;  %v2795_v34 = vpop.f32.mrb[54].mxu1 }
 0x270   : > { %2959 = vst.msk [vmem:[%s5170_s21 + $0x20] sm:$0xf] %vm2950_vm4, %v3536_v25  ;;  %v3537_v48 = vpack.c.bf16 %v2879_v17, %v2879_v17  ;;  %v2841_v55 = vmax.f32 %v2254_v54, %v2792_v59  ;;  %v2255_v52 = vmax.f32 %v1668_v6, %v2208_v30  ;;  %v2210_v47 = vpop.f32.mrb[55].mxu0  ;;  %v2797_v50 = vpop.f32.mrb[55].mxu1 }
 0x272   : > { %2960 = vst.msk [vmem:[%s5170_s21 + $0x24] sm:$0xf] %vm2950_vm4, %v3537_v48  ;;  %v2864_v61 = vadd.f32 %v5159_v2, %v2841_v55  ;;  %v2842_v0 = vmax.f32 %v2255_v52, %v2795_v34 }
 0x274   : > { %v2880_v39 = vmax.f32 %v2864_v61, 0.0  ;;  %v2865_v22 = vadd.f32 %v5159_v2, %v2842_v0 }
 0x275   : > { %v2213_v46 = vpop.f32.mrb[56].mxu0  ;;  %v2800_v62 = vpop.f32.mrb[56].mxu1 }
 0x276   : > { %v3538_v29 = vpack.c.bf16 %v2880_v39, %v2880_v39  ;;  %v2881_v57 = vmax.f32 %v2865_v22, 0.0  ;;  %v2256_v49 = vmax.f32 %v1669_v10, %v2213_v46  ;;  %v2215_v6 = vpop.f32.mrb[57].mxu0  ;;  %v2802_v3 = vpop.f32.mrb[57].mxu1 }
 0x277   : > { %v2216_v7 = vpop.f32.mrb[58].mxu0  ;;  %v2803_v36 = vpop.f32.mrb[58].mxu1 }
 0x278   : > { %2961 = vst.msk [vmem:[%s5170_s21 + $0x28] sm:$0xf] %vm2950_vm4, %v3538_v29  ;;  %v3539_v5 = vpack.c.bf16 %v2881_v57, %v2881_v57  ;;  %v2843_v13 = vmax.f32 %v2256_v49, %v2800_v62  ;;  %v2257_v45 = vmax.f32 %v1670_v41, %v2216_v7  ;;  %v2218_v35 = vpop.f32.mrb[59].mxu0  ;;  %v2805_v44 = vpop.f32.mrb[59].mxu1 }
 0x27a   : > { %2962 = vst.msk [vmem:[%s5170_s21 + $0x2c] sm:$0xf] %vm2950_vm4, %v3539_v5  ;;  %v2866_v8 = vadd.f32 %v5159_v2, %v2843_v13  ;;  %v2844_v9 = vmax.f32 %v2257_v45, %v2803_v36 }
 0x27c   : > { %v2882_v10 = vmax.f32 %v2866_v8, 0.0  ;;  %v2867_v51 = vadd.f32 %v5159_v2, %v2844_v9 }
 0x27d   : > { %v2221_v11 = vpop.f32.mrb[60].mxu0  ;;  %v2808_v56 = vpop.f32.mrb[60].mxu1 }
 0x27e   : > { %v3540_v15 = vpack.c.bf16 %v2882_v10, %v2882_v10  ;;  %v2883_v1 = vmax.f32 %v2867_v51, 0.0  ;;  %v2258_v42 = vmax.f32 %v1671_v43, %v2221_v11  ;;  %v2223_v41 = vpop.f32.mrb[61].mxu0  ;;  %v2810_v32 = vpop.f32.mrb[61].mxu1 }
 0x27f   : > { %v2224_v38 = vpop.f32.mrb[62].mxu0  ;;  %v2811_v4 = vpop.f32.mrb[62].mxu1 }
 0x280   : > { %2963 = vst.msk [vmem:[%s5170_s21 + $0x30] sm:$0xf] %vm2950_vm4, %v3540_v15  ;;  %v3541_v40 = vpack.c.bf16 %v2883_v1, %v2883_v1  ;;  %v2845_v18 = vmax.f32 %v2258_v42, %v2808_v56  ;;  %v2259_v63 = vmax.f32 %v1672_v58, %v2224_v38  ;;  %v2226_v33 = vpop.f32.mrb[63].mxu0  ;;  %v2813_v14 = vpop.f32.mrb[63].mxu1 }
 0x282   : > { %2964 = vst.msk [vmem:[%s5170_s21 + $0x34] sm:$0xf] %vm2950_vm4, %v3541_v40  ;;  %v2868_v12 = vadd.f32 %v5159_v2, %v2845_v18  ;;  %v2846_v19 = vmax.f32 %v2259_v63, %v2811_v4 }
 0x284   : > { %v2884_v43 = vmax.f32 %v2868_v12, 0.0  ;;  %v2869_v24 = vadd.f32 %v5159_v2, %v2846_v19 }
 0x286   : > { %v3542_v60 = vpack.c.bf16 %v2884_v43, %v2884_v43  ;;  %v2885_v23 = vmax.f32 %v2869_v24, 0.0 }
 0x288   : > { %2965 = vst.msk [vmem:[%s5170_s21 + $0x38] sm:$0xf] %vm2950_vm4, %v3542_v60  ;;  %v3543_v16 = vpack.c.bf16 %v2885_v23, %v2885_v23 }
 0x28a   : > { %2966 = vst.msk [vmem:[%s5170_s21 + $0x3c] sm:$0xf] %vm2950_vm4, %v3543_v16 }
 0x28b PF: > { %s13_s12 = sadd.s32 1, %s3987_s12  }
 0x28c   : > { %p10_p4 = scmp.ge.s32.totalorder %s13_s12, 4  }
 0x28e   :  { %12 = sbr.rel (!%p10_p4) target bundleno = 1 (0x1), region = 73 }

</bundles_post_ra>
